<compile_context>
chip_gen: v6e
topology: v6e:2x2x1
jax: 0.10.0
libtpu: 0.0.40
codegen_flags: <defaults>
</compile_context>

<pallas_src>
import functools

import jax
import jax.numpy as jnp
from jax import lax
from jax.experimental import pallas as pl
from jax.experimental.pallas import tpu as pltpu

# ---------------- synthetic config (small) ----------------
B = 2            # batch
S = 8            # sequence length
H = 32           # config.hidden_size
FF = 4 * H       # BERT FFN intermediate
C = 8            # config.num_class (CRF tags)
VOCAB = 32
NTYPE = 2        # token_type vocabulary

WEIGHT_KEYS = (
    "word_emb", "pos_emb", "type_emb", "emb_ln_g", "emb_ln_b",
    "wq", "bq", "wk", "bk", "wv", "bv", "wo", "bo", "ln1g", "ln1b",
    "w1", "b1", "w2", "b2", "ln2g", "ln2b",
    "wlin", "blin", "crf_start", "crf_end", "crf_trans")


def rep_spec(shape):
    """BlockSpec for a weight replicated across the batch grid."""
    zeros = (0,) * len(shape)
    return pl.BlockSpec(shape, lambda b, zeros=zeros: zeros)


# ============ fused kernel: embeddings + BERT layer + Linear + CRF ============
def kobert_crf_kernel(ids_ref, tt_ref, vlen_ref,
                      wemb_ref, pemb_ref, temb_ref, embg_ref, embb_ref,
                      wq_ref, bq_ref, wk_ref, bk_ref, wv_ref, bv_ref,
                      wo_ref, bo_ref, ln1g_ref, ln1b_ref,
                      w1_ref, b1_ref, w2_ref, b2_ref, ln2g_ref, ln2b_ref,
                      wlin_ref, blin_ref, start_ref, end_ref, trans_ref,
                      out_ref):
    bb = ids_ref.shape[0]
    s = ids_ref.shape[1]
    h = wemb_ref.shape[1]
    f32 = jnp.float32
    bf16 = jnp.bfloat16

    def layer_norm(v, g, b):
        mu = jnp.mean(v, axis=-1, keepdims=True)
        var = jnp.mean((v - mu) ** 2, axis=-1, keepdims=True)
        return (v - mu) * lax.rsqrt(var + 1e-12) * g + b

    # ---- fused BERT embeddings: word (one-hot matmul -> no gather),
    #      position, token-type, then LayerNorm ----
    ids = ids_ref[...]                                         # (bb, S, 1) int32
    vocab_iota = lax.broadcasted_iota(jnp.int32, (bb, s, VOCAB), 2)
    onehot = (vocab_iota == ids).astype(f32)                   # (bb, S, V)
    word = jnp.dot(onehot.reshape(bb * s, VOCAB), wemb_ref[...],
                   preferred_element_type=f32)                 # (bb*S, H)

    tt = tt_ref[...].astype(f32)                               # (bb, S, 1)
    type0 = temb_ref[0:1, :]                                   # (1, H)
    type1 = temb_ref[1:2, :]
    # TODO(synk): assumes token_type vocabulary == 2 (BERT segment ids).
    type_add = type0[None] + tt * (type1 - type0)[None]        # (bb, S, H)

    x3 = word.reshape(bb, s, h) + pemb_ref[...][None] + type_add
    x3 = layer_norm(x3, embg_ref[...], embb_ref[...])
    x2 = x3.reshape(bb * s, h)                                 # (bb*S, H) f32

    # ---- attention mask from valid_length (1.0 = valid key position) ----
    pos_lane = lax.broadcasted_iota(jnp.int32, (bb, 1, s), 2)
    mask = (pos_lane < vlen_ref[...]).astype(f32)              # (bb, 1, S)

    # ---- synthetic single-head BERT encoder layer ----
    # three lane-aligned projections; 1/sqrt(H) is folded into wq/bq.
    x2b = x2.astype(bf16)
    q = (jnp.dot(x2b, wq_ref[...], preferred_element_type=f32)
         + bq_ref[...]).reshape(bb, s, h)
    k = (jnp.dot(x2b, wk_ref[...], preferred_element_type=f32)
         + bk_ref[...]).reshape(bb, s, h)
    v = (jnp.dot(x2b, wv_ref[...], preferred_element_type=f32)
         + bv_ref[...]).reshape(bb, s, h)

    scores = jnp.einsum("bqd,bkd->bqk", q.astype(bf16), k.astype(bf16),
                        preferred_element_type=f32)            # (bb, S, S)
    scores = scores + (mask - 1.0) * 1e9
    probs = jax.nn.softmax(scores, axis=-1)
    ctx = jnp.einsum("bqk,bkd->bqd", probs.astype(bf16), v.astype(bf16),
                     preferred_element_type=f32)               # (bb, S, H)
    attn = jnp.dot(ctx.reshape(bb * s, h).astype(bf16), wo_ref[...],
                   preferred_element_type=f32) + bo_ref[...]
    h1 = layer_norm(x2 + attn, ln1g_ref[...], ln1b_ref[...])

    # TODO(synk): tanh-approximate GELU (exact erf GELU lowering not relied on).
    ff = jax.nn.gelu(jnp.dot(h1.astype(bf16), w1_ref[...],
                             preferred_element_type=f32) + b1_ref[...],
                     approximate=True)
    ff = jnp.dot(ff.astype(bf16), w2_ref[...],
                 preferred_element_type=f32) + b2_ref[...]
    h2 = layer_norm(h1 + ff, ln2g_ref[...], ln2b_ref[...])

    # ---- dropout (eval) = identity; Linear -> CRF emissions (f32) ----
    emit = jnp.dot(h2, wlin_ref[...], preferred_element_type=f32) + blin_ref[...]
    emit = emit.reshape(bb, s, C)

    trans = trans_ref[...][None]                               # (1, C, C) [prev,next]
    start = start_ref[...]                                     # (1, C)
    end = end_ref[...]                                         # (1, C)

    prev_iota = lax.broadcasted_iota(jnp.int32, (bb, C, C), 1)
    lane_iota = lax.broadcasted_iota(jnp.int32, (bb, 1, C), 2)

    # ---- Viterbi + forward (logZ) recursions, fully unrolled over time.
    #      Backpointers live in vregs (Python list) -- no dynamic_update_slice.
    #      (CRF.decode is called WITHOUT a mask in the reference forward.)
    score = emit[:, 0:1, :] + start                            # (bb,1,C)
    alpha = score
    history = []
    for t in range(1, s):
        emit_t = emit[:, t:t + 1, :]
        smat = score.reshape(bb, C, 1) + trans                 # (bb, prev, next)
        maxv = jnp.max(smat, axis=1, keepdims=True)            # (bb,1,C)
        # first-occurrence argmax over prev (matches torch.max tie-break);
        # kept as compare/select/min for lowering robustness.
        bp = jnp.min(jnp.where(smat >= maxv, prev_iota, C),
                     axis=1, keepdims=True).astype(jnp.int32)
        history.append(bp)
        score = maxv + emit_t
        amat = alpha.reshape(bb, C, 1) + trans
        m = jnp.max(amat, axis=1, keepdims=True)
        alpha = (m + jnp.log(jnp.sum(jnp.exp(amat - m), axis=1, keepdims=True))
                 + emit_t)

    final = score + end                                        # (bb,1,C)
    best_score = jnp.max(final, axis=2, keepdims=True)         # (bb,1,1)
    cur = jnp.min(jnp.where(final >= best_score, lane_iota, C),
                  axis=2, keepdims=True).astype(jnp.int32)     # (bb,1,1)

    # ---- backtrack (unrolled) ----
    tags_t = [None] * s
    tags_t[s - 1] = cur
    for t in range(s - 2, -1, -1):
        row = history[t]                                       # backptrs for time t+1
        cur = jnp.sum(jnp.where(lane_iota == cur, row, 0),
                      axis=2, keepdims=True).astype(jnp.int32)
        tags_t[t] = cur

    fin = alpha + end
    m = jnp.max(fin, axis=2, keepdims=True)
    logz = m + jnp.log(jnp.sum(jnp.exp(fin - m), axis=2, keepdims=True))  # (bb,1,1)
    # TODO(synk): CRF.compute_confidence source unavailable; approximated as the
    # posterior probability of the decoded path: exp(score(best_path) - logZ).
    conf = jnp.exp(best_score - logz)                          # (bb,1,1)

    # ---- lane-dense packed output: lanes 0..S-1 = tags (as f32),
    #      lane S = confidence; one unmasked 128-lane store ----
    out_lane = lax.broadcasted_iota(jnp.int32, (bb, 1, 128), 2)
    packed = jnp.zeros((bb, 1, 128), f32)
    for t in range(s):
        packed = jnp.where(out_lane == t, tags_t[t].astype(f32), packed)
    packed = jnp.where(out_lane == s, conf, packed)
    out_ref[...] = packed


# ===================== wrapper =====================
def _fused_forward(params, input_ids, token_type_ids, valid_length,
                   batch_per_block):
    bb = batch_per_block
    nblk = B // bb
    ids3 = input_ids.reshape(B, S, 1).astype(jnp.int32)
    tt3 = token_type_ids.reshape(B, S, 1).astype(jnp.int32)
    vl3 = valid_length.reshape(B, 1, 1).astype(jnp.int32)
    ws = [params[k] for k in WEIGHT_KEYS]

    packed = pl.pallas_call(
        kobert_crf_kernel,
        out_shape=jax.ShapeDtypeStruct((B, 1, 128), jnp.float32),
        grid=(nblk,),
        in_specs=[pl.BlockSpec((bb, S, 1), lambda b: (b, 0, 0)),
                  pl.BlockSpec((bb, S, 1), lambda b: (b, 0, 0)),
                  pl.BlockSpec((bb, 1, 1), lambda b: (b, 0, 0))]
                 + [rep_spec(w.shape) for w in ws],
        out_specs=pl.BlockSpec((bb, 1, 128), lambda b: (b, 0, 0)),
        compiler_params=pltpu.CompilerParams(
            dimension_semantics=("arbitrary",)),
    )(ids3, tt3, vl3, *ws)

    tags = packed[:, 0, :S].astype(jnp.int32)        # (B, S)
    conf = packed[:, 0, S]                           # (B,)
    return tags, conf


def kobert_crf_forward(params, input_ids, valid_length, token_type_ids,
                       *, batch_per_block=None):
    if batch_per_block is None:
        # Keep the whole batch on one core on ALL generations at these sizes;
        # only split across TensorCores once bb*S reaches ~256 matmul rows.
        batch_per_block = B
    return _fused_forward(params, input_ids, token_type_ids, valid_length,
                          batch_per_block)


# ===================== params =====================
def init_params(key):
    ks = iter(jax.random.split(key, 40))

    def nrm(shape, scale=0.1):
        return (scale * jax.random.normal(next(ks), shape)).astype(jnp.float32)

    p = {}
    p["word_emb"] = nrm((VOCAB, H))
    p["pos_emb"] = nrm((S, H))
    p["type_emb"] = nrm((NTYPE, H))
    p["emb_ln_g"] = jnp.ones((1, H), jnp.float32)
    p["emb_ln_b"] = jnp.zeros((1, H), jnp.float32)
    p["wq"] = nrm((H, H)); p["bq"] = jnp.zeros((1, H), jnp.float32)
    p["wk"] = nrm((H, H)); p["bk"] = jnp.zeros((1, H), jnp.float32)
    p["wv"] = nrm((H, H)); p["bv"] = jnp.zeros((1, H), jnp.float32)
    p["wo"] = nrm((H, H)); p["bo"] = jnp.zeros((1, H), jnp.float32)
    p["ln1g"] = jnp.ones((1, H), jnp.float32)
    p["ln1b"] = jnp.zeros((1, H), jnp.float32)
    p["w1"] = nrm((H, FF)); p["b1"] = jnp.zeros((1, FF), jnp.float32)
    p["w2"] = nrm((FF, H)); p["b2"] = jnp.zeros((1, H), jnp.float32)
    p["ln2g"] = jnp.ones((1, H), jnp.float32)
    p["ln2b"] = jnp.zeros((1, H), jnp.float32)
    p["wlin"] = nrm((H, C)); p["blin"] = jnp.zeros((1, C), jnp.float32)
    p["crf_start"] = nrm((1, C))
    p["crf_end"] = nrm((1, C))
    p["crf_trans"] = nrm((C, C))
    return p


def prepare_params(p):
    """Fold 1/sqrt(H) into the Q projection and cast MXU weights to bf16."""
    out = dict(p)
    q_scale = 1.0 / (float(H) ** 0.5)
    out["wq"] = (p["wq"] * q_scale).astype(jnp.bfloat16)
    out["bq"] = p["bq"] * q_scale
    for kname in ("wk", "wv", "wo", "w1", "w2"):
        out[kname] = p[kname].astype(jnp.bfloat16)
    return out


if __name__ == "__main__":
    root = jax.random.PRNGKey(0)
    k_params, k_ids = jax.random.split(root)
    params = prepare_params(init_params(k_params))

    input_ids = jax.random.randint(k_ids, (B, S), 0, VOCAB, dtype=jnp.int32)
    token_type_ids = jnp.zeros((B, S), dtype=jnp.int32)
    valid_length = jnp.array([S, 5], dtype=jnp.int32)

    fwd = jax.jit(functools.partial(kobert_crf_forward, params))
    tag_seq, confidence = fwd(input_ids, valid_length, token_type_ids)
    jax.block_until_ready((tag_seq, confidence))
    assert tag_seq.shape == (B, S) and confidence.shape == (B,)
    print("KERNEL_OK")
</pallas_src>

<mosaic_0001>
module attributes {stable_mosaic.version = 11 : i64} {
  func.func @kobert_crf_kernel(%arg0: i32, %arg1: memref<2x8x1xi32, #tpu.memory_space<vmem>>, %arg2: memref<2x8x1xi32, #tpu.memory_space<vmem>>, %arg3: memref<2x1x1xi32, #tpu.memory_space<vmem>>, %arg4: memref<32x32xf32, #tpu.memory_space<vmem>>, %arg5: memref<8x32xf32, #tpu.memory_space<vmem>>, %arg6: memref<2x32xf32, #tpu.memory_space<vmem>>, %arg7: memref<1x32xf32, #tpu.memory_space<vmem>>, %arg8: memref<1x32xf32, #tpu.memory_space<vmem>>, %arg9: memref<32x32xbf16, #tpu.memory_space<vmem>>, %arg10: memref<1x32xf32, #tpu.memory_space<vmem>>, %arg11: memref<32x32xbf16, #tpu.memory_space<vmem>>, %arg12: memref<1x32xf32, #tpu.memory_space<vmem>>, %arg13: memref<32x32xbf16, #tpu.memory_space<vmem>>, %arg14: memref<1x32xf32, #tpu.memory_space<vmem>>, %arg15: memref<32x32xbf16, #tpu.memory_space<vmem>>, %arg16: memref<1x32xf32, #tpu.memory_space<vmem>>, %arg17: memref<1x32xf32, #tpu.memory_space<vmem>>, %arg18: memref<1x32xf32, #tpu.memory_space<vmem>>, %arg19: memref<32x128xbf16, #tpu.memory_space<vmem>>, %arg20: memref<1x128xf32, #tpu.memory_space<vmem>>, %arg21: memref<128x32xbf16, #tpu.memory_space<vmem>>, %arg22: memref<1x32xf32, #tpu.memory_space<vmem>>, %arg23: memref<1x32xf32, #tpu.memory_space<vmem>>, %arg24: memref<1x32xf32, #tpu.memory_space<vmem>>, %arg25: memref<32x8xf32, #tpu.memory_space<vmem>>, %arg26: memref<1x8xf32, #tpu.memory_space<vmem>>, %arg27: memref<1x8xf32, #tpu.memory_space<vmem>>, %arg28: memref<1x8xf32, #tpu.memory_space<vmem>>, %arg29: memref<8x8xf32, #tpu.memory_space<vmem>>, %arg30: memref<2x1x128xf32, #tpu.memory_space<vmem>>) attributes {dimension_semantics = [#tpu.dimension_semantics<arbitrary>], iteration_bounds = array<i64: 1>, scalar_prefetch = 0 : i64, scratch_operands = 0 : i64, tpu.core_type = #tpu.core_type<tc>, window_params = [{transform_indices = @transform_0, window_bounds = array<i64: 2, 8, 1>}, {transform_indices = @transform_1, window_bounds = array<i64: 2, 8, 1>}, {transform_indices = @transform_2, window_bounds = array<i64: 2, 1, 1>}, {pipeline_mode = #tpu.pipeline_mode<synchronous>, transform_indices = @transform_3, window_bounds = array<i64: 32, 32>}, {pipeline_mode = #tpu.pipeline_mode<synchronous>, transform_indices = @transform_4, window_bounds = array<i64: 8, 32>}, {pipeline_mode = #tpu.pipeline_mode<synchronous>, transform_indices = @transform_5, window_bounds = array<i64: 2, 32>}, {pipeline_mode = #tpu.pipeline_mode<synchronous>, transform_indices = @transform_6, window_bounds = array<i64: 1, 32>}, {pipeline_mode = #tpu.pipeline_mode<synchronous>, transform_indices = @transform_7, window_bounds = array<i64: 1, 32>}, {pipeline_mode = #tpu.pipeline_mode<synchronous>, transform_indices = @transform_8, window_bounds = array<i64: 32, 32>}, {pipeline_mode = #tpu.pipeline_mode<synchronous>, transform_indices = @transform_9, window_bounds = array<i64: 1, 32>}, {pipeline_mode = #tpu.pipeline_mode<synchronous>, transform_indices = @transform_10, window_bounds = array<i64: 32, 32>}, {pipeline_mode = #tpu.pipeline_mode<synchronous>, transform_indices = @transform_11, window_bounds = array<i64: 1, 32>}, {pipeline_mode = #tpu.pipeline_mode<synchronous>, transform_indices = @transform_12, window_bounds = array<i64: 32, 32>}, {pipeline_mode = #tpu.pipeline_mode<synchronous>, transform_indices = @transform_13, window_bounds = array<i64: 1, 32>}, {pipeline_mode = #tpu.pipeline_mode<synchronous>, transform_indices = @transform_14, window_bounds = array<i64: 32, 32>}, {pipeline_mode = #tpu.pipeline_mode<synchronous>, transform_indices = @transform_15, window_bounds = array<i64: 1, 32>}, {pipeline_mode = #tpu.pipeline_mode<synchronous>, transform_indices = @transform_16, window_bounds = array<i64: 1, 32>}, {pipeline_mode = #tpu.pipeline_mode<synchronous>, transform_indices = @transform_17, window_bounds = array<i64: 1, 32>}, {pipeline_mode = #tpu.pipeline_mode<synchronous>, transform_indices = @transform_18, window_bounds = array<i64: 32, 128>}, {pipeline_mode = #tpu.pipeline_mode<synchronous>, transform_indices = @transform_19, window_bounds = array<i64: 1, 128>}, {pipeline_mode = #tpu.pipeline_mode<synchronous>, transform_indices = @transform_20, window_bounds = array<i64: 128, 32>}, {pipeline_mode = #tpu.pipeline_mode<synchronous>, transform_indices = @transform_21, window_bounds = array<i64: 1, 32>}, {pipeline_mode = #tpu.pipeline_mode<synchronous>, transform_indices = @transform_22, window_bounds = array<i64: 1, 32>}, {pipeline_mode = #tpu.pipeline_mode<synchronous>, transform_indices = @transform_23, window_bounds = array<i64: 1, 32>}, {pipeline_mode = #tpu.pipeline_mode<synchronous>, transform_indices = @transform_24, window_bounds = array<i64: 32, 8>}, {pipeline_mode = #tpu.pipeline_mode<synchronous>, transform_indices = @transform_25, window_bounds = array<i64: 1, 8>}, {pipeline_mode = #tpu.pipeline_mode<synchronous>, transform_indices = @transform_26, window_bounds = array<i64: 1, 8>}, {pipeline_mode = #tpu.pipeline_mode<synchronous>, transform_indices = @transform_27, window_bounds = array<i64: 1, 8>}, {pipeline_mode = #tpu.pipeline_mode<synchronous>, transform_indices = @transform_28, window_bounds = array<i64: 8, 8>}, {transform_indices = @transform_29, window_bounds = array<i64: 2, 1, 128>}]} {
    %c0 = arith.constant 0 : index
    %c0_0 = arith.constant 0 : index
    %c0_1 = arith.constant 0 : index
    %0 = vector.load %arg1[%c0, %c0_0, %c0_1] : memref<2x8x1xi32, #tpu.memory_space<vmem>>, vector<2x8x1xi32>
    %1 = tpu.iota {dimensions = array<i32: 2>} : vector<2x8x32xi32>
    %2 = vector.broadcast %0 : vector<2x8x1xi32> to vector<2x8x32xi32>
    %3 = arith.cmpi eq, %1, %2 : vector<2x8x32xi32>
    %4 = arith.extui %3 : vector<2x8x32xi1> to vector<2x8x32xi32>
    %5 = arith.sitofp %4 : vector<2x8x32xi32> to vector<2x8x32xf32>
    %6 = vector.shape_cast %5 : vector<2x8x32xf32> to vector<16x32xf32>
    %c0_2 = arith.constant 0 : index
    %c0_3 = arith.constant 0 : index
    %7 = vector.load %arg4[%c0_2, %c0_3] : memref<32x32xf32, #tpu.memory_space<vmem>>, vector<32x32xf32>
    %cst = arith.constant dense<0.000000e+00> : vector<16x32xf32>
    %8 = tpu.matmul %6, %7, %cst {dimension_numbers = #tpu.dot_dimension_numbers<[1], [0], [0], [1], [0, 0, 1, 1], [], []>} : vector<16x32xf32>, vector<32x32xf32>, vector<16x32xf32> -> vector<16x32xf32>
    %c0_4 = arith.constant 0 : index
    %c0_5 = arith.constant 0 : index
    %c0_6 = arith.constant 0 : index
    %9 = vector.load %arg2[%c0_4, %c0_5, %c0_6] : memref<2x8x1xi32, #tpu.memory_space<vmem>>, vector<2x8x1xi32>
    %10 = arith.sitofp %9 : vector<2x8x1xi32> to vector<2x8x1xf32>
    %c0_7 = arith.constant 0 : index
    %c0_8 = arith.constant 0 : index
    %11 = vector.load %arg6[%c0_7, %c0_8] : memref<2x32xf32, #tpu.memory_space<vmem>>, vector<1x32xf32>
    %c1 = arith.constant 1 : index
    %c0_9 = arith.constant 0 : index
    %12 = vector.load %arg6[%c1, %c0_9] : memref<2x32xf32, #tpu.memory_space<vmem>>, vector<1x32xf32>
    %13 = vector.shape_cast %11 : vector<1x32xf32> to vector<1x1x32xf32>
    %14 = arith.subf %12, %11 : vector<1x32xf32>
    %15 = vector.shape_cast %14 : vector<1x32xf32> to vector<1x1x32xf32>
    %16 = vector.broadcast %10 : vector<2x8x1xf32> to vector<2x8x32xf32>
    %17 = vector.broadcast %15 : vector<1x1x32xf32> to vector<2x8x32xf32>
    %18 = arith.mulf %16, %17 : vector<2x8x32xf32>
    %19 = vector.broadcast %13 : vector<1x1x32xf32> to vector<2x8x32xf32>
    %20 = arith.addf %19, %18 : vector<2x8x32xf32>
    %21 = vector.shape_cast %8 : vector<16x32xf32> to vector<2x8x32xf32>
    %c0_10 = arith.constant 0 : index
    %c0_11 = arith.constant 0 : index
    %22 = vector.load %arg5[%c0_10, %c0_11] : memref<8x32xf32, #tpu.memory_space<vmem>>, vector<8x32xf32>
    %23 = vector.shape_cast %22 : vector<8x32xf32> to vector<1x8x32xf32>
    %24 = vector.broadcast %23 : vector<1x8x32xf32> to vector<2x8x32xf32>
    %25 = arith.addf %21, %24 : vector<2x8x32xf32>
    %26 = arith.addf %25, %20 : vector<2x8x32xf32>
    %c0_12 = arith.constant 0 : index
    %c0_13 = arith.constant 0 : index
    %27 = vector.load %arg7[%c0_12, %c0_13] : memref<1x32xf32, #tpu.memory_space<vmem>>, vector<1x32xf32>
    %c0_14 = arith.constant 0 : index
    %c0_15 = arith.constant 0 : index
    %28 = vector.load %arg8[%c0_14, %c0_15] : memref<1x32xf32, #tpu.memory_space<vmem>>, vector<1x32xf32>
    %cst_16 = arith.constant dense<0.000000e+00> : vector<2x8xf32>
    %29 = vector.multi_reduction <add>, %26, %cst_16 [2] : vector<2x8x32xf32> to vector<2x8xf32>
    %30 = vector.shape_cast %29 : vector<2x8xf32> to vector<2x8x1xf32>
    %cst_17 = arith.constant 3.200000e+01 : f32
    %31 = vector.broadcast %cst_17 : f32 to vector<2x8x1xf32>
    %32 = arith.divf %30, %31 : vector<2x8x1xf32>
    %33 = vector.broadcast %32 : vector<2x8x1xf32> to vector<2x8x32xf32>
    %34 = arith.subf %26, %33 : vector<2x8x32xf32>
    %35 = arith.mulf %34, %34 : vector<2x8x32xf32>
    %cst_18 = arith.constant dense<0.000000e+00> : vector<2x8xf32>
    %36 = vector.multi_reduction <add>, %35, %cst_18 [2] : vector<2x8x32xf32> to vector<2x8xf32>
    %37 = vector.shape_cast %36 : vector<2x8xf32> to vector<2x8x1xf32>
    %cst_19 = arith.constant 3.200000e+01 : f32
    %38 = vector.broadcast %cst_19 : f32 to vector<2x8x1xf32>
    %39 = arith.divf %37, %38 : vector<2x8x1xf32>
    %40 = vector.broadcast %32 : vector<2x8x1xf32> to vector<2x8x32xf32>
    %41 = arith.subf %26, %40 : vector<2x8x32xf32>
    %cst_20 = arith.constant 9.99999996E-13 : f32
    %42 = vector.broadcast %cst_20 : f32 to vector<2x8x1xf32>
    %43 = arith.addf %39, %42 : vector<2x8x1xf32>
    %44 = math.rsqrt %43 : vector<2x8x1xf32>
    %45 = vector.broadcast %44 : vector<2x8x1xf32> to vector<2x8x32xf32>
    %46 = arith.mulf %41, %45 : vector<2x8x32xf32>
    %47 = vector.shape_cast %27 : vector<1x32xf32> to vector<1x1x32xf32>
    %48 = vector.broadcast %47 : vector<1x1x32xf32> to vector<2x8x32xf32>
    %49 = arith.mulf %46, %48 : vector<2x8x32xf32>
    %50 = vector.shape_cast %28 : vector<1x32xf32> to vector<1x1x32xf32>
    %51 = vector.broadcast %50 : vector<1x1x32xf32> to vector<2x8x32xf32>
    %52 = arith.addf %49, %51 : vector<2x8x32xf32>
    %53 = vector.shape_cast %52 : vector<2x8x32xf32> to vector<16x32xf32>
    %54 = tpu.iota {dimensions = array<i32: 2>} : vector<2x1x8xi32>
    %c0_21 = arith.constant 0 : index
    %c0_22 = arith.constant 0 : index
    %c0_23 = arith.constant 0 : index
    %55 = vector.load %arg3[%c0_21, %c0_22, %c0_23] : memref<2x1x1xi32, #tpu.memory_space<vmem>>, vector<2x1x1xi32>
    %56 = vector.broadcast %55 : vector<2x1x1xi32> to vector<2x1x8xi32>
    %57 = arith.cmpi slt, %54, %56 : vector<2x1x8xi32>
    %58 = arith.extui %57 : vector<2x1x8xi1> to vector<2x1x8xi32>
    %59 = arith.sitofp %58 : vector<2x1x8xi32> to vector<2x1x8xf32>
    %60 = arith.truncf %53 : vector<16x32xf32> to vector<16x32xbf16>
    %c0_24 = arith.constant 0 : index
    %c0_25 = arith.constant 0 : index
    %61 = vector.load %arg9[%c0_24, %c0_25] : memref<32x32xbf16, #tpu.memory_space<vmem>>, vector<32x32xbf16>
    %cst_26 = arith.constant dense<0.000000e+00> : vector<16x32xf32>
    %62 = tpu.matmul %60, %61, %cst_26 {dimension_numbers = #tpu.dot_dimension_numbers<[1], [0], [0], [1], [0, 0, 1, 1], [], []>} : vector<16x32xbf16>, vector<32x32xbf16>, vector<16x32xf32> -> vector<16x32xf32>
    %c0_27 = arith.constant 0 : index
    %c0_28 = arith.constant 0 : index
    %63 = vector.load %arg10[%c0_27, %c0_28] : memref<1x32xf32, #tpu.memory_space<vmem>>, vector<1x32xf32>
    %64 = vector.broadcast %63 : vector<1x32xf32> to vector<16x32xf32>
    %65 = arith.addf %62, %64 : vector<16x32xf32>
    %66 = vector.shape_cast %65 : vector<16x32xf32> to vector<2x8x32xf32>
    %c0_29 = arith.constant 0 : index
    %c0_30 = arith.constant 0 : index
    %67 = vector.load %arg11[%c0_29, %c0_30] : memref<32x32xbf16, #tpu.memory_space<vmem>>, vector<32x32xbf16>
    %cst_31 = arith.constant dense<0.000000e+00> : vector<16x32xf32>
    %68 = tpu.matmul %60, %67, %cst_31 {dimension_numbers = #tpu.dot_dimension_numbers<[1], [0], [0], [1], [0, 0, 1, 1], [], []>} : vector<16x32xbf16>, vector<32x32xbf16>, vector<16x32xf32> -> vector<16x32xf32>
    %c0_32 = arith.constant 0 : index
    %c0_33 = arith.constant 0 : index
    %69 = vector.load %arg12[%c0_32, %c0_33] : memref<1x32xf32, #tpu.memory_space<vmem>>, vector<1x32xf32>
    %70 = vector.broadcast %69 : vector<1x32xf32> to vector<16x32xf32>
    %71 = arith.addf %68, %70 : vector<16x32xf32>
    %72 = vector.shape_cast %71 : vector<16x32xf32> to vector<2x8x32xf32>
    %c0_34 = arith.constant 0 : index
    %c0_35 = arith.constant 0 : index
    %73 = vector.load %arg13[%c0_34, %c0_35] : memref<32x32xbf16, #tpu.memory_space<vmem>>, vector<32x32xbf16>
    %cst_36 = arith.constant dense<0.000000e+00> : vector<16x32xf32>
    %74 = tpu.matmul %60, %73, %cst_36 {dimension_numbers = #tpu.dot_dimension_numbers<[1], [0], [0], [1], [0, 0, 1, 1], [], []>} : vector<16x32xbf16>, vector<32x32xbf16>, vector<16x32xf32> -> vector<16x32xf32>
    %c0_37 = arith.constant 0 : index
    %c0_38 = arith.constant 0 : index
    %75 = vector.load %arg14[%c0_37, %c0_38] : memref<1x32xf32, #tpu.memory_space<vmem>>, vector<1x32xf32>
    %76 = vector.broadcast %75 : vector<1x32xf32> to vector<16x32xf32>
    %77 = arith.addf %74, %76 : vector<16x32xf32>
    %78 = vector.shape_cast %77 : vector<16x32xf32> to vector<2x8x32xf32>
    %79 = arith.truncf %66 : vector<2x8x32xf32> to vector<2x8x32xbf16>
    %80 = arith.truncf %72 : vector<2x8x32xf32> to vector<2x8x32xbf16>
    "tpu.trace_start"() <{level = 10 : i32, message = "bqd,bkd->bqk"}> : () -> ()
    %cst_39 = arith.constant dense<0.000000e+00> : vector<2x8x8xf32>
    %81 = tpu.matmul %79, %80, %cst_39 {dimension_numbers = #tpu.dot_dimension_numbers<[2], [2], [1], [1], [0, 0, 0, 1, 1, 1], [0], [0]>} : vector<2x8x32xbf16>, vector<2x8x32xbf16>, vector<2x8x8xf32> -> vector<2x8x8xf32>
    "tpu.trace_stop"() : () -> ()
    %cst_40 = arith.constant 1.000000e+00 : f32
    %82 = vector.broadcast %cst_40 : f32 to vector<2x1x8xf32>
    %83 = arith.subf %59, %82 : vector<2x1x8xf32>
    %cst_41 = arith.constant 1.000000e+09 : f32
    %84 = vector.broadcast %cst_41 : f32 to vector<2x1x8xf32>
    %85 = arith.mulf %83, %84 : vector<2x1x8xf32>
    %86 = vector.broadcast %85 : vector<2x1x8xf32> to vector<2x8x8xf32>
    %87 = arith.addf %81, %86 : vector<2x8x8xf32>
    %cst_42 = arith.constant dense<0xFF800000> : vector<2x8xf32>
    %88 = vector.multi_reduction <maximumf>, %87, %cst_42 [2] : vector<2x8x8xf32> to vector<2x8xf32>
    %cst_43 = arith.constant 0xFF800000 : f32
    %89 = vector.broadcast %cst_43 : f32 to vector<2x8xf32>
    %90 = arith.maximumf %89, %88 : vector<2x8xf32>
    %91 = vector.shape_cast %90 : vector<2x8xf32> to vector<2x8x1xf32>
    %92 = vector.broadcast %91 : vector<2x8x1xf32> to vector<2x8x8xf32>
    %93 = arith.subf %87, %92 : vector<2x8x8xf32>
    %94 = math.exp %93 : vector<2x8x8xf32>
    %cst_44 = arith.constant dense<0.000000e+00> : vector<2x8xf32>
    %95 = vector.multi_reduction <add>, %94, %cst_44 [2] : vector<2x8x8xf32> to vector<2x8xf32>
    %96 = vector.shape_cast %95 : vector<2x8xf32> to vector<2x8x1xf32>
    %97 = vector.broadcast %96 : vector<2x8x1xf32> to vector<2x8x8xf32>
    %98 = arith.divf %94, %97 : vector<2x8x8xf32>
    %99 = arith.truncf %98 : vector<2x8x8xf32> to vector<2x8x8xbf16>
    %100 = arith.truncf %78 : vector<2x8x32xf32> to vector<2x8x32xbf16>
    "tpu.trace_start"() <{level = 10 : i32, message = "bqk,bkd->bqd"}> : () -> ()
    %cst_45 = arith.constant dense<0.000000e+00> : vector<2x8x32xf32>
    %101 = tpu.matmul %99, %100, %cst_45 {dimension_numbers = #tpu.dot_dimension_numbers<[2], [1], [1], [2], [0, 0, 0, 1, 1, 2], [0], [0]>} : vector<2x8x8xbf16>, vector<2x8x32xbf16>, vector<2x8x32xf32> -> vector<2x8x32xf32>
    "tpu.trace_stop"() : () -> ()
    %102 = vector.shape_cast %101 : vector<2x8x32xf32> to vector<16x32xf32>
    %103 = arith.truncf %102 : vector<16x32xf32> to vector<16x32xbf16>
    %c0_46 = arith.constant 0 : index
    %c0_47 = arith.constant 0 : index
    %104 = vector.load %arg15[%c0_46, %c0_47] : memref<32x32xbf16, #tpu.memory_space<vmem>>, vector<32x32xbf16>
    %cst_48 = arith.constant dense<0.000000e+00> : vector<16x32xf32>
    %105 = tpu.matmul %103, %104, %cst_48 {dimension_numbers = #tpu.dot_dimension_numbers<[1], [0], [0], [1], [0, 0, 1, 1], [], []>} : vector<16x32xbf16>, vector<32x32xbf16>, vector<16x32xf32> -> vector<16x32xf32>
    %c0_49 = arith.constant 0 : index
    %c0_50 = arith.constant 0 : index
    %106 = vector.load %arg16[%c0_49, %c0_50] : memref<1x32xf32, #tpu.memory_space<vmem>>, vector<1x32xf32>
    %107 = vector.broadcast %106 : vector<1x32xf32> to vector<16x32xf32>
    %108 = arith.addf %105, %107 : vector<16x32xf32>
    %109 = arith.addf %53, %108 : vector<16x32xf32>
    %c0_51 = arith.constant 0 : index
    %c0_52 = arith.constant 0 : index
    %110 = vector.load %arg17[%c0_51, %c0_52] : memref<1x32xf32, #tpu.memory_space<vmem>>, vector<1x32xf32>
    %c0_53 = arith.constant 0 : index
    %c0_54 = arith.constant 0 : index
    %111 = vector.load %arg18[%c0_53, %c0_54] : memref<1x32xf32, #tpu.memory_space<vmem>>, vector<1x32xf32>
    %cst_55 = arith.constant dense<0.000000e+00> : vector<16xf32>
    %112 = vector.multi_reduction <add>, %109, %cst_55 [1] : vector<16x32xf32> to vector<16xf32>
    %113 = vector.shape_cast %112 : vector<16xf32> to vector<16x1xf32>
    %cst_56 = arith.constant 3.200000e+01 : f32
    %114 = vector.broadcast %cst_56 : f32 to vector<16x1xf32>
    %115 = arith.divf %113, %114 : vector<16x1xf32>
    %116 = vector.broadcast %115 : vector<16x1xf32> to vector<16x32xf32>
    %117 = arith.subf %109, %116 : vector<16x32xf32>
    %118 = arith.mulf %117, %117 : vector<16x32xf32>
    %cst_57 = arith.constant dense<0.000000e+00> : vector<16xf32>
    %119 = vector.multi_reduction <add>, %118, %cst_57 [1] : vector<16x32xf32> to vector<16xf32>
    %120 = vector.shape_cast %119 : vector<16xf32> to vector<16x1xf32>
    %cst_58 = arith.constant 3.200000e+01 : f32
    %121 = vector.broadcast %cst_58 : f32 to vector<16x1xf32>
    %122 = arith.divf %120, %121 : vector<16x1xf32>
    %123 = vector.broadcast %115 : vector<16x1xf32> to vector<16x32xf32>
    %124 = arith.subf %109, %123 : vector<16x32xf32>
    %cst_59 = arith.constant 9.99999996E-13 : f32
    %125 = vector.broadcast %cst_59 : f32 to vector<16x1xf32>
    %126 = arith.addf %122, %125 : vector<16x1xf32>
    %127 = math.rsqrt %126 : vector<16x1xf32>
    %128 = vector.broadcast %127 : vector<16x1xf32> to vector<16x32xf32>
    %129 = arith.mulf %124, %128 : vector<16x32xf32>
    %130 = vector.broadcast %110 : vector<1x32xf32> to vector<16x32xf32>
    %131 = arith.mulf %129, %130 : vector<16x32xf32>
    %132 = vector.broadcast %111 : vector<1x32xf32> to vector<16x32xf32>
    %133 = arith.addf %131, %132 : vector<16x32xf32>
    %134 = arith.truncf %133 : vector<16x32xf32> to vector<16x32xbf16>
    %c0_60 = arith.constant 0 : index
    %c0_61 = arith.constant 0 : index
    %135 = vector.load %arg19[%c0_60, %c0_61] : memref<32x128xbf16, #tpu.memory_space<vmem>>, vector<32x128xbf16>
    %cst_62 = arith.constant dense<0.000000e+00> : vector<16x128xf32>
    %136 = tpu.matmul %134, %135, %cst_62 {dimension_numbers = #tpu.dot_dimension_numbers<[1], [0], [0], [1], [0, 0, 1, 1], [], []>} : vector<16x32xbf16>, vector<32x128xbf16>, vector<16x128xf32> -> vector<16x128xf32>
    %c0_63 = arith.constant 0 : index
    %c0_64 = arith.constant 0 : index
    %137 = vector.load %arg20[%c0_63, %c0_64] : memref<1x128xf32, #tpu.memory_space<vmem>>, vector<1x128xf32>
    %138 = vector.broadcast %137 : vector<1x128xf32> to vector<16x128xf32>
    %139 = arith.addf %136, %138 : vector<16x128xf32>
    %140 = arith.mulf %139, %139 : vector<16x128xf32>
    %141 = arith.mulf %139, %140 : vector<16x128xf32>
    %cst_65 = arith.constant 4.471500e-02 : f32
    %142 = vector.broadcast %cst_65 : f32 to vector<16x128xf32>
    %143 = arith.mulf %142, %141 : vector<16x128xf32>
    %144 = arith.addf %139, %143 : vector<16x128xf32>
    %cst_66 = arith.constant 0.797884583 : f32
    %145 = vector.broadcast %cst_66 : f32 to vector<16x128xf32>
    %146 = arith.mulf %145, %144 : vector<16x128xf32>
    %147 = math.tanh %146 : vector<16x128xf32>
    %cst_67 = arith.constant 1.000000e+00 : f32
    %148 = vector.broadcast %cst_67 : f32 to vector<16x128xf32>
    %149 = arith.addf %148, %147 : vector<16x128xf32>
    %cst_68 = arith.constant 5.000000e-01 : f32
    %150 = vector.broadcast %cst_68 : f32 to vector<16x128xf32>
    %151 = arith.mulf %150, %149 : vector<16x128xf32>
    %152 = arith.mulf %139, %151 : vector<16x128xf32>
    %153 = arith.truncf %152 : vector<16x128xf32> to vector<16x128xbf16>
    %c0_69 = arith.constant 0 : index
    %c0_70 = arith.constant 0 : index
    %154 = vector.load %arg21[%c0_69, %c0_70] : memref<128x32xbf16, #tpu.memory_space<vmem>>, vector<128x32xbf16>
    %cst_71 = arith.constant dense<0.000000e+00> : vector<16x32xf32>
    %155 = tpu.matmul %153, %154, %cst_71 {dimension_numbers = #tpu.dot_dimension_numbers<[1], [0], [0], [1], [0, 0, 1, 1], [], []>} : vector<16x128xbf16>, vector<128x32xbf16>, vector<16x32xf32> -> vector<16x32xf32>
    %c0_72 = arith.constant 0 : index
    %c0_73 = arith.constant 0 : index
    %156 = vector.load %arg22[%c0_72, %c0_73] : memref<1x32xf32, #tpu.memory_space<vmem>>, vector<1x32xf32>
    %157 = vector.broadcast %156 : vector<1x32xf32> to vector<16x32xf32>
    %158 = arith.addf %155, %157 : vector<16x32xf32>
    %159 = arith.addf %133, %158 : vector<16x32xf32>
    %c0_74 = arith.constant 0 : index
    %c0_75 = arith.constant 0 : index
    %160 = vector.load %arg23[%c0_74, %c0_75] : memref<1x32xf32, #tpu.memory_space<vmem>>, vector<1x32xf32>
    %c0_76 = arith.constant 0 : index
    %c0_77 = arith.constant 0 : index
    %161 = vector.load %arg24[%c0_76, %c0_77] : memref<1x32xf32, #tpu.memory_space<vmem>>, vector<1x32xf32>
    %cst_78 = arith.constant dense<0.000000e+00> : vector<16xf32>
    %162 = vector.multi_reduction <add>, %159, %cst_78 [1] : vector<16x32xf32> to vector<16xf32>
    %163 = vector.shape_cast %162 : vector<16xf32> to vector<16x1xf32>
    %cst_79 = arith.constant 3.200000e+01 : f32
    %164 = vector.broadcast %cst_79 : f32 to vector<16x1xf32>
    %165 = arith.divf %163, %164 : vector<16x1xf32>
    %166 = vector.broadcast %165 : vector<16x1xf32> to vector<16x32xf32>
    %167 = arith.subf %159, %166 : vector<16x32xf32>
    %168 = arith.mulf %167, %167 : vector<16x32xf32>
    %cst_80 = arith.constant dense<0.000000e+00> : vector<16xf32>
    %169 = vector.multi_reduction <add>, %168, %cst_80 [1] : vector<16x32xf32> to vector<16xf32>
    %170 = vector.shape_cast %169 : vector<16xf32> to vector<16x1xf32>
    %cst_81 = arith.constant 3.200000e+01 : f32
    %171 = vector.broadcast %cst_81 : f32 to vector<16x1xf32>
    %172 = arith.divf %170, %171 : vector<16x1xf32>
    %173 = vector.broadcast %165 : vector<16x1xf32> to vector<16x32xf32>
    %174 = arith.subf %159, %173 : vector<16x32xf32>
    %cst_82 = arith.constant 9.99999996E-13 : f32
    %175 = vector.broadcast %cst_82 : f32 to vector<16x1xf32>
    %176 = arith.addf %172, %175 : vector<16x1xf32>
    %177 = math.rsqrt %176 : vector<16x1xf32>
    %178 = vector.broadcast %177 : vector<16x1xf32> to vector<16x32xf32>
    %179 = arith.mulf %174, %178 : vector<16x32xf32>
    %180 = vector.broadcast %160 : vector<1x32xf32> to vector<16x32xf32>
    %181 = arith.mulf %179, %180 : vector<16x32xf32>
    %182 = vector.broadcast %161 : vector<1x32xf32> to vector<16x32xf32>
    %183 = arith.addf %181, %182 : vector<16x32xf32>
    %c0_83 = arith.constant 0 : index
    %c0_84 = arith.constant 0 : index
    %184 = vector.load %arg25[%c0_83, %c0_84] : memref<32x8xf32, #tpu.memory_space<vmem>>, vector<32x8xf32>
    %cst_85 = arith.constant dense<0.000000e+00> : vector<16x8xf32>
    %185 = tpu.matmul %183, %184, %cst_85 {dimension_numbers = #tpu.dot_dimension_numbers<[1], [0], [0], [1], [0, 0, 1, 1], [], []>} : vector<16x32xf32>, vector<32x8xf32>, vector<16x8xf32> -> vector<16x8xf32>
    %c0_86 = arith.constant 0 : index
    %c0_87 = arith.constant 0 : index
    %186 = vector.load %arg26[%c0_86, %c0_87] : memref<1x8xf32, #tpu.memory_space<vmem>>, vector<1x8xf32>
    %187 = vector.broadcast %186 : vector<1x8xf32> to vector<16x8xf32>
    %188 = arith.addf %185, %187 : vector<16x8xf32>
    %189 = vector.shape_cast %188 : vector<16x8xf32> to vector<2x8x8xf32>
    %c0_88 = arith.constant 0 : index
    %c0_89 = arith.constant 0 : index
    %190 = vector.load %arg29[%c0_88, %c0_89] : memref<8x8xf32, #tpu.memory_space<vmem>>, vector<8x8xf32>
    %191 = vector.shape_cast %190 : vector<8x8xf32> to vector<1x8x8xf32>
    %c0_90 = arith.constant 0 : index
    %c0_91 = arith.constant 0 : index
    %192 = vector.load %arg27[%c0_90, %c0_91] : memref<1x8xf32, #tpu.memory_space<vmem>>, vector<1x8xf32>
    %c0_92 = arith.constant 0 : index
    %c0_93 = arith.constant 0 : index
    %193 = vector.load %arg28[%c0_92, %c0_93] : memref<1x8xf32, #tpu.memory_space<vmem>>, vector<1x8xf32>
    %194 = tpu.iota {dimensions = array<i32: 1>} : vector<2x8x8xi32>
    %195 = tpu.iota {dimensions = array<i32: 2>} : vector<2x1x8xi32>
    %196 = vector.extract_strided_slice %189 {offsets = [0, 0, 0], sizes = [2, 1, 8], strides = [1, 1, 1]} : vector<2x8x8xf32> to vector<2x1x8xf32>
    %197 = vector.shape_cast %192 : vector<1x8xf32> to vector<1x1x8xf32>
    %198 = vector.broadcast %197 : vector<1x1x8xf32> to vector<2x1x8xf32>
    %199 = arith.addf %196, %198 : vector<2x1x8xf32>
    %200 = vector.extract_strided_slice %189 {offsets = [0, 1, 0], sizes = [2, 1, 8], strides = [1, 1, 1]} : vector<2x8x8xf32> to vector<2x1x8xf32>
    %201 = vector.shape_cast %199 : vector<2x1x8xf32> to vector<2x8x1xf32>
    %202 = vector.broadcast %201 : vector<2x8x1xf32> to vector<2x8x8xf32>
    %203 = vector.broadcast %191 : vector<1x8x8xf32> to vector<2x8x8xf32>
    %204 = arith.addf %202, %203 : vector<2x8x8xf32>
    %cst_94 = arith.constant dense<0xFF800000> : vector<2x8xf32>
    %205 = vector.multi_reduction <maximumf>, %204, %cst_94 [1] : vector<2x8x8xf32> to vector<2x8xf32>
    %206 = vector.shape_cast %205 : vector<2x8xf32> to vector<2x1x8xf32>
    %207 = vector.broadcast %206 : vector<2x1x8xf32> to vector<2x8x8xf32>
    %208 = arith.cmpf oge, %204, %207 : vector<2x8x8xf32>
    %c8_i32 = arith.constant 8 : i32
    %209 = vector.broadcast %c8_i32 : i32 to vector<2x8x8xi32>
    %210 = arith.select %208, %194, %209 : vector<2x8x8xi1>, vector<2x8x8xi32>
    %cst_95 = arith.constant dense<2147483647> : vector<2x8xi32>
    %211 = vector.multi_reduction <minsi>, %210, %cst_95 [1] : vector<2x8x8xi32> to vector<2x8xi32>
    %212 = vector.shape_cast %211 : vector<2x8xi32> to vector<2x1x8xi32>
    %213 = arith.addf %206, %200 : vector<2x1x8xf32>
    %214 = vector.shape_cast %199 : vector<2x1x8xf32> to vector<2x8x1xf32>
    %215 = vector.broadcast %214 : vector<2x8x1xf32> to vector<2x8x8xf32>
    %216 = vector.broadcast %191 : vector<1x8x8xf32> to vector<2x8x8xf32>
    %217 = arith.addf %215, %216 : vector<2x8x8xf32>
    %cst_96 = arith.constant dense<0xFF800000> : vector<2x8xf32>
    %218 = vector.multi_reduction <maximumf>, %217, %cst_96 [1] : vector<2x8x8xf32> to vector<2x8xf32>
    %219 = vector.shape_cast %218 : vector<2x8xf32> to vector<2x1x8xf32>
    %220 = vector.broadcast %219 : vector<2x1x8xf32> to vector<2x8x8xf32>
    %221 = arith.subf %217, %220 : vector<2x8x8xf32>
    %222 = math.exp %221 : vector<2x8x8xf32>
    %cst_97 = arith.constant dense<0.000000e+00> : vector<2x8xf32>
    %223 = vector.multi_reduction <add>, %222, %cst_97 [1] : vector<2x8x8xf32> to vector<2x8xf32>
    %224 = vector.shape_cast %223 : vector<2x8xf32> to vector<2x1x8xf32>
    %225 = math.log %224 : vector<2x1x8xf32>
    %226 = arith.addf %219, %225 : vector<2x1x8xf32>
    %227 = arith.addf %226, %200 : vector<2x1x8xf32>
    %228 = vector.extract_strided_slice %189 {offsets = [0, 2, 0], sizes = [2, 1, 8], strides = [1, 1, 1]} : vector<2x8x8xf32> to vector<2x1x8xf32>
    %229 = vector.shape_cast %213 : vector<2x1x8xf32> to vector<2x8x1xf32>
    %230 = vector.broadcast %229 : vector<2x8x1xf32> to vector<2x8x8xf32>
    %231 = vector.broadcast %191 : vector<1x8x8xf32> to vector<2x8x8xf32>
    %232 = arith.addf %230, %231 : vector<2x8x8xf32>
    %cst_98 = arith.constant dense<0xFF800000> : vector<2x8xf32>
    %233 = vector.multi_reduction <maximumf>, %232, %cst_98 [1] : vector<2x8x8xf32> to vector<2x8xf32>
    %234 = vector.shape_cast %233 : vector<2x8xf32> to vector<2x1x8xf32>
    %235 = vector.broadcast %234 : vector<2x1x8xf32> to vector<2x8x8xf32>
    %236 = arith.cmpf oge, %232, %235 : vector<2x8x8xf32>
    %c8_i32_99 = arith.constant 8 : i32
    %237 = vector.broadcast %c8_i32_99 : i32 to vector<2x8x8xi32>
    %238 = arith.select %236, %194, %237 : vector<2x8x8xi1>, vector<2x8x8xi32>
    %cst_100 = arith.constant dense<2147483647> : vector<2x8xi32>
    %239 = vector.multi_reduction <minsi>, %238, %cst_100 [1] : vector<2x8x8xi32> to vector<2x8xi32>
    %240 = vector.shape_cast %239 : vector<2x8xi32> to vector<2x1x8xi32>
    %241 = arith.addf %234, %228 : vector<2x1x8xf32>
    %242 = vector.shape_cast %227 : vector<2x1x8xf32> to vector<2x8x1xf32>
    %243 = vector.broadcast %242 : vector<2x8x1xf32> to vector<2x8x8xf32>
    %244 = vector.broadcast %191 : vector<1x8x8xf32> to vector<2x8x8xf32>
    %245 = arith.addf %243, %244 : vector<2x8x8xf32>
    %cst_101 = arith.constant dense<0xFF800000> : vector<2x8xf32>
    %246 = vector.multi_reduction <maximumf>, %245, %cst_101 [1] : vector<2x8x8xf32> to vector<2x8xf32>
    %247 = vector.shape_cast %246 : vector<2x8xf32> to vector<2x1x8xf32>
    %248 = vector.broadcast %247 : vector<2x1x8xf32> to vector<2x8x8xf32>
    %249 = arith.subf %245, %248 : vector<2x8x8xf32>
    %250 = math.exp %249 : vector<2x8x8xf32>
    %cst_102 = arith.constant dense<0.000000e+00> : vector<2x8xf32>
    %251 = vector.multi_reduction <add>, %250, %cst_102 [1] : vector<2x8x8xf32> to vector<2x8xf32>
    %252 = vector.shape_cast %251 : vector<2x8xf32> to vector<2x1x8xf32>
    %253 = math.log %252 : vector<2x1x8xf32>
    %254 = arith.addf %247, %253 : vector<2x1x8xf32>
    %255 = arith.addf %254, %228 : vector<2x1x8xf32>
    %256 = vector.extract_strided_slice %189 {offsets = [0, 3, 0], sizes = [2, 1, 8], strides = [1, 1, 1]} : vector<2x8x8xf32> to vector<2x1x8xf32>
    %257 = vector.shape_cast %241 : vector<2x1x8xf32> to vector<2x8x1xf32>
    %258 = vector.broadcast %257 : vector<2x8x1xf32> to vector<2x8x8xf32>
    %259 = vector.broadcast %191 : vector<1x8x8xf32> to vector<2x8x8xf32>
    %260 = arith.addf %258, %259 : vector<2x8x8xf32>
    %cst_103 = arith.constant dense<0xFF800000> : vector<2x8xf32>
    %261 = vector.multi_reduction <maximumf>, %260, %cst_103 [1] : vector<2x8x8xf32> to vector<2x8xf32>
    %262 = vector.shape_cast %261 : vector<2x8xf32> to vector<2x1x8xf32>
    %263 = vector.broadcast %262 : vector<2x1x8xf32> to vector<2x8x8xf32>
    %264 = arith.cmpf oge, %260, %263 : vector<2x8x8xf32>
    %c8_i32_104 = arith.constant 8 : i32
    %265 = vector.broadcast %c8_i32_104 : i32 to vector<2x8x8xi32>
    %266 = arith.select %264, %194, %265 : vector<2x8x8xi1>, vector<2x8x8xi32>
    %cst_105 = arith.constant dense<2147483647> : vector<2x8xi32>
    %267 = vector.multi_reduction <minsi>, %266, %cst_105 [1] : vector<2x8x8xi32> to vector<2x8xi32>
    %268 = vector.shape_cast %267 : vector<2x8xi32> to vector<2x1x8xi32>
    %269 = arith.addf %262, %256 : vector<2x1x8xf32>
    %270 = vector.shape_cast %255 : vector<2x1x8xf32> to vector<2x8x1xf32>
    %271 = vector.broadcast %270 : vector<2x8x1xf32> to vector<2x8x8xf32>
    %272 = vector.broadcast %191 : vector<1x8x8xf32> to vector<2x8x8xf32>
    %273 = arith.addf %271, %272 : vector<2x8x8xf32>
    %cst_106 = arith.constant dense<0xFF800000> : vector<2x8xf32>
    %274 = vector.multi_reduction <maximumf>, %273, %cst_106 [1] : vector<2x8x8xf32> to vector<2x8xf32>
    %275 = vector.shape_cast %274 : vector<2x8xf32> to vector<2x1x8xf32>
    %276 = vector.broadcast %275 : vector<2x1x8xf32> to vector<2x8x8xf32>
    %277 = arith.subf %273, %276 : vector<2x8x8xf32>
    %278 = math.exp %277 : vector<2x8x8xf32>
    %cst_107 = arith.constant dense<0.000000e+00> : vector<2x8xf32>
    %279 = vector.multi_reduction <add>, %278, %cst_107 [1] : vector<2x8x8xf32> to vector<2x8xf32>
    %280 = vector.shape_cast %279 : vector<2x8xf32> to vector<2x1x8xf32>
    %281 = math.log %280 : vector<2x1x8xf32>
    %282 = arith.addf %275, %281 : vector<2x1x8xf32>
    %283 = arith.addf %282, %256 : vector<2x1x8xf32>
    %284 = vector.extract_strided_slice %189 {offsets = [0, 4, 0], sizes = [2, 1, 8], strides = [1, 1, 1]} : vector<2x8x8xf32> to vector<2x1x8xf32>
    %285 = vector.shape_cast %269 : vector<2x1x8xf32> to vector<2x8x1xf32>
    %286 = vector.broadcast %285 : vector<2x8x1xf32> to vector<2x8x8xf32>
    %287 = vector.broadcast %191 : vector<1x8x8xf32> to vector<2x8x8xf32>
    %288 = arith.addf %286, %287 : vector<2x8x8xf32>
    %cst_108 = arith.constant dense<0xFF800000> : vector<2x8xf32>
    %289 = vector.multi_reduction <maximumf>, %288, %cst_108 [1] : vector<2x8x8xf32> to vector<2x8xf32>
    %290 = vector.shape_cast %289 : vector<2x8xf32> to vector<2x1x8xf32>
    %291 = vector.broadcast %290 : vector<2x1x8xf32> to vector<2x8x8xf32>
    %292 = arith.cmpf oge, %288, %291 : vector<2x8x8xf32>
    %c8_i32_109 = arith.constant 8 : i32
    %293 = vector.broadcast %c8_i32_109 : i32 to vector<2x8x8xi32>
    %294 = arith.select %292, %194, %293 : vector<2x8x8xi1>, vector<2x8x8xi32>
    %cst_110 = arith.constant dense<2147483647> : vector<2x8xi32>
    %295 = vector.multi_reduction <minsi>, %294, %cst_110 [1] : vector<2x8x8xi32> to vector<2x8xi32>
    %296 = vector.shape_cast %295 : vector<2x8xi32> to vector<2x1x8xi32>
    %297 = arith.addf %290, %284 : vector<2x1x8xf32>
    %298 = vector.shape_cast %283 : vector<2x1x8xf32> to vector<2x8x1xf32>
    %299 = vector.broadcast %298 : vector<2x8x1xf32> to vector<2x8x8xf32>
    %300 = vector.broadcast %191 : vector<1x8x8xf32> to vector<2x8x8xf32>
    %301 = arith.addf %299, %300 : vector<2x8x8xf32>
    %cst_111 = arith.constant dense<0xFF800000> : vector<2x8xf32>
    %302 = vector.multi_reduction <maximumf>, %301, %cst_111 [1] : vector<2x8x8xf32> to vector<2x8xf32>
    %303 = vector.shape_cast %302 : vector<2x8xf32> to vector<2x1x8xf32>
    %304 = vector.broadcast %303 : vector<2x1x8xf32> to vector<2x8x8xf32>
    %305 = arith.subf %301, %304 : vector<2x8x8xf32>
    %306 = math.exp %305 : vector<2x8x8xf32>
    %cst_112 = arith.constant dense<0.000000e+00> : vector<2x8xf32>
    %307 = vector.multi_reduction <add>, %306, %cst_112 [1] : vector<2x8x8xf32> to vector<2x8xf32>
    %308 = vector.shape_cast %307 : vector<2x8xf32> to vector<2x1x8xf32>
    %309 = math.log %308 : vector<2x1x8xf32>
    %310 = arith.addf %303, %309 : vector<2x1x8xf32>
    %311 = arith.addf %310, %284 : vector<2x1x8xf32>
    %312 = vector.extract_strided_slice %189 {offsets = [0, 5, 0], sizes = [2, 1, 8], strides = [1, 1, 1]} : vector<2x8x8xf32> to vector<2x1x8xf32>
    %313 = vector.shape_cast %297 : vector<2x1x8xf32> to vector<2x8x1xf32>
    %314 = vector.broadcast %313 : vector<2x8x1xf32> to vector<2x8x8xf32>
    %315 = vector.broadcast %191 : vector<1x8x8xf32> to vector<2x8x8xf32>
    %316 = arith.addf %314, %315 : vector<2x8x8xf32>
    %cst_113 = arith.constant dense<0xFF800000> : vector<2x8xf32>
    %317 = vector.multi_reduction <maximumf>, %316, %cst_113 [1] : vector<2x8x8xf32> to vector<2x8xf32>
    %318 = vector.shape_cast %317 : vector<2x8xf32> to vector<2x1x8xf32>
    %319 = vector.broadcast %318 : vector<2x1x8xf32> to vector<2x8x8xf32>
    %320 = arith.cmpf oge, %316, %319 : vector<2x8x8xf32>
    %c8_i32_114 = arith.constant 8 : i32
    %321 = vector.broadcast %c8_i32_114 : i32 to vector<2x8x8xi32>
    %322 = arith.select %320, %194, %321 : vector<2x8x8xi1>, vector<2x8x8xi32>
    %cst_115 = arith.constant dense<2147483647> : vector<2x8xi32>
    %323 = vector.multi_reduction <minsi>, %322, %cst_115 [1] : vector<2x8x8xi32> to vector<2x8xi32>
    %324 = vector.shape_cast %323 : vector<2x8xi32> to vector<2x1x8xi32>
    %325 = arith.addf %318, %312 : vector<2x1x8xf32>
    %326 = vector.shape_cast %311 : vector<2x1x8xf32> to vector<2x8x1xf32>
    %327 = vector.broadcast %326 : vector<2x8x1xf32> to vector<2x8x8xf32>
    %328 = vector.broadcast %191 : vector<1x8x8xf32> to vector<2x8x8xf32>
    %329 = arith.addf %327, %328 : vector<2x8x8xf32>
    %cst_116 = arith.constant dense<0xFF800000> : vector<2x8xf32>
    %330 = vector.multi_reduction <maximumf>, %329, %cst_116 [1] : vector<2x8x8xf32> to vector<2x8xf32>
    %331 = vector.shape_cast %330 : vector<2x8xf32> to vector<2x1x8xf32>
    %332 = vector.broadcast %331 : vector<2x1x8xf32> to vector<2x8x8xf32>
    %333 = arith.subf %329, %332 : vector<2x8x8xf32>
    %334 = math.exp %333 : vector<2x8x8xf32>
    %cst_117 = arith.constant dense<0.000000e+00> : vector<2x8xf32>
    %335 = vector.multi_reduction <add>, %334, %cst_117 [1] : vector<2x8x8xf32> to vector<2x8xf32>
    %336 = vector.shape_cast %335 : vector<2x8xf32> to vector<2x1x8xf32>
    %337 = math.log %336 : vector<2x1x8xf32>
    %338 = arith.addf %331, %337 : vector<2x1x8xf32>
    %339 = arith.addf %338, %312 : vector<2x1x8xf32>
    %340 = vector.extract_strided_slice %189 {offsets = [0, 6, 0], sizes = [2, 1, 8], strides = [1, 1, 1]} : vector<2x8x8xf32> to vector<2x1x8xf32>
    %341 = vector.shape_cast %325 : vector<2x1x8xf32> to vector<2x8x1xf32>
    %342 = vector.broadcast %341 : vector<2x8x1xf32> to vector<2x8x8xf32>
    %343 = vector.broadcast %191 : vector<1x8x8xf32> to vector<2x8x8xf32>
    %344 = arith.addf %342, %343 : vector<2x8x8xf32>
    %cst_118 = arith.constant dense<0xFF800000> : vector<2x8xf32>
    %345 = vector.multi_reduction <maximumf>, %344, %cst_118 [1] : vector<2x8x8xf32> to vector<2x8xf32>
    %346 = vector.shape_cast %345 : vector<2x8xf32> to vector<2x1x8xf32>
    %347 = vector.broadcast %346 : vector<2x1x8xf32> to vector<2x8x8xf32>
    %348 = arith.cmpf oge, %344, %347 : vector<2x8x8xf32>
    %c8_i32_119 = arith.constant 8 : i32
    %349 = vector.broadcast %c8_i32_119 : i32 to vector<2x8x8xi32>
    %350 = arith.select %348, %194, %349 : vector<2x8x8xi1>, vector<2x8x8xi32>
    %cst_120 = arith.constant dense<2147483647> : vector<2x8xi32>
    %351 = vector.multi_reduction <minsi>, %350, %cst_120 [1] : vector<2x8x8xi32> to vector<2x8xi32>
    %352 = vector.shape_cast %351 : vector<2x8xi32> to vector<2x1x8xi32>
    %353 = arith.addf %346, %340 : vector<2x1x8xf32>
    %354 = vector.shape_cast %339 : vector<2x1x8xf32> to vector<2x8x1xf32>
    %355 = vector.broadcast %354 : vector<2x8x1xf32> to vector<2x8x8xf32>
    %356 = vector.broadcast %191 : vector<1x8x8xf32> to vector<2x8x8xf32>
    %357 = arith.addf %355, %356 : vector<2x8x8xf32>
    %cst_121 = arith.constant dense<0xFF800000> : vector<2x8xf32>
    %358 = vector.multi_reduction <maximumf>, %357, %cst_121 [1] : vector<2x8x8xf32> to vector<2x8xf32>
    %359 = vector.shape_cast %358 : vector<2x8xf32> to vector<2x1x8xf32>
    %360 = vector.broadcast %359 : vector<2x1x8xf32> to vector<2x8x8xf32>
    %361 = arith.subf %357, %360 : vector<2x8x8xf32>
    %362 = math.exp %361 : vector<2x8x8xf32>
    %cst_122 = arith.constant dense<0.000000e+00> : vector<2x8xf32>
    %363 = vector.multi_reduction <add>, %362, %cst_122 [1] : vector<2x8x8xf32> to vector<2x8xf32>
    %364 = vector.shape_cast %363 : vector<2x8xf32> to vector<2x1x8xf32>
    %365 = math.log %364 : vector<2x1x8xf32>
    %366 = arith.addf %359, %365 : vector<2x1x8xf32>
    %367 = arith.addf %366, %340 : vector<2x1x8xf32>
    %368 = vector.extract_strided_slice %189 {offsets = [0, 7, 0], sizes = [2, 1, 8], strides = [1, 1, 1]} : vector<2x8x8xf32> to vector<2x1x8xf32>
    %369 = vector.shape_cast %353 : vector<2x1x8xf32> to vector<2x8x1xf32>
    %370 = vector.broadcast %369 : vector<2x8x1xf32> to vector<2x8x8xf32>
    %371 = vector.broadcast %191 : vector<1x8x8xf32> to vector<2x8x8xf32>
    %372 = arith.addf %370, %371 : vector<2x8x8xf32>
    %cst_123 = arith.constant dense<0xFF800000> : vector<2x8xf32>
    %373 = vector.multi_reduction <maximumf>, %372, %cst_123 [1] : vector<2x8x8xf32> to vector<2x8xf32>
    %374 = vector.shape_cast %373 : vector<2x8xf32> to vector<2x1x8xf32>
    %375 = vector.broadcast %374 : vector<2x1x8xf32> to vector<2x8x8xf32>
    %376 = arith.cmpf oge, %372, %375 : vector<2x8x8xf32>
    %c8_i32_124 = arith.constant 8 : i32
    %377 = vector.broadcast %c8_i32_124 : i32 to vector<2x8x8xi32>
    %378 = arith.select %376, %194, %377 : vector<2x8x8xi1>, vector<2x8x8xi32>
    %cst_125 = arith.constant dense<2147483647> : vector<2x8xi32>
    %379 = vector.multi_reduction <minsi>, %378, %cst_125 [1] : vector<2x8x8xi32> to vector<2x8xi32>
    %380 = vector.shape_cast %379 : vector<2x8xi32> to vector<2x1x8xi32>
    %381 = arith.addf %374, %368 : vector<2x1x8xf32>
    %382 = vector.shape_cast %367 : vector<2x1x8xf32> to vector<2x8x1xf32>
    %383 = vector.broadcast %382 : vector<2x8x1xf32> to vector<2x8x8xf32>
    %384 = vector.broadcast %191 : vector<1x8x8xf32> to vector<2x8x8xf32>
    %385 = arith.addf %383, %384 : vector<2x8x8xf32>
    %cst_126 = arith.constant dense<0xFF800000> : vector<2x8xf32>
    %386 = vector.multi_reduction <maximumf>, %385, %cst_126 [1] : vector<2x8x8xf32> to vector<2x8xf32>
    %387 = vector.shape_cast %386 : vector<2x8xf32> to vector<2x1x8xf32>
    %388 = vector.broadcast %387 : vector<2x1x8xf32> to vector<2x8x8xf32>
    %389 = arith.subf %385, %388 : vector<2x8x8xf32>
    %390 = math.exp %389 : vector<2x8x8xf32>
    %cst_127 = arith.constant dense<0.000000e+00> : vector<2x8xf32>
    %391 = vector.multi_reduction <add>, %390, %cst_127 [1] : vector<2x8x8xf32> to vector<2x8xf32>
    %392 = vector.shape_cast %391 : vector<2x8xf32> to vector<2x1x8xf32>
    %393 = math.log %392 : vector<2x1x8xf32>
    %394 = arith.addf %387, %393 : vector<2x1x8xf32>
    %395 = arith.addf %394, %368 : vector<2x1x8xf32>
    %396 = vector.shape_cast %193 : vector<1x8xf32> to vector<1x1x8xf32>
    %397 = vector.broadcast %396 : vector<1x1x8xf32> to vector<2x1x8xf32>
    %398 = arith.addf %381, %397 : vector<2x1x8xf32>
    %cst_128 = arith.constant dense<0xFF800000> : vector<2x1xf32>
    %399 = vector.multi_reduction <maximumf>, %398, %cst_128 [2] : vector<2x1x8xf32> to vector<2x1xf32>
    %400 = vector.shape_cast %399 : vector<2x1xf32> to vector<2x1x1xf32>
    %401 = vector.broadcast %400 : vector<2x1x1xf32> to vector<2x1x8xf32>
    %402 = arith.cmpf oge, %398, %401 : vector<2x1x8xf32>
    %c8_i32_129 = arith.constant 8 : i32
    %403 = vector.broadcast %c8_i32_129 : i32 to vector<2x1x8xi32>
    %404 = arith.select %402, %195, %403 : vector<2x1x8xi1>, vector<2x1x8xi32>
    %cst_130 = arith.constant dense<2147483647> : vector<2x1xi32>
    %405 = vector.multi_reduction <minsi>, %404, %cst_130 [2] : vector<2x1x8xi32> to vector<2x1xi32>
    %406 = vector.shape_cast %405 : vector<2x1xi32> to vector<2x1x1xi32>
    %407 = vector.broadcast %406 : vector<2x1x1xi32> to vector<2x1x8xi32>
    %408 = arith.cmpi eq, %195, %407 : vector<2x1x8xi32>
    %c0_i32 = arith.constant 0 : i32
    %409 = vector.broadcast %c0_i32 : i32 to vector<2x1x8xi32>
    %410 = arith.select %408, %380, %409 : vector<2x1x8xi1>, vector<2x1x8xi32>
    %cst_131 = arith.constant dense<0> : vector<2x1xi32>
    %411 = vector.multi_reduction <add>, %410, %cst_131 [2] : vector<2x1x8xi32> to vector<2x1xi32>
    %412 = vector.shape_cast %411 : vector<2x1xi32> to vector<2x1x1xi32>
    %413 = vector.broadcast %412 : vector<2x1x1xi32> to vector<2x1x8xi32>
    %414 = arith.cmpi eq, %195, %413 : vector<2x1x8xi32>
    %c0_i32_132 = arith.constant 0 : i32
    %415 = vector.broadcast %c0_i32_132 : i32 to vector<2x1x8xi32>
    %416 = arith.select %414, %352, %415 : vector<2x1x8xi1>, vector<2x1x8xi32>
    %cst_133 = arith.constant dense<0> : vector<2x1xi32>
    %417 = vector.multi_reduction <add>, %416, %cst_133 [2] : vector<2x1x8xi32> to vector<2x1xi32>
    %418 = vector.shape_cast %417 : vector<2x1xi32> to vector<2x1x1xi32>
    %419 = vector.broadcast %418 : vector<2x1x1xi32> to vector<2x1x8xi32>
    %420 = arith.cmpi eq, %195, %419 : vector<2x1x8xi32>
    %c0_i32_134 = arith.constant 0 : i32
    %421 = vector.broadcast %c0_i32_134 : i32 to vector<2x1x8xi32>
    %422 = arith.select %420, %324, %421 : vector<2x1x8xi1>, vector<2x1x8xi32>
    %cst_135 = arith.constant dense<0> : vector<2x1xi32>
    %423 = vector.multi_reduction <add>, %422, %cst_135 [2] : vector<2x1x8xi32> to vector<2x1xi32>
    %424 = vector.shape_cast %423 : vector<2x1xi32> to vector<2x1x1xi32>
    %425 = vector.broadcast %424 : vector<2x1x1xi32> to vector<2x1x8xi32>
    %426 = arith.cmpi eq, %195, %425 : vector<2x1x8xi32>
    %c0_i32_136 = arith.constant 0 : i32
    %427 = vector.broadcast %c0_i32_136 : i32 to vector<2x1x8xi32>
    %428 = arith.select %426, %296, %427 : vector<2x1x8xi1>, vector<2x1x8xi32>
    %cst_137 = arith.constant dense<0> : vector<2x1xi32>
    %429 = vector.multi_reduction <add>, %428, %cst_137 [2] : vector<2x1x8xi32> to vector<2x1xi32>
    %430 = vector.shape_cast %429 : vector<2x1xi32> to vector<2x1x1xi32>
    %431 = vector.broadcast %430 : vector<2x1x1xi32> to vector<2x1x8xi32>
    %432 = arith.cmpi eq, %195, %431 : vector<2x1x8xi32>
    %c0_i32_138 = arith.constant 0 : i32
    %433 = vector.broadcast %c0_i32_138 : i32 to vector<2x1x8xi32>
    %434 = arith.select %432, %268, %433 : vector<2x1x8xi1>, vector<2x1x8xi32>
    %cst_139 = arith.constant dense<0> : vector<2x1xi32>
    %435 = vector.multi_reduction <add>, %434, %cst_139 [2] : vector<2x1x8xi32> to vector<2x1xi32>
    %436 = vector.shape_cast %435 : vector<2x1xi32> to vector<2x1x1xi32>
    %437 = vector.broadcast %436 : vector<2x1x1xi32> to vector<2x1x8xi32>
    %438 = arith.cmpi eq, %195, %437 : vector<2x1x8xi32>
    %c0_i32_140 = arith.constant 0 : i32
    %439 = vector.broadcast %c0_i32_140 : i32 to vector<2x1x8xi32>
    %440 = arith.select %438, %240, %439 : vector<2x1x8xi1>, vector<2x1x8xi32>
    %cst_141 = arith.constant dense<0> : vector<2x1xi32>
    %441 = vector.multi_reduction <add>, %440, %cst_141 [2] : vector<2x1x8xi32> to vector<2x1xi32>
    %442 = vector.shape_cast %441 : vector<2x1xi32> to vector<2x1x1xi32>
    %443 = vector.broadcast %442 : vector<2x1x1xi32> to vector<2x1x8xi32>
    %444 = arith.cmpi eq, %195, %443 : vector<2x1x8xi32>
    %c0_i32_142 = arith.constant 0 : i32
    %445 = vector.broadcast %c0_i32_142 : i32 to vector<2x1x8xi32>
    %446 = arith.select %444, %212, %445 : vector<2x1x8xi1>, vector<2x1x8xi32>
    %cst_143 = arith.constant dense<0> : vector<2x1xi32>
    %447 = vector.multi_reduction <add>, %446, %cst_143 [2] : vector<2x1x8xi32> to vector<2x1xi32>
    %448 = vector.shape_cast %447 : vector<2x1xi32> to vector<2x1x1xi32>
    %449 = vector.shape_cast %193 : vector<1x8xf32> to vector<1x1x8xf32>
    %450 = vector.broadcast %449 : vector<1x1x8xf32> to vector<2x1x8xf32>
    %451 = arith.addf %395, %450 : vector<2x1x8xf32>
    %cst_144 = arith.constant dense<0xFF800000> : vector<2x1xf32>
    %452 = vector.multi_reduction <maximumf>, %451, %cst_144 [2] : vector<2x1x8xf32> to vector<2x1xf32>
    %453 = vector.shape_cast %452 : vector<2x1xf32> to vector<2x1x1xf32>
    %454 = vector.broadcast %453 : vector<2x1x1xf32> to vector<2x1x8xf32>
    %455 = arith.subf %451, %454 : vector<2x1x8xf32>
    %456 = math.exp %455 : vector<2x1x8xf32>
    %cst_145 = arith.constant dense<0.000000e+00> : vector<2x1xf32>
    %457 = vector.multi_reduction <add>, %456, %cst_145 [2] : vector<2x1x8xf32> to vector<2x1xf32>
    %458 = vector.shape_cast %457 : vector<2x1xf32> to vector<2x1x1xf32>
    %459 = math.log %458 : vector<2x1x1xf32>
    %460 = arith.addf %453, %459 : vector<2x1x1xf32>
    %461 = arith.subf %400, %460 : vector<2x1x1xf32>
    %462 = math.exp %461 : vector<2x1x1xf32>
    %463 = tpu.iota {dimensions = array<i32: 2>} : vector<2x1x128xi32>
    %cst_146 = arith.constant 0.000000e+00 : f32
    %464 = vector.broadcast %cst_146 : f32 to vector<2x1x128xf32>
    %c0_i32_147 = arith.constant 0 : i32
    %465 = vector.broadcast %c0_i32_147 : i32 to vector<2x1x128xi32>
    %466 = arith.cmpi eq, %463, %465 : vector<2x1x128xi32>
    %467 = arith.sitofp %448 : vector<2x1x1xi32> to vector<2x1x1xf32>
    %468 = vector.shape_cast %467 : vector<2x1x1xf32> to vector<2x1x1xf32>
    %469 = vector.broadcast %468 : vector<2x1x1xf32> to vector<2x1x128xf32>
    %470 = arith.select %466, %469, %464 : vector<2x1x128xi1>, vector<2x1x128xf32>
    %c1_i32 = arith.constant 1 : i32
    %471 = vector.broadcast %c1_i32 : i32 to vector<2x1x128xi32>
    %472 = arith.cmpi eq, %463, %471 : vector<2x1x128xi32>
    %473 = arith.sitofp %442 : vector<2x1x1xi32> to vector<2x1x1xf32>
    %474 = vector.shape_cast %473 : vector<2x1x1xf32> to vector<2x1x1xf32>
    %475 = vector.broadcast %474 : vector<2x1x1xf32> to vector<2x1x128xf32>
    %476 = arith.select %472, %475, %470 : vector<2x1x128xi1>, vector<2x1x128xf32>
    %c2_i32 = arith.constant 2 : i32
    %477 = vector.broadcast %c2_i32 : i32 to vector<2x1x128xi32>
    %478 = arith.cmpi eq, %463, %477 : vector<2x1x128xi32>
    %479 = arith.sitofp %436 : vector<2x1x1xi32> to vector<2x1x1xf32>
    %480 = vector.shape_cast %479 : vector<2x1x1xf32> to vector<2x1x1xf32>
    %481 = vector.broadcast %480 : vector<2x1x1xf32> to vector<2x1x128xf32>
    %482 = arith.select %478, %481, %476 : vector<2x1x128xi1>, vector<2x1x128xf32>
    %c3_i32 = arith.constant 3 : i32
    %483 = vector.broadcast %c3_i32 : i32 to vector<2x1x128xi32>
    %484 = arith.cmpi eq, %463, %483 : vector<2x1x128xi32>
    %485 = arith.sitofp %430 : vector<2x1x1xi32> to vector<2x1x1xf32>
    %486 = vector.shape_cast %485 : vector<2x1x1xf32> to vector<2x1x1xf32>
    %487 = vector.broadcast %486 : vector<2x1x1xf32> to vector<2x1x128xf32>
    %488 = arith.select %484, %487, %482 : vector<2x1x128xi1>, vector<2x1x128xf32>
    %c4_i32 = arith.constant 4 : i32
    %489 = vector.broadcast %c4_i32 : i32 to vector<2x1x128xi32>
    %490 = arith.cmpi eq, %463, %489 : vector<2x1x128xi32>
    %491 = arith.sitofp %424 : vector<2x1x1xi32> to vector<2x1x1xf32>
    %492 = vector.shape_cast %491 : vector<2x1x1xf32> to vector<2x1x1xf32>
    %493 = vector.broadcast %492 : vector<2x1x1xf32> to vector<2x1x128xf32>
    %494 = arith.select %490, %493, %488 : vector<2x1x128xi1>, vector<2x1x128xf32>
    %c5_i32 = arith.constant 5 : i32
    %495 = vector.broadcast %c5_i32 : i32 to vector<2x1x128xi32>
    %496 = arith.cmpi eq, %463, %495 : vector<2x1x128xi32>
    %497 = arith.sitofp %418 : vector<2x1x1xi32> to vector<2x1x1xf32>
    %498 = vector.shape_cast %497 : vector<2x1x1xf32> to vector<2x1x1xf32>
    %499 = vector.broadcast %498 : vector<2x1x1xf32> to vector<2x1x128xf32>
    %500 = arith.select %496, %499, %494 : vector<2x1x128xi1>, vector<2x1x128xf32>
    %c6_i32 = arith.constant 6 : i32
    %501 = vector.broadcast %c6_i32 : i32 to vector<2x1x128xi32>
    %502 = arith.cmpi eq, %463, %501 : vector<2x1x128xi32>
    %503 = arith.sitofp %412 : vector<2x1x1xi32> to vector<2x1x1xf32>
    %504 = vector.shape_cast %503 : vector<2x1x1xf32> to vector<2x1x1xf32>
    %505 = vector.broadcast %504 : vector<2x1x1xf32> to vector<2x1x128xf32>
    %506 = arith.select %502, %505, %500 : vector<2x1x128xi1>, vector<2x1x128xf32>
    %c7_i32 = arith.constant 7 : i32
    %507 = vector.broadcast %c7_i32 : i32 to vector<2x1x128xi32>
    %508 = arith.cmpi eq, %463, %507 : vector<2x1x128xi32>
    %509 = arith.sitofp %406 : vector<2x1x1xi32> to vector<2x1x1xf32>
    %510 = vector.shape_cast %509 : vector<2x1x1xf32> to vector<2x1x1xf32>
    %511 = vector.broadcast %510 : vector<2x1x1xf32> to vector<2x1x128xf32>
    %512 = arith.select %508, %511, %506 : vector<2x1x128xi1>, vector<2x1x128xf32>
    %c8_i32_148 = arith.constant 8 : i32
    %513 = vector.broadcast %c8_i32_148 : i32 to vector<2x1x128xi32>
    %514 = arith.cmpi eq, %463, %513 : vector<2x1x128xi32>
    %515 = vector.shape_cast %462 : vector<2x1x1xf32> to vector<2x1x1xf32>
    %516 = vector.broadcast %515 : vector<2x1x1xf32> to vector<2x1x128xf32>
    %517 = arith.select %514, %516, %512 : vector<2x1x128xi1>, vector<2x1x128xf32>
    %c0_149 = arith.constant 0 : index
    %c0_150 = arith.constant 0 : index
    %c0_151 = arith.constant 0 : index
    %518 = vector.load %arg30[%c0_149, %c0_150, %c0_151] : memref<2x1x128xf32, #tpu.memory_space<vmem>>, vector<2x1x128xf32>
    tpu.vector_store %arg30[%c0_149, %c0_150, %c0_151], %517 {strides = array<i32>} : memref<2x1x128xf32, #tpu.memory_space<vmem>>, vector<2x1x128xf32>,
    return
  }
  func.func @transform_0(%arg0: i32) -> (i32, i32, i32) {
    %c0_i32 = arith.constant 0 : i32
    %c0_i32_0 = arith.constant 0 : i32
    %c0_i32_1 = arith.constant 0 : i32
    return %arg0, %c0_i32, %c0_i32_0 : i32, i32, i32
  }
  func.func @transform_1(%arg0: i32) -> (i32, i32, i32) {
    %c0_i32 = arith.constant 0 : i32
    %c0_i32_0 = arith.constant 0 : i32
    %c0_i32_1 = arith.constant 0 : i32
    return %arg0, %c0_i32, %c0_i32_0 : i32, i32, i32
  }
  func.func @transform_2(%arg0: i32) -> (i32, i32, i32) {
    %c0_i32 = arith.constant 0 : i32
    %c0_i32_0 = arith.constant 0 : i32
    %c0_i32_1 = arith.constant 0 : i32
    return %arg0, %c0_i32, %c0_i32_0 : i32, i32, i32
  }
  func.func @transform_3(%arg0: i32) -> (i32, i32) {
    %c0_i32 = arith.constant 0 : i32
    %c0_i32_0 = arith.constant 0 : i32
    %c0_i32_1 = arith.constant 0 : i32
    return %c0_i32, %c0_i32_0 : i32, i32
  }
  func.func @transform_4(%arg0: i32) -> (i32, i32) {
    %c0_i32 = arith.constant 0 : i32
    %c0_i32_0 = arith.constant 0 : i32
    %c0_i32_1 = arith.constant 0 : i32
    return %c0_i32, %c0_i32_0 : i32, i32
  }
  func.func @transform_5(%arg0: i32) -> (i32, i32) {
    %c0_i32 = arith.constant 0 : i32
    %c0_i32_0 = arith.constant 0 : i32
    %c0_i32_1 = arith.constant 0 : i32
    return %c0_i32, %c0_i32_0 : i32, i32
  }
  func.func @transform_6(%arg0: i32) -> (i32, i32) {
    %c0_i32 = arith.constant 0 : i32
    %c0_i32_0 = arith.constant 0 : i32
    %c0_i32_1 = arith.constant 0 : i32
    return %c0_i32, %c0_i32_0 : i32, i32
  }
  func.func @transform_7(%arg0: i32) -> (i32, i32) {
    %c0_i32 = arith.constant 0 : i32
    %c0_i32_0 = arith.constant 0 : i32
    %c0_i32_1 = arith.constant 0 : i32
    return %c0_i32, %c0_i32_0 : i32, i32
  }
  func.func @transform_8(%arg0: i32) -> (i32, i32) {
    %c0_i32 = arith.constant 0 : i32
    %c0_i32_0 = arith.constant 0 : i32
    %c0_i32_1 = arith.constant 0 : i32
    return %c0_i32, %c0_i32_0 : i32, i32
  }
  func.func @transform_9(%arg0: i32) -> (i32, i32) {
    %c0_i32 = arith.constant 0 : i32
    %c0_i32_0 = arith.constant 0 : i32
    %c0_i32_1 = arith.constant 0 : i32
    return %c0_i32, %c0_i32_0 : i32, i32
  }
  func.func @transform_10(%arg0: i32) -> (i32, i32) {
    %c0_i32 = arith.constant 0 : i32
    %c0_i32_0 = arith.constant 0 : i32
    %c0_i32_1 = arith.constant 0 : i32
    return %c0_i32, %c0_i32_0 : i32, i32
  }
  func.func @transform_11(%arg0: i32) -> (i32, i32) {
    %c0_i32 = arith.constant 0 : i32
    %c0_i32_0 = arith.constant 0 : i32
    %c0_i32_1 = arith.constant 0 : i32
    return %c0_i32, %c0_i32_0 : i32, i32
  }
  func.func @transform_12(%arg0: i32) -> (i32, i32) {
    %c0_i32 = arith.constant 0 : i32
    %c0_i32_0 = arith.constant 0 : i32
    %c0_i32_1 = arith.constant 0 : i32
    return %c0_i32, %c0_i32_0 : i32, i32
  }
  func.func @transform_13(%arg0: i32) -> (i32, i32) {
    %c0_i32 = arith.constant 0 : i32
    %c0_i32_0 = arith.constant 0 : i32
    %c0_i32_1 = arith.constant 0 : i32
    return %c0_i32, %c0_i32_0 : i32, i32
  }
  func.func @transform_14(%arg0: i32) -> (i32, i32) {
    %c0_i32 = arith.constant 0 : i32
    %c0_i32_0 = arith.constant 0 : i32
    %c0_i32_1 = arith.constant 0 : i32
    return %c0_i32, %c0_i32_0 : i32, i32
  }
  func.func @transform_15(%arg0: i32) -> (i32, i32) {
    %c0_i32 = arith.constant 0 : i32
    %c0_i32_0 = arith.constant 0 : i32
    %c0_i32_1 = arith.constant 0 : i32
    return %c0_i32, %c0_i32_0 : i32, i32
  }
  func.func @transform_16(%arg0: i32) -> (i32, i32) {
    %c0_i32 = arith.constant 0 : i32
    %c0_i32_0 = arith.constant 0 : i32
    %c0_i32_1 = arith.constant 0 : i32
    return %c0_i32, %c0_i32_0 : i32, i32
  }
  func.func @transform_17(%arg0: i32) -> (i32, i32) {
    %c0_i32 = arith.constant 0 : i32
    %c0_i32_0 = arith.constant 0 : i32
    %c0_i32_1 = arith.constant 0 : i32
    return %c0_i32, %c0_i32_0 : i32, i32
  }
  func.func @transform_18(%arg0: i32) -> (i32, i32) {
    %c0_i32 = arith.constant 0 : i32
    %c0_i32_0 = arith.constant 0 : i32
    %c0_i32_1 = arith.constant 0 : i32
    return %c0_i32, %c0_i32_0 : i32, i32
  }
  func.func @transform_19(%arg0: i32) -> (i32, i32) {
    %c0_i32 = arith.constant 0 : i32
    %c0_i32_0 = arith.constant 0 : i32
    %c0_i32_1 = arith.constant 0 : i32
    return %c0_i32, %c0_i32_0 : i32, i32
  }
  func.func @transform_20(%arg0: i32) -> (i32, i32) {
    %c0_i32 = arith.constant 0 : i32
    %c0_i32_0 = arith.constant 0 : i32
    %c0_i32_1 = arith.constant 0 : i32
    return %c0_i32, %c0_i32_0 : i32, i32
  }
  func.func @transform_21(%arg0: i32) -> (i32, i32) {
    %c0_i32 = arith.constant 0 : i32
    %c0_i32_0 = arith.constant 0 : i32
    %c0_i32_1 = arith.constant 0 : i32
    return %c0_i32, %c0_i32_0 : i32, i32
  }
  func.func @transform_22(%arg0: i32) -> (i32, i32) {
    %c0_i32 = arith.constant 0 : i32
    %c0_i32_0 = arith.constant 0 : i32
    %c0_i32_1 = arith.constant 0 : i32
    return %c0_i32, %c0_i32_0 : i32, i32
  }
  func.func @transform_23(%arg0: i32) -> (i32, i32) {
    %c0_i32 = arith.constant 0 : i32
    %c0_i32_0 = arith.constant 0 : i32
    %c0_i32_1 = arith.constant 0 : i32
    return %c0_i32, %c0_i32_0 : i32, i32
  }
  func.func @transform_24(%arg0: i32) -> (i32, i32) {
    %c0_i32 = arith.constant 0 : i32
    %c0_i32_0 = arith.constant 0 : i32
    %c0_i32_1 = arith.constant 0 : i32
    return %c0_i32, %c0_i32_0 : i32, i32
  }
  func.func @transform_25(%arg0: i32) -> (i32, i32) {
    %c0_i32 = arith.constant 0 : i32
    %c0_i32_0 = arith.constant 0 : i32
    %c0_i32_1 = arith.constant 0 : i32
    return %c0_i32, %c0_i32_0 : i32, i32
  }
  func.func @transform_26(%arg0: i32) -> (i32, i32) {
    %c0_i32 = arith.constant 0 : i32
    %c0_i32_0 = arith.constant 0 : i32
    %c0_i32_1 = arith.constant 0 : i32
    return %c0_i32, %c0_i32_0 : i32, i32
  }
  func.func @transform_27(%arg0: i32) -> (i32, i32) {
    %c0_i32 = arith.constant 0 : i32
    %c0_i32_0 = arith.constant 0 : i32
    %c0_i32_1 = arith.constant 0 : i32
    return %c0_i32, %c0_i32_0 : i32, i32
  }
  func.func @transform_28(%arg0: i32) -> (i32, i32) {
    %c0_i32 = arith.constant 0 : i32
    %c0_i32_0 = arith.constant 0 : i32
    %c0_i32_1 = arith.constant 0 : i32
    return %c0_i32, %c0_i32_0 : i32, i32
  }
  func.func @transform_29(%arg0: i32) -> (i32, i32, i32) {
    %c0_i32 = arith.constant 0 : i32
    %c0_i32_0 = arith.constant 0 : i32
    %c0_i32_1 = arith.constant 0 : i32
    return %arg0, %c0_i32, %c0_i32_0 : i32, i32, i32
  }
}

</mosaic_0001>

<bundles_post_ra>
// kernel: kobert_crf_forward.1
= control target key start
LH: loop header
LB: loop body
LE: loop exit
PB: predicated region body
PF: predicated region fallthrough
CT: control target
= control target key end

     0   :  { %s2978_s6 = smov 1   ;;  %s2979_s10 = smov 2   ;;  %s3875_s0 = inlined_call_operand.smem [shape: u32[30], index: -1, kind: input, shape index: {}] }
   0x1   :  { %s3030_s5 = sld [smem:[%s3875_s0]]   ;;  %s2980_s14 = smov 3  }
   0x2   :  { %s3035_s9 = sld [smem:[%s3875_s0 + %s2978_s6]]   ;;  %s2981_s18 = smov 4  }
   0x3   :  { %s3040_s13 = sld [smem:[%s3875_s0 + %s2979_s10]]   ;;  %s2982_s22 = smov 5  }
   0x4   :  { %s3045_s17 = sld [smem:[%s3875_s0 + %s2980_s14]]   ;;  %s2983_s26 = smov 6  }
   0x5   :  { %s3050_s21 = sld [smem:[%s3875_s0 + %s2981_s18]]   ;;  %s2984_s30 = smov 7  }
   0x6   :  { %s3055_s25 = sld [smem:[%s3875_s0 + %s2982_s22]]   ;;  %s2985_s4 = smov 8  }
   0x7   :  { %s3060_s29 = sld [smem:[%s3875_s0 + %s2983_s26]]   ;;  %s2986_s10 = smov 9  }
   0x8   :  { %s3065_s3 = sld [smem:[%s3875_s0 + %s2984_s30]]   ;;  %s2987_s15 = smov 10  }
   0x9   :  { %s3070_s8 = sld [smem:[%s3875_s0 + %s2985_s4]]   ;;  %s2988_s20 = smov 11  }
   0xa   :  { %s3075_s14 = sld [smem:[%s3875_s0 + %s2986_s10]]   ;;  %s2989_s26 = smov 12  }
   0xb   :  { %s3080_s19 = sld [smem:[%s3875_s0 + %s2987_s15]]   ;;  %s2990_s1 = smov 13  }
   0xc   :  { %s3085_s24 = sld [smem:[%s3875_s0 + %s2988_s20]]   ;;  %s2991_s7 = smov 14  }
   0xd   :  { %s3090_s30 = sld [smem:[%s3875_s0 + %s2989_s26]]   ;;  %s2992_s15 = smov 15  }
   0xe   :  { %s3095_s6 = sld [smem:[%s3875_s0 + %s2990_s1]]   ;;  %s2993_s22 = smov 16  }
   0xf   :  { %s3100_s12 = sld [smem:[%s3875_s0 + %s2991_s7]]   ;;  %s2994_s28 = smov 17  }
  0x10   :  { %3877 = sst [smem:[#allocation20_spill]] %s3075_s14  ;;  %s2995_s7 = smov 18  }
  0x11   :  { %s3105_s20 = sld [smem:[%s3875_s0 + %s2992_s15]]   ;;  %s2996_s15 = smov 19  }
  0x12   :  { %3878 = sst [smem:[#allocation21_spill]] %s3085_s24 }
  0x13   :  { %s3110_s27 = sld [smem:[%s3875_s0 + %s2993_s22]]   ;;  %s2997_s22 = smov 20  }
  0x14   :  { %3879 = sst [smem:[#allocation22_spill]] %s3095_s6 }
  0x15   :  { %s3115_s4 = sld [smem:[%s3875_s0 + %s2994_s28]]   ;;  %s2998_s28 = smov 21  }
  0x16   :  { %s3120_s6 = sld [smem:[%s3875_s0 + %s2995_s7]]   ;;  %s2999_s7 = smov 22  }
  0x17   :  { %3880 = sst [smem:[#allocation23_spill]] %s3105_s20 }
  0x18   :  { %s3125_s20 = sld [smem:[%s3875_s0 + %s2996_s15]]   ;;  %s3000_s15 = smov 23  }
  0x19   :  { %3881 = sst [smem:[#allocation24_spill]] %s3110_s27 }
  0x1a   :  { %s3130_s27 = sld [smem:[%s3875_s0 + %s2997_s22]]   ;;  %s3001_s22 = smov 24  }
  0x1b   :  { %3882 = sst [smem:[#allocation25_spill]] %s3115_s4 }
  0x1c   :  { %s3135_s4 = sld [smem:[%s3875_s0 + %s2998_s28]]   ;;  %s3002_s28 = smov 25  }
  0x1d   :  { %s3140_s14 = sld [smem:[%s3875_s0 + %s2999_s7]]   ;;  %s3003_s7 = smov 26  }
  0x1e   :  { %3883 = sst [smem:[#allocation26_spill]] %s3125_s20 }
  0x1f   :  { %s3145_s20 = sld [smem:[%s3875_s0 + %s3000_s15]]   ;;  %s3004_s15 = smov 27  }
  0x20   :  { %3884 = sst [smem:[#allocation27_spill]] %s3130_s27 }
  0x21   :  { %s3150_s27 = sld [smem:[%s3875_s0 + %s3001_s22]]   ;;  %s3005_s22 = smov 28  }
  0x22   :  { %3885 = sst [smem:[#allocation28_spill]] %s3135_s4 }
  0x23   :  { %3886 = sst [smem:[#allocation29_spill]] %s3140_s14 }
  0x24   :  { %s3155_s4 = sld [smem:[%s3875_s0 + %s3002_s28]]   ;;  %s3006_s28 = smov 29  }
  0x25   :  { %3887 = sst [smem:[#allocation30_spill]] %s3145_s20 }
  0x26   :  { %s3160_s14 = sld [smem:[%s3875_s0 + %s3003_s7]]  }
  0x27   :  { %s3165_s20 = sld [smem:[%s3875_s0 + %s3004_s15]]  }
  0x28   :  { %s3170_s24 = sld [smem:[%s3875_s0 + %s3005_s22]]  }
  0x2a   :  { %3888 = sst [smem:[#allocation31_spill]] %s3155_s4 }
  0x2b   :  { %s3175_s4 = sld [smem:[%s3875_s0 + %s3006_s28]]  }
  0x2c   :  { %64 = vsyncpa [#allocation3], 0 }
  0x2d   :  { %65 = vsyncpa [#allocation5], 0 }
  0x2e   :  { %66 = vsyncpa [#allocation8], 0 }
  0x2f   :  { %67 = vsyncpa [#allocation11], 0 }
  0x30   :  { %68 = vsyncpa [#allocation14], 0  ;;  %s3007_s7 = smov [#allocation4]  }
  0x31   :  { %s93_s10 = sshll.u32 %s3007_s7, 4  ;;  %s94_s10 = int_to_ptr.vmem [resolvable:$true] %s93_s10 }
  0x32   :  { %s2816_s11 = scalar_lea.vmem %s94_s10, 128  ;;  %p2821_p1 = scmp.lt.s32.totalorder %s94_s10, %s94_s10 }
  0x33   :  { %p2817_p0 = scmp.ne.s32.totalorder %s94_s10, %s2816_s11  ;;  %p2822_p2 = scmp.lt.s32.totalorder %s2816_s11, %s2816_s11 }
  0x35   :  { %p2823_p3 = por %p2822_p2, %p2821_p1 }
  0x37   :  { %p2824_p4 = pnand %p2823_p3, %p2817_p0 }
  0x39   :  { %2827 = shalt.err (!%p2824_p4)
}
  0x3a   :  { %96 = dma.hbm_to_vmem [thread:$0]  %s3050_s21, 128, %s94_s10, [#allocation5]  }
  0x3b   :  { %s3008_s15 = smov [#allocation7]   ;;  %s3009_s16 = smov [#allocation10]  }
  0x3c   :  { %s122_s0 = sshll.u32 %s3008_s15, 4  ;;  %s150_s18 = sshll.u32 %s3009_s16, 4  ;;  %s123_s0 = int_to_ptr.vmem [resolvable:$true] %s122_s0  ;;  %s151_s18 = int_to_ptr.vmem [resolvable:$true] %s150_s18 }
  0x3d   :  { %s2836_s22 = scalar_lea.vmem %s123_s0, 256  ;;  %p2841_p6 = scmp.lt.s32.totalorder %s123_s0, %s123_s0 }
  0x3e   :  { %p2837_p5 = scmp.ne.s32.totalorder %s123_s0, %s2836_s22  ;;  %p2842_p7 = scmp.lt.s32.totalorder %s2836_s22, %s2836_s22 }
  0x40   :  { %p2843_p8 = por %p2842_p7, %p2841_p6 }
  0x42   :  { %p2844_p9 = pnand %p2843_p8, %p2837_p5 }
  0x44   :  { %2847 = shalt.err (!%p2844_p9)
}
  0x45   :  { %s3010_s23 = smov 64   ;;  %s3011_s26 = smov 4  }
  0x46   :  { %128 = dma.hbm_to_vmem [thread:$0]  %s3080_s19, 256, %s123_s0, [#allocation8], %s3010_s23, %s3010_s23, %s3011_s26  }
  0x47   :  { %s2856_s21 = scalar_lea.vmem %s151_s18, 256  ;;  %p2861_p11 = scmp.lt.s32.totalorder %s151_s18, %s151_s18 }
  0x48   :  { %p2857_p10 = scmp.ne.s32.totalorder %s151_s18, %s2856_s21  ;;  %p2862_p12 = scmp.lt.s32.totalorder %s2856_s21, %s2856_s21 }
  0x4a   :  { %p2863_p13 = por %p2862_p12, %p2861_p11 }
  0x4c   :  { %p2864_p0 = pnand %p2863_p13, %p2857_p10 }
  0x4e   :  { %2867 = shalt.err (!%p2864_p0)
}
  0x4f   :  { %156 = dma.hbm_to_vmem [thread:$0]  %s3100_s12, 256, %s151_s18, [#allocation11], %s3010_s23, %s3010_s23, %s3011_s26  }
  0x50   :  { %s3012_s28 = smov [#allocation2]  }
  0x51   :  { %s80_s1 = sshll.u32 %s3012_s28, 4  ;;  %s81_s1 = int_to_ptr.vmem [resolvable:$true] %s80_s1 }
  0x52   :  { %s2876_s2 = scalar_lea.vmem %s81_s1, 512  ;;  %p2881_p2 = scmp.lt.s32.totalorder %s81_s1, %s81_s1 }
  0x53   :  { %p2877_p1 = scmp.ne.s32.totalorder %s81_s1, %s2876_s2  ;;  %p2882_p3 = scmp.lt.s32.totalorder %s2876_s2, %s2876_s2 }
  0x55   :  { %p2883_p4 = por %p2882_p3, %p2881_p2 }
  0x57   :  { %p2884_p5 = pnand %p2883_p4, %p2877_p1 }
  0x59   :  { %2887 = shalt.err (!%p2884_p5)
}
  0x5a   :  { %s3013_s19 = smov 128   ;;  %s3014_s7 = smov 8  }
  0x5b   :  { %86 = dma.hbm_to_vmem [thread:$0]  %s3045_s17, 512, %s81_s1, [#allocation3], %s3013_s19, %s3013_s19, %s3014_s7  }
  0x5c   :  { %s3015_s10 = smov [#allocation6]   ;;  %s3016_s12 = smov [#allocation9]  }
  0x5d   :  { %s108_s11 = sshll.u32 %s3015_s10, 4  ;;  %s136_s15 = sshll.u32 %s3016_s12, 4  ;;  %s109_s11 = int_to_ptr.vmem [resolvable:$true] %s108_s11  ;;  %s137_s15 = int_to_ptr.vmem [resolvable:$true] %s136_s15 }
  0x5e   :  { %s2896_s0 = scalar_lea.vmem %s109_s11, 256  ;;  %p2901_p7 = scmp.lt.s32.totalorder %s109_s11, %s109_s11 }
  0x5f   :  { %p2897_p6 = scmp.ne.s32.totalorder %s109_s11, %s2896_s0  ;;  %p2902_p8 = scmp.lt.s32.totalorder %s2896_s0, %s2896_s0 }
  0x61   :  { %p2903_p9 = por %p2902_p8, %p2901_p7 }
  0x63   :  { %p2904_p10 = pnand %p2903_p9, %p2897_p6 }
  0x65   :  { %2907 = shalt.err (!%p2904_p10)
}
  0x66   :  { %114 = dma.hbm_to_vmem [thread:$0]  %s3070_s8, 256, %s109_s11, [#allocation5], %s3010_s23, %s3010_s23, %s3011_s26  }
  0x67   :  { %s2916_s16 = scalar_lea.vmem %s137_s15, 256  ;;  %p2921_p12 = scmp.lt.s32.totalorder %s137_s15, %s137_s15 }
  0x68   :  { %p2917_p11 = scmp.ne.s32.totalorder %s137_s15, %s2916_s16  ;;  %p2922_p13 = scmp.lt.s32.totalorder %s2916_s16, %s2916_s16 }
  0x6a   :  { %p2923_p0 = por %p2922_p13, %p2921_p12 }
  0x6c   :  { %p2924_p1 = pnand %p2923_p0, %p2917_p11 }
  0x6e   :  { %2927 = shalt.err (!%p2924_p1)
}
  0x6f   :  { %142 = dma.hbm_to_vmem [thread:$0]  %s3090_s30, 256, %s137_s15, [#allocation8], %s3010_s23, %s3010_s23, %s3011_s26  }
  0x70   :  { %s3017_s17 = smov [#allocation12]   ;;  %s3018_s22 = smov [#allocation13]  }
  0x71   :  { %s168_s18 = sshll.u32 %s3017_s17, 4  ;;  %s190_s21 = sshll.u32 %s3018_s22, 4  ;;  %s169_s18 = int_to_ptr.vmem [resolvable:$true] %s168_s18  ;;  %s191_s21 = int_to_ptr.vmem [resolvable:$true] %s190_s21 }
  0x72   :  { %s2936_s28 = scalar_lea.vmem %s169_s18, 256  ;;  %p2941_p3 = scmp.lt.s32.totalorder %s169_s18, %s169_s18 }
  0x73   :  { %p2937_p2 = scmp.ne.s32.totalorder %s169_s18, %s2936_s28  ;;  %p2942_p4 = scmp.lt.s32.totalorder %s2936_s28, %s2936_s28 }
  0x75   :  { %p2943_p5 = por %p2942_p4, %p2941_p3 }
  0x77   :  { %p2944_p6 = pnand %p2943_p5, %p2937_p2 }
  0x79   :  { %2947 = shalt.err (!%p2944_p6)
}
  0x7a   :  { %174 = dma.hbm_to_vmem [thread:$0]  %s3120_s6, 256, %s169_s18, [#allocation11], %s3010_s23, %s3010_s23, %s3011_s26  }
  0x7b   :  { %s2956_s8 = scalar_lea.vmem %s191_s21, 512  ;;  %p2961_p8 = scmp.lt.s32.totalorder %s191_s21, %s191_s21 }
  0x7c   :  { %p2957_p7 = scmp.ne.s32.totalorder %s191_s21, %s2956_s8  ;;  %p2962_p9 = scmp.lt.s32.totalorder %s2956_s8, %s2956_s8 }
  0x7e   :  { %p2963_p10 = por %p2962_p9, %p2961_p8 }
  0x80   :  { %p2964_p11 = pnand %p2963_p10, %p2957_p7 }
  0x82   :  { %2967 = shalt.err (!%p2964_p11)
}
  0x83   :  { %196 = dma.hbm_to_vmem [thread:$0]  %s3150_s27, 512, %s191_s21, [#allocation14], %s3013_s19, %s3013_s19, %s3014_s7  }
  0x84   :  { %2968 = dma.done.wait [#allocation3], 512  }
  0x85   :  { %2969 = vsyncadd [#allocation3], 4294966784 }
  0x86   :  { %2970 = dma.done.wait [#allocation5], 384  }
  0x87   :  { %2971 = vsyncadd [#allocation5], 4294966912 }
  0x88   :  { %2972 = dma.done.wait [#allocation8], 512  }
  0x89   :  { %2973 = vsyncadd [#allocation8], 4294966784 }
  0x8a   :  { %2974 = dma.done.wait [#allocation11], 512  }
  0x8b   :  { %2975 = vsyncadd [#allocation11], 4294966784 }
  0x8c   :  { %2976 = dma.done.wait [#allocation14], 512  }
  0x8d   :  { %2977 = vsyncadd [#allocation14], 4294966784  ;;  %v3019_v0 = vmov 0   ;;  %v3020_v1 = vmov 0.0   ;;  %v230_v2 = vld [vmem:[%s3030_s5] sm:$0xff]  ;;  %v249_v3 = vld [vmem:[#allocation2 + $0x18] sm:$0xff]  ;;  %v232_v12 = vlaneseq }
  0x8e   :  { %2694 = vset.pattern.permute.xlu0 %v3019_v0  ;;  %2695 = vset.pattern.permute.xlu1 %v3019_v0  ;;  %v231_v4 = vld [vmem:[%s3030_s5 + $0x8] sm:$0xff]  ;;  %v248_v5 = vld [vmem:[#allocation2 + $0x10] sm:$0xff]  ;;  %v332_v7 = vld [vmem:[%s3035_s9] sm:$0xff]  ;;  %vm250_vm0 = vcmask 261120   ;;  %vm3021_vm3 = vmmov 0   ;;  %s3889_s5 = sld [smem:[#allocation21_spill]] }
  0x8f   :  { %2579 = vmatprep.subr.bf16.mxu0 %v3020_v1  ;;  %235 = vperm.xlu0 %2694, %v230_v2   ;;  %v247_v6 = vld [vmem:[#allocation2 + $0x8] sm:$0xff]  ;;  %v246_v9 = vld [vmem:[#allocation2] sm:$0xff]  ;;  %v334_v10 = vcvt.s32.f32 %v332_v7  ;;  %v3212_v13 = vand.u32 127, %v232_v12  ;;  %v3220_v18 = vshrl.u32 %v232_v12, 7  ;;  %v2696_v52 = vld [vmem:[#allocation6 + $0x8] sm:$0xff]   ;;  %vm759_vm4 = vcmask 1043456  }
  0x90   :  { %2544 = vmatprep.subr.mxu1 %v249_v3  ;;  %v333_v8 = vld [vmem:[%s3035_s9 + $0x8] sm:$0xff]  ;;  %v336_v19 = vld [vmem:[%s3055_s25] sm:$0x1]  ;;  %v337_v20 = vld [vmem:[%s3055_s25 + $0x1] sm:$0x1]  ;;  %2581 = vmatprep.mubr.msk.bf16.mxu0 %vm3021_vm3, %v3020_v1  ;;  %s3890_s9 = sld [smem:[#allocation20_spill]] }
  0x91   :  { %2545 = vmatpush3.msra.mxu1 %v249_v3  ;;  %341 = vperm.xlu1 %2695, %v334_v10   ;;  %v335_v11 = vcvt.s32.f32 %v333_v8  ;;  %v338_v22 = vsub.f32 %v337_v20, %v336_v19  ;;  %v3225_v23 = vsub.s32 0, %v3220_v18  ;;  %v361_v29 = vld [vmem:[#allocation4] sm:$0xff]  ;;  %v2697_v53 = vld [vmem:[#allocation6] sm:$0xff]   ;;  %v2700_v10 = vld [vmem:[#allocation9 + $0x8] sm:$0xff]   ;;  %vm729_vm7 = vcmask 64512   ;;  %s3892_s25 = sld [smem:[#allocation23_spill]] }
  0x92   :  { %2546 = vmatprep.subr.mxu1 %v248_v5  ;;  %v411_v40 = vld [vmem:[%s3040_s13] sm:$0x1]  ;;  %v412_v51 = vld [vmem:[%s3040_s13 + $0x1] sm:$0x1]  ;;  %s3891_s13 = sld [smem:[#allocation22_spill]] }
  0x93   :  { %2547 = vmatpush3.msra.mxu1 %v248_v5  ;;  %238 = vperm.xlu0 %2694, %v231_v4   ;;  %v352_v24 = vrot.slane %v338_v22, %v3225_v23  ;;  %v358_v26 = vrot.slane %v336_v19, %v3225_v23  ;;  %v2453_v62 = vld [vmem:[%s3060_s29] ss:$0 sm:$0xff]  ;;  %s3893_s29 = sld [smem:[#allocation24_spill]] }
  0x94   :  { %2548 = vmatprep.subr.mxu1 %v247_v6  ;;  %v2454_v3 = vld [vmem:[%s3065_s3] ss:$0 sm:$0xff]  ;;  %s3894_s3 = sld [smem:[#allocation25_spill]] }
  0x95   :  { %2549 = vmatpush3.msra.mxu1 %v247_v6  ;;  %346 = vperm.xlu1 %2695, %v335_v11   ;;  %v2698_v7 = vld [vmem:[#allocation7 + $0x8] sm:$0xff]   ;;  %v2701_v11 = vld [vmem:[#allocation9] sm:$0xff]   ;;  %s3895_s30 = sld [smem:[#allocation27_spill]] }
  0x96   :  { %2550 = vmatprep.subr.mxu1 %v246_v9  ;;  %s3896_s6 = sld [smem:[#allocation26_spill]] }
  0x97   :  { %2551 = vmatpush3.msra.mxu1 %v246_v9  ;;  %v2699_v9 = vld [vmem:[#allocation7] sm:$0xff]   ;;  %s3897_s27 = sld [smem:[#allocation28_spill]] }
  0x98   :  { %2555 = vmatprep.subr.bf16.mxu1 %v3020_v1  ;;  %s3898_s23 = sld [smem:[#allocation29_spill]] }
  0x99   :  { %s3899_s26 = sld [smem:[#allocation30_spill]] }
  0x9a   :  { %s3900_s1 = sld [smem:[#allocation31_spill]] }
 0x10a   :  { %v236_v14 = vpop.permute.xlu0 %235 }
 0x10b   :  { %vm240_vm1 = vcmp.eq.s32.totalorder %v3212_v13, %v236_v14 }
 0x10c   :  { %v2449_v15 = vsel %vm240_vm1, 1.0, %v3020_v1  ;;  %v342_v21 = vpop.permute.xlu1 %341 }
 0x10d   :  { %2552 = vmatprep.mubr.msk.f32.mxu1 %vm250_vm0, %v2449_v15  ;;  %v353_v28 = vmul.f32 %v352_v24, %v342_v21 }
 0x10e   :  { %v239_v16 = vpop.permute.xlu0 %238 }
 0x10f   :  { %vm241_vm2 = vcmp.eq.s32.totalorder %v3212_v13, %v239_v16  ;;  %v359_v32 = vadd.f32 %v358_v26, %v353_v28 }
 0x110   :  { %v2450_v17 = vsel %vm241_vm2, 1.0, %v3020_v1  ;;  %v347_v25 = vpop.permute.xlu1 %346 }
 0x111   :  { %2553 = vmatmul.mubr.msk.f32.vlgmr.msra.gmra.mxu1 %vm250_vm0, %v2450_v17  ;;  %v354_v27 = vmul.f32 %v352_v24, %v347_v25  ;;  %v2461_v17 = vld [vmem:[%s3889_s5] ss:$0 sm:$0xff] }
 0x112   :  { %2556 = vmatpush3.bf16.msra.mxu1 %v2696_v52  ;;  %2559 = vmatprep.mubr.msk.bf16.mxu1 %vm3021_vm3, %v3020_v1  ;;  %v2457_v24 = vld [vmem:[%s3890_s9] ss:$0 sm:$0xff] }
 0x113   :  { %v360_v30 = vadd.f32 %v358_v26, %v354_v27  ;;  %2557 = vmatprep.subr.bf16.mxu1 %v3020_v1 }
 0x116   :  { %2558 = vmatpush3.bf16.msra.mxu1 %v2697_v53 }
 0x117   :  { %2563 = vmatprep.subr.bf16.mxu1 %v3020_v1 }
 0x1d1   :  { %v2554_v31 = vpop.f32.mrf.mxu1 }
 0x1d2   :  { %v363_v33 = vadd.f32 %v2554_v31, %v361_v29 }
 0x1d3   :  { %v323_v34 = vpop.f32.mrf.mxu1 }
 0x1d4   :  { %v362_v35 = vadd.f32 %v361_v29, %v323_v34  ;;  %v365_v36 = vadd.f32 %v363_v33, %v360_v30  ;;  %v2465_v29 = vld [vmem:[%s3891_s13] ss:$0 sm:$0xff] }
 0x1d6   :  { %v371_v37 = vsel %vm250_vm0, %v365_v36, 0.0  ;;  %v364_v38 = vadd.f32 %v362_v35, %v359_v32 }
 0x1d7   :  { %372 = vadd.xlane.f32.xlu1 %v371_v37 }
 0x1d8   :  { %v368_v39 = vsel %vm250_vm0, %v364_v38, 0.0 }
 0x1d9   :  { %369 = vadd.xlane.f32.xlu0 %v368_v39 }
 0x1e8   :  { %414 = vperm.xlu1 %2695, %v411_v40  }
 0x260   :  { %v373_v41 = vpop.xlane.xlu1 %372 }
 0x261   :  { %v376_v42 = vmul.f32 0.03125, %v373_v41 }
 0x262   :  { %v370_v43 = vpop.xlane.xlu0 %369 }
 0x263   :  { %v375_v44 = vmul.f32 0.03125, %v370_v43  ;;  %v378_v45 = vsub.f32 %v365_v36, %v376_v42 }
 0x265   :  { %v377_v46 = vsub.f32 %v364_v38, %v375_v44  ;;  %v380_v49 = vmul.f32 %v378_v45, %v378_v45 }
 0x267   :  { %v379_v47 = vmul.f32 %v377_v46, %v377_v46  ;;  %v384_v50 = vsel %vm250_vm0, %v380_v49, 0.0 }
 0x269   :  { %v381_v48 = vsel %vm250_vm0, %v379_v47, 0.0 }
 0x26a   :  { %382 = vadd.xlane.f32.xlu0 %v381_v48 }
 0x26e   :  { %385 = vadd.xlane.f32.xlu0 %v384_v50 }
 0x284   :  { %421 = vperm.xlu0 %2694, %v412_v51  }
 0x2f3   :  { %v383_v54 = vpop.xlane.xlu0 %382 }
 0x2f4   :  { %v387_v55 = vmul.f32 0.03125, %v383_v54 }
 0x2f6   :  { %v389_v56 = vadd.f32 1e-12, %v387_v55 }
 0x2f7   :  { %v386_v57 = vpop.xlane.xlu0 %385 }
 0x2f8   :  { %2714 = vrsqrt.f32 %v389_v56  ;;  %v388_v58 = vmul.f32 0.03125, %v386_v57 }
 0x2fa   :  { %v390_v59 = vadd.f32 1e-12, %v388_v58 }
 0x2fc   :  { %2716 = vrsqrt.f32 %v390_v59 }
 0x2ff   :  { %v422_v48 = vpop.permute.xlu0 %421 }
 0x300   :  { %v426_v49 = vrot.slane %v422_v48, %v3225_v23 }
 0x302   :  { %vm428_vm6 = vcmp.lt.s32.totalorder %v3212_v13, %v426_v49 }
 0x303   :  { %v2456_v52 = vsel %vm428_vm6, 1.0, %v3020_v1 }
 0x304   :  { %v2470_v54 = vadd.f32 -1.0, %v2456_v52 }
 0x305   :  { %v2715_v60 = vpop.eup %2714 }
 0x306   :  { %v393_v61 = vmul.f32 %v2715_v60, %v377_v46  ;;  %v415_v46 = vpop.permute.xlu1 %414  ;;  %v636_v59 = vmul.f32 1e+09, %v2470_v54 }
 0x307   :  { %v419_v47 = vrot.slane %v415_v46, %v3225_v23 }
 0x308   :  { %v401_v2 = vmul.f32 %v2453_v62, %v393_v61 }
 0x309   :  { %v2717_v63 = vpop.eup %2716  ;;  %vm427_vm5 = vcmp.lt.s32.totalorder %v3212_v13, %v419_v47 }
 0x30a   :  { %v394_v0 = vmul.f32 %v2717_v63, %v378_v45  ;;  %v3243_v5 = vadd.f32 %v2454_v3, %v401_v2  ;;  %v2455_v50 = vsel %vm427_vm5, 1.0, %v3020_v1  ;;  %vm2083_vm5 = vcmask 64519  }
 0x30b   :  { %v2469_v51 = vadd.f32 -1.0, %v2455_v50 }
 0x30c   :  { %v402_v4 = vmul.f32 %v2453_v62, %v394_v0 }
 0x30d   :  { %v635_v53 = vmul.f32 1e+09, %v2469_v51 }
 0x30e   :  { %v3245_v6 = vadd.f32 %v2454_v3, %v402_v4 }
 0x310   :  { %v433_v8 = vpack.c.bf16 %v3245_v6, %v3243_v5 }
 0x312   :  { %2560 = vmatmul.mubr.msk.bf16.vlgmr.msra.gmra.mxu1 %vm250_vm0, %v433_v8 }
 0x313   :  { %2564 = vmatpush3.bf16.msra.mxu1 %v2698_v7  ;;  %2567 = vmatprep.mubr.msk.bf16.mxu1 %vm3021_vm3, %v3020_v1 }
 0x314   :  { %2565 = vmatprep.subr.bf16.mxu1 %v3020_v1 }
 0x317   :  { %2566 = vmatpush3.bf16.msra.mxu1 %v2699_v9 }
 0x318   :  { %2571 = vmatprep.subr.bf16.mxu1 %v3020_v1 }
 0x31a   :  { %2568 = vmatmul.mubr.msk.bf16.vlgmr.msra.gmra.mxu1 %vm250_vm0, %v433_v8 }
 0x31b   :  { %2572 = vmatpush3.bf16.msra.mxu1 %v2700_v10  ;;  %2575 = vmatprep.mubr.msk.bf16.mxu1 %vm3021_vm3, %v3020_v1 }
 0x31c   :  { %2573 = vmatprep.subr.bf16.mxu1 %v3020_v1 }
 0x31f   :  { %2574 = vmatpush3.bf16.msra.mxu1 %v2701_v11 }
 0x320   :  { %2585 = vmatprep.subr.bf16.mxu1 %v3020_v1 }
 0x322   :  { %2576 = vmatmul.mubr.msk.bf16.vlgmr.msra.gmra.mxu1 %vm250_vm0, %v433_v8 }
 0x323   :  { %2587 = vmatprep.mubr.msk.bf16.mxu1 %vm3021_vm3, %v3020_v1 }
 0x3d2   :  { %v494_v12 = vpop.f32.mrf.mxu1 }
 0x3d3   :  { %v495_v30 = vadd.f32 %v2457_v24, %v494_v12 }
 0x3d4   :  { %v2561_v14 = vpop.f32.mrf.mxu1 }
 0x3d5   :  { %v629_v36 = vpack.c.bf16 %v495_v30, %v495_v30 }
 0x3d6   :  { %v497_v15 = vpop.f32.mrf.mxu1 }
 0x3d7   :  { %v498_v37 = vadd.f32 %v2457_v24, %v497_v15 }
 0x3d8   :  { %v2562_v16 = vpop.f32.mrf.mxu1 }
 0x3d9   :  { %v630_v43 = vpack.c.bf16 %v498_v37, %v498_v37 }
 0x3da   :  { %v558_v19 = vpop.f32.mrf.mxu1 }
 0x3db   :  { %v559_v20 = vadd.f32 %v2461_v17, %v558_v19 }
 0x3dc   :  { %v2569_v21 = vpop.f32.mrf.mxu1 }
 0x3dd   :  { %v631_v22 = vpack.c.bf16 %v559_v20, %v559_v20 }
 0x3de   :  { %v561_v25 = vpop.f32.mrf.mxu1 }
 0x3df   :  { %v562_v26 = vadd.f32 %v2461_v17, %v561_v25  ;;  %v641_v27 = vsel %vm250_vm0, %v631_v22, 0 }
 0x3e0   :  { %v2570_v28 = vpop.f32.mrf.mxu1  ;;  %2580 = vmatpush3.bf16.xpose.msra.mxu0 %v641_v27 }
 0x3e1   :  { %v632_v31 = vpack.c.bf16 %v562_v26, %v562_v26  ;;  %2591 = vmatprep.subr.bf16.mxu0 %v3020_v1  ;;  %v2702_v28 = vld [vmem:[#allocation10 + $0x8] sm:$0xff]  }
 0x3e2   :  { %v622_v32 = vpop.f32.mrf.mxu1 }
 0x3e3   :  { %v687_v33 = vsel %vm250_vm0, %v632_v31, 0  ;;  %v623_v34 = vadd.f32 %v2465_v29, %v622_v32 }
 0x3e4   :  { %v2577_v35 = vpop.f32.mrf.mxu1  ;;  %2586 = vmatpush3.bf16.xpose.msra.mxu1 %v687_v33 }
 0x3e5   :  { %v754_v38 = vpack.c.bf16 %v623_v34, %v623_v34  ;;  %2597 = vmatprep.subr.bf16.mxu1 %v3020_v1 }
 0x3e6   :  { %v625_v39 = vpop.f32.mrf.mxu1 }
 0x3e7   :  { %v761_v40 = vsel %vm759_vm4, %v754_v38, 0  ;;  %v626_v41 = vadd.f32 %v2465_v29, %v625_v39  ;;  %2582 = vmatmul.mubr.msk.bf16.vlgmr.msra.gmra.mxu0 %vm250_vm0, %v629_v36  ;;  %v2703_v29 = vld [vmem:[#allocation10] sm:$0xff]   ;;  %v2475_v39 = vld [vmem:[%s3892_s25] ss:$0 sm:$0xff] }
 0x3e8   :  { %v2578_v42 = vpop.f32.mrf.mxu1  ;;  %2592 = vmatpush3.bf16.msra.mxu0 %v761_v40  ;;  %2593 = vmatprep.mubr.msk.bf16.mxu0 %vm3021_vm3, %v3020_v1 }
 0x3e9   :  { %v755_v44 = vpack.c.bf16 %v626_v41, %v626_v41  ;;  %2603 = vmatprep.subr.bf16.mxu0 %v3020_v1 }
 0x3eb   :  { %v807_v45 = vsel %vm759_vm4, %v755_v44, 0  ;;  %2588 = vmatmul.mubr.msk.bf16.vlgmr.msra.gmra.mxu1 %vm250_vm0, %v630_v43 }
 0x3ec   :  { %2598 = vmatpush3.bf16.msra.mxu1 %v807_v45  ;;  %2599 = vmatprep.mubr.msk.bf16.mxu1 %vm3021_vm3, %v3020_v1 }
 0x3ed   :  { %2611 = vmatprep.subr.bf16.mxu1 %v3020_v1 }
 0x4a7   :  { %v677_v55 = vpop.f32.mrf.mxu0 }
 0x4a8   :  { %v678_v56 = vadd.f32 %v677_v55, %v635_v53 }
 0x4a9   :  { %v2583_v57 = vpop.f32.mrf.mxu0 }
 0x4aa   :  { %v730_v58 = vsel %vm729_vm7, %v678_v56, -inf }
 0x4ab   :  { %731 = vmax.xlane.f32.xlu1 %v730_v58  ;;  %v680_v60 = vpop.f32.mrf.mxu0  ;;  %v723_v61 = vpop.f32.mrf.mxu1 }
 0x4ac   :  { %v724_v62 = vadd.f32 %v723_v61, %v636_v59  ;;  %v2704_v59 = vld [vmem:[#allocation12 + $0x8] sm:$0xff]  }
 0x4ad   :  { %v2584_v63 = vpop.f32.mrf.mxu0  ;;  %v2589_v0 = vpop.f32.mrf.mxu1 }
 0x4ae   :  { %v733_v2 = vsel %vm729_vm7, %v724_v62, -inf }
 0x4af   :  { %v726_v3 = vpop.f32.mrf.mxu1  ;;  %734 = vmax.xlane.f32.xlu0 %v733_v2 }
 0x4b1   :  { %v2590_v4 = vpop.f32.mrf.mxu1 }
 0x534   :  { %v732_v7 = vpop.xlane.xlu1 %731 }
 0x535   :  { %v736_v8 = vsub.f32 %v678_v56, %v732_v7  ;;  %v2479_v7 = vld [vmem:[%s3893_s29] ss:$0 sm:$0xff] }
 0x537   :  { %v738_v9 = vmul.f32 1.442695, %v736_v8 }
 0x538   :  { %v735_v10 = vpop.xlane.xlu0 %734 }
 0x539   :  { %2718 = vpow2.f32 %v738_v9  ;;  %v737_v11 = vsub.f32 %v724_v62, %v735_v10 }
 0x53b   :  { %v740_v12 = vmul.f32 1.442695, %v737_v11  ;;  %v2480_v11 = vld [vmem:[%s3894_s3] ss:$0 sm:$0xff] }
 0x53d   :  { %2720 = vpow2.f32 %v740_v12 }
 0x546   :  { %v2719_v14 = vpop.eup %2718 }
 0x547   :  { %v742_v15 = vsel %vm729_vm7, %v2719_v14, 0.0 }
 0x548   :  { %743 = vadd.xlane.f32.xlu1 %v742_v15 }
 0x54a   :  { %v2721_v16 = vpop.eup %2720 }
 0x54b   :  { %v745_v17 = vsel %vm729_vm7, %v2721_v16, 0.0 }
 0x54c   :  { %746 = vadd.xlane.f32.xlu0 %v745_v17  ;;  %v2706_v17 = vld [vmem:[%s3895_s30 + $0x38] sm:$0xff]  }
 0x5d1   :  { %v744_v19 = vpop.xlane.xlu1 %743 }
 0x5d2   :  { %2722 = vrcp.f32 %v744_v19  ;;  %v2707_v19 = vld [vmem:[%s3895_s30 + $0x30] sm:$0xff]  }
 0x5d5   :  { %v747_v20 = vpop.xlane.xlu0 %746 }
 0x5d6   :  { %2724 = vrcp.f32 %v747_v20  ;;  %v2708_v20 = vld [vmem:[%s3895_s30 + $0x28] sm:$0xff]  }
 0x5df   :  { %v2723_v21 = vpop.eup %2722 }
 0x5e0   :  { %v749_v22 = vmul.f32 %v2723_v21, %v2719_v14  ;;  %v2709_v21 = vld [vmem:[%s3895_s30 + $0x20] sm:$0xff]  }
 0x5e2   :  { %v752_v24 = vpack.c.bf16 %v749_v22, %v749_v22  ;;  %v2710_v22 = vld [vmem:[%s3895_s30 + $0x18] sm:$0xff]  }
 0x5e3   :  { %v2725_v25 = vpop.eup %2724 }
 0x5e4   :  { %2594 = vmatmul.mubr.msk.bf16.vlgmr.msra.gmra.mxu0 %vm729_vm7, %v752_v24  ;;  %v751_v26 = vmul.f32 %v2725_v25, %v2721_v16  ;;  %v2711_v24 = vld [vmem:[%s3895_s30 + $0x10] sm:$0xff]   ;;  %v2712_v25 = vld [vmem:[%s3895_s30 + $0x8] sm:$0xff]  }
 0x5e5   :  { %2607 = vmatprep.mubr.msk.bf16.mxu0 %vm3021_vm3, %v3020_v1  ;;  %2604 = vmatpush3.bf16.msra.mxu0 %v2702_v28 }
 0x5e6   :  { %v753_v27 = vpack.c.bf16 %v751_v26, %v751_v26  ;;  %2605 = vmatprep.subr.bf16.mxu0 %v3020_v1  ;;  %v2713_v26 = vld [vmem:[%s3895_s30] sm:$0xff]  }
 0x5e8   :  { %2600 = vmatmul.mubr.msk.bf16.vlgmr.msra.gmra.mxu1 %vm729_vm7, %v753_v27  ;;  %v2481_v27 = vld [vmem:[%s3896_s6] ss:$0 sm:$0xff] }
 0x5e9   :  { %2615 = vmatprep.mubr.msk.bf16.mxu1 %vm3021_vm3, %v3020_v1  ;;  %2606 = vmatpush3.bf16.msra.mxu0 %v2703_v29 }
 0x5ea   :  { %2619 = vmatprep.subr.bf16.mxu0 %v3020_v1  ;;  %2612 = vmatpush3.bf16.msra.mxu1 %v2704_v59 }
 0x5eb   :  { %2613 = vmatprep.subr.bf16.mxu1 %v3020_v1 }
 0x6a4   :  { %v797_v30 = vpop.f32.mrf.mxu0 }
 0x6a6   :  { %v2595_v31 = vpop.f32.mrf.mxu0 }
 0x6a8   :  { %v800_v32 = vpop.f32.mrf.mxu0  ;;  %v843_v33 = vpop.f32.mrf.mxu1 }
 0x6a9   :  { %v849_v34 = vpack.c.bf16 %v843_v33, %v797_v30 }
 0x6aa   :  { %v2596_v35 = vpop.f32.mrf.mxu0  ;;  %v2601_v36 = vpop.f32.mrf.mxu1 }
 0x6ab   :  { %2608 = vmatmul.mubr.msk.bf16.vlgmr.msra.gmra.mxu0 %vm250_vm0, %v849_v34 }
 0x6ac   :  { %v846_v37 = vpop.f32.mrf.mxu1  ;;  %2635 = vmatprep.mubr.msk.bf16.mxu0 %vm3021_vm3, %v3020_v1  ;;  %2620 = vmatpush3.bf16.msra.mxu0 %v2706_v17 }
 0x6ad   :  { %2621 = vmatprep.subr.bf16.mxu0 %v3020_v1 }
 0x6ae   :  { %v2602_v38 = vpop.f32.mrf.mxu1 }
 0x6b0   :  { %2622 = vmatpush3.bf16.msra.mxu0 %v2707_v19 }
 0x6b1   :  { %2623 = vmatprep.subr.bf16.mxu0 %v3020_v1 }
 0x6b4   :  { %2624 = vmatpush3.bf16.msra.mxu0 %v2708_v20 }
 0x6b5   :  { %2625 = vmatprep.subr.bf16.mxu0 %v3020_v1 }
 0x6b8   :  { %2626 = vmatpush3.bf16.msra.mxu0 %v2709_v21 }
 0x6b9   :  { %2627 = vmatprep.subr.bf16.mxu0 %v3020_v1 }
 0x6bc   :  { %2628 = vmatpush3.bf16.msra.mxu0 %v2710_v22 }
 0x6bd   :  { %2629 = vmatprep.subr.bf16.mxu0 %v3020_v1 }
 0x6c0   :  { %2630 = vmatpush3.bf16.msra.mxu0 %v2711_v24  ;;  %v2494_v24 = vld [vmem:[%s3898_s23] ss:$0 sm:$0xff] }
 0x6c1   :  { %2631 = vmatprep.subr.bf16.mxu0 %v3020_v1 }
 0x6c4   :  { %2632 = vmatpush3.bf16.msra.mxu0 %v2712_v25 }
 0x6c5   :  { %2633 = vmatprep.subr.bf16.mxu0 %v3020_v1 }
 0x6c8   :  { %2634 = vmatpush3.bf16.msra.mxu0 %v2713_v26  ;;  %v2495_v26 = vld [vmem:[%s3899_s26] ss:$0 sm:$0xff] }
 0x76b   :  { %v910_v40 = vpop.f32.mrf.mxu0 }
 0x76c   :  { %v911_v41 = vadd.f32 %v2475_v39, %v910_v40 }
 0x76d   :  { %v2609_v42 = vpop.f32.mrf.mxu0 }
 0x76e   :  { %v917_v43 = vadd.f32 %v911_v41, %v3243_v5 }
 0x76f   :  { %v913_v44 = vpop.f32.mrf.mxu0 }
 0x770   :  { %v914_v45 = vadd.f32 %v2475_v39, %v913_v44  ;;  %v921_v46 = vsel %vm250_vm0, %v917_v43, 0.0 }
 0x771   :  { %922 = vadd.xlane.f32.xlu1 %v921_v46  ;;  %v2610_v47 = vpop.f32.mrf.mxu0 }
 0x772   :  { %v918_v48 = vadd.f32 %v914_v45, %v3245_v6  ;;  %v2705_v6 = vld [vmem:[#allocation12] sm:$0xff]  }
 0x773   :  { %2614 = vmatpush3.bf16.msra.mxu1 %v2705_v6 }
 0x774   :  { %v924_v49 = vsel %vm250_vm0, %v918_v48, 0.0 }
 0x775   :  { %925 = vadd.xlane.f32.xlu0 %v924_v49 }
 0x7fa   :  { %v923_v50 = vpop.xlane.xlu1 %922 }
 0x7fb   :  { %v927_v51 = vmul.f32 0.03125, %v923_v50 }
 0x7fd   :  { %v929_v52 = vsub.f32 %v917_v43, %v927_v51 }
 0x7fe   :  { %v926_v53 = vpop.xlane.xlu0 %925 }
 0x7ff   :  { %v928_v54 = vmul.f32 0.03125, %v926_v53  ;;  %v931_v55 = vmul.f32 %v929_v52, %v929_v52 }
 0x801   :  { %v930_v56 = vsub.f32 %v918_v48, %v928_v54  ;;  %v933_v5 = vsel %vm250_vm0, %v931_v55, 0.0 }
 0x802   :  { %934 = vadd.xlane.f32.xlu1 %v933_v5 }
 0x803   :  { %v932_v57 = vmul.f32 %v930_v56, %v930_v56 }
 0x805   :  { %v936_v58 = vsel %vm250_vm0, %v932_v57, 0.0 }
 0x806   :  { %937 = vadd.xlane.f32.xlu0 %v936_v58 }
 0x88b   :  { %v935_v60 = vpop.xlane.xlu1 %934 }
 0x88c   :  { %v939_v61 = vmul.f32 0.03125, %v935_v60 }
 0x88e   :  { %v941_v62 = vadd.f32 1e-12, %v939_v61 }
 0x88f   :  { %v938_v63 = vpop.xlane.xlu0 %937 }
 0x890   :  { %2726 = vrsqrt.f32 %v941_v62  ;;  %v940_v0 = vmul.f32 0.03125, %v938_v63 }
 0x892   :  { %v942_v2 = vadd.f32 1e-12, %v940_v0 }
 0x894   :  { %2728 = vrsqrt.f32 %v942_v2 }
 0x89d   :  { %v2727_v3 = vpop.eup %2726 }
 0x89e   :  { %v945_v4 = vmul.f32 %v2727_v3, %v929_v52  ;;  %v2485_v52 = vld [vmem:[%s3897_s27] ss:$0 sm:$0xff] }
 0x8a0   :  { %v953_v10 = vmul.f32 %v2479_v7, %v945_v4 }
 0x8a1   :  { %v2729_v8 = vpop.eup %2728 }
 0x8a2   :  { %v946_v9 = vmul.f32 %v2729_v8, %v930_v56  ;;  %v961_v14 = vadd.f32 %v2480_v11, %v953_v10  ;;  %v1211_v10 = vld [vmem:[#allocation13 + $0x18] sm:$0xff] }
 0x8a3   :  { %2639 = vmatprep.subr.mxu1 %v1211_v10 }
 0x8a4   :  { %v954_v12 = vmul.f32 %v2479_v7, %v946_v9 }
 0x8a6   :  { %v3310_v15 = vadd.f32 %v2480_v11, %v954_v12  ;;  %v1210_v11 = vld [vmem:[#allocation13 + $0x10] sm:$0xff]  ;;  %v1209_v12 = vld [vmem:[#allocation13 + $0x8] sm:$0xff] }
 0x8a8   :  { %v963_v16 = vpack.c.bf16 %v3310_v15, %v961_v14 }
 0x8aa   :  { %2616 = vmatmul.mubr.msk.bf16.vlgmr.msra.gmra.mxu1 %vm250_vm0, %v963_v16 }
 0x8ab   :  { %2640 = vmatpush3.msra.mxu1 %v1211_v10 }
 0x8ac   :  { %2641 = vmatprep.subr.mxu1 %v1210_v11 }
 0x8ad   :  { %2642 = vmatpush3.msra.mxu1 %v1210_v11 }
 0x8ae   :  { %2643 = vmatprep.subr.mxu1 %v1209_v12 }
 0x8af   :  { %2644 = vmatpush3.msra.mxu1 %v1209_v12 }
 0x96a   :  { %v1024_v28 = vpop.f32.mrf.mxu1 }
 0x96b   :  { %v1025_v29 = vadd.f32 %v2481_v27, %v1024_v28 }
 0x96c   :  { %v2617_v30 = vpop.f32.mrf.mxu1 }
 0x96d   :  { %v1031_v31 = vmul.f32 %v1025_v29, %v1025_v29 }
 0x96e   :  { %v1027_v32 = vpop.f32.mrf.mxu1 }
 0x96f   :  { %v1033_v33 = vmul.f32 %v1031_v31, %v1025_v29  ;;  %v1028_v34 = vadd.f32 %v2481_v27, %v1027_v32 }
 0x970   :  { %v2618_v35 = vpop.f32.mrf.mxu1 }
 0x971   :  { %v1035_v36 = vmul.f32 0.044715, %v1033_v33  ;;  %v1032_v37 = vmul.f32 %v1028_v34, %v1028_v34  ;;  %v2496_v33 = vld [vmem:[%s3900_s1] ss:$0 sm:$0xff] }
 0x972   :  { %v1301_v35 = vld [vmem:[%s3160_s14] sm:$0x1] }
 0x973   :  { %v1037_v38 = vadd.f32 %v1035_v36, %v1025_v29  ;;  %v1034_v39 = vmul.f32 %v1032_v37, %v1028_v34 }
 0x975   :  { %v1039_v40 = vmul.f32 0.7978846, %v1037_v38  ;;  %v1036_v41 = vmul.f32 0.044715, %v1034_v39 }
 0x977   :  { %2730 = vtanh.f32 %v1039_v40  ;;  %v1038_v1 = vadd.f32 %v1036_v41, %v1028_v34 }
 0x979   :  { %v1040_v42 = vmul.f32 0.7978846, %v1038_v1 }
 0x97b   :  { %2732 = vtanh.f32 %v1040_v42  ;;  %v3351_v42 = vld [vmem:[%s3170_s24] sm:$0xff] }
 0x984   :  { %v2731_v43 = vpop.eup %2730 }
 0x985   :  { %v1043_v44 = vadd.f32 1.0, %v2731_v43 }
 0x987   :  { %v1045_v46 = vmul.f32 0.5, %v1043_v44 }
 0x988   :  { %v2733_v45 = vpop.eup %2732 }
 0x989   :  { %v1044_v47 = vadd.f32 1.0, %v2733_v45  ;;  %v1047_v49 = vmul.f32 %v1045_v46, %v1025_v29 }
 0x98b   :  { %v1046_v48 = vmul.f32 0.5, %v1044_v47 }
 0x98d   :  { %v1048_v50 = vmul.f32 %v1046_v48, %v1028_v34 }
 0x98f   :  { %v1049_v51 = vpack.c.bf16 %v1048_v50, %v1047_v49 }
 0x991   :  { %2636 = vmatmul.mubr.bf16.vlgmr.msra.gmra.mxu0 %v1049_v51 }
 0xa51   :  { %v1155_v53 = vpop.f32.mrf.mxu0 }
 0xa52   :  { %v1156_v54 = vadd.f32 %v2485_v52, %v1155_v53 }
 0xa53   :  { %v2637_v55 = vpop.f32.mrf.mxu0 }
 0xa54   :  { %v1162_v56 = vadd.f32 %v1156_v54, %v961_v14  ;;  %v1208_v14 = vld [vmem:[#allocation13] sm:$0xff] }
 0xa55   :  { %v1158_v5 = vpop.f32.mrf.mxu0  ;;  %2645 = vmatprep.subr.mxu1 %v1208_v14 }
 0xa56   :  { %v1159_v57 = vadd.f32 %v2485_v52, %v1158_v5  ;;  %v1166_v58 = vsel %vm250_vm0, %v1162_v56, 0.0  ;;  %2646 = vmatpush3.msra.mxu1 %v1208_v14 }
 0xa57   :  { %1167 = vadd.xlane.f32.xlu1 %v1166_v58  ;;  %v2638_v59 = vpop.f32.mrf.mxu0 }
 0xa58   :  { %v1163_v6 = vadd.f32 %v1159_v57, %v3310_v15 }
 0xa5a   :  { %v1169_v60 = vsel %vm250_vm0, %v1163_v6, 0.0 }
 0xa5b   :  { %1170 = vadd.xlane.f32.xlu0 %v1169_v60 }
 0xae0   :  { %v1168_v61 = vpop.xlane.xlu1 %1167 }
 0xae1   :  { %v1172_v62 = vmul.f32 0.03125, %v1168_v61 }
 0xae3   :  { %v1174_v63 = vsub.f32 %v1162_v56, %v1172_v62  ;;  %v3378_v62 = vsub.s32 1, %v3220_v18 }
 0xae4   :  { %v1171_v0 = vpop.xlane.xlu0 %1170 }
 0xae5   :  { %v1173_v2 = vmul.f32 0.03125, %v1171_v0  ;;  %v1176_v3 = vmul.f32 %v1174_v63, %v1174_v63 }
 0xae7   :  { %v1175_v4 = vsub.f32 %v1163_v6, %v1173_v2  ;;  %v1178_v7 = vsel %vm250_vm0, %v1176_v3, 0.0 }
 0xae8   :  { %1179 = vadd.xlane.f32.xlu1 %v1178_v7 }
 0xae9   :  { %v1177_v8 = vmul.f32 %v1175_v4, %v1175_v4 }
 0xaeb   :  { %v1181_v9 = vsel %vm250_vm0, %v1177_v8, 0.0 }
 0xaec   :  { %1182 = vadd.xlane.f32.xlu0 %v1181_v9 }
 0xb71   :  { %v1180_v15 = vpop.xlane.xlu1 %1179 }
 0xb72   :  { %v1184_v16 = vmul.f32 0.03125, %v1180_v15 }
 0xb74   :  { %v1186_v17 = vadd.f32 1e-12, %v1184_v16 }
 0xb75   :  { %v1183_v19 = vpop.xlane.xlu0 %1182 }
 0xb76   :  { %2734 = vrsqrt.f32 %v1186_v17  ;;  %v1185_v20 = vmul.f32 0.03125, %v1183_v19 }
 0xb78   :  { %v1187_v21 = vadd.f32 1e-12, %v1185_v20 }
 0xb7a   :  { %2736 = vrsqrt.f32 %v1187_v21 }
 0xb83   :  { %v2735_v22 = vpop.eup %2734 }
 0xb84   :  { %v1190_v25 = vmul.f32 %v2735_v22, %v1174_v63 }
 0xb86   :  { %v1198_v27 = vmul.f32 %v2494_v24, %v1190_v25 }
 0xb87   :  { %v2737_v28 = vpop.eup %2736 }
 0xb88   :  { %v1191_v29 = vmul.f32 %v2737_v28, %v1175_v4  ;;  %v1206_v30 = vadd.f32 %v2495_v26, %v1198_v27 }
 0xb8a   :  { %v1199_v31 = vmul.f32 %v2494_v24, %v1191_v29  ;;  %2647 = vmatprep.mubr.msk.f32.mxu1 %vm250_vm0, %v1206_v30 }
 0xb8c   :  { %v1207_v32 = vadd.f32 %v2495_v26, %v1199_v31 }
 0xb8e   :  { %2648 = vmatmul.mubr.msk.f32.vlgmr.msra.gmra.mxu1 %vm250_vm0, %v1207_v32 }
 0xc4e   :  { %v2649_v34 = vpop.f32.mrf.mxu1 }
 0xc4f   :  { %v3342_v36 = vadd.f32 %v2649_v34, %v2496_v33 }
 0xc50   :  { %v1291_v37 = vpop.f32.mrf.mxu1 }
 0xc51   :  { %v3344_v38 = vadd.f32 %v2496_v33, %v1291_v37  ;;  %v1306_v39 = vadd.f32 %v1301_v35, %v3342_v36 }
 0xc53   :  { %v1317_v40 = vrot.slane %v1306_v39, %v3225_v23  ;;  %v1305_v41 = vadd.f32 %v1301_v35, %v3344_v38 }
 0xc55   :  { %1319 = vbcast.lane.b32.xlu0 %v1317_v40, 256  ;;  %v1310_v1 = vrot.slane %v1305_v41, %v3225_v23 }
 0xc57   :  { %1312 = vbcast.lane.b32.xlu1 %v1310_v1, 256 }
 0xcc7   :  { %v1320_v43 = vpop.permute.xlu0 %1319 }
 0xcc8   :  { %v3354_v44 = vadd.f32 %v1320_v43, %v3351_v42 }
 0xcc9   :  { %v1313_v45 = vpop.permute.xlu1 %1312 }
 0xcca   :  { %v1330_v46 = vsel %vm729_vm7, %v3354_v44, -inf  ;;  %v3359_v47 = vadd.f32 %v1313_v45, %v3351_v42 }
 0xccb   :  { %v1331_v48 = vrot.slane %v1330_v46, 4 }
 0xccc   :  { %v1323_v49 = vsel %vm729_vm7, %v3359_v47, -inf }
 0xccd   :  { %v1332_v50 = vmax.f32 %v1330_v46, %v1331_v48  ;;  %v1324_v23 = vrot.slane %v1323_v49, 4 }
 0xccf   :  { %v1333_v51 = vrot.slane %v1332_v50, 2  ;;  %v1325_v52 = vmax.f32 %v1323_v49, %v1324_v23 }
 0xcd1   :  { %v1334_v53 = vmax.f32 %v1332_v50, %v1333_v51  ;;  %v1326_v54 = vrot.slane %v1325_v52, 2 }
 0xcd3   :  { %v1335_v55 = vrot.slane %v1334_v53, 1  ;;  %v1327_v56 = vmax.f32 %v1325_v52, %v1326_v54  ;;  %v3411_v54 = vsub.s32 2, %v3220_v18 }
 0xcd5   :  { %v3363_v5 = vmax.f32 %v1334_v53, %v1335_v55  ;;  %v1328_v57 = vrot.slane %v1327_v56, 1 }
 0xcd7   :  { %v1364_v58 = vsub.f32 %v3354_v44, %v3363_v5  ;;  %v3369_v59 = vmax.f32 %v1327_v56, %v1328_v57  ;;  %v1362_v2 = vadd.f32 %v3363_v5, %v3342_v36 }
 0xcd9   :  { %v1367_v6 = vmul.f32 1.442695, %v1364_v58  ;;  %v1363_v60 = vsub.f32 %v3359_v47, %v3369_v59  ;;  %v1361_v61 = vadd.f32 %v3369_v59, %v3344_v38  ;;  %v1401_v3 = vrot.slane %v1362_v2, %v3378_v62 }
 0xcdb   :  { %2738 = vpow2.f32 %v1367_v6  ;;  %v1365_v63 = vmul.f32 1.442695, %v1363_v60  ;;  %v1394_v0 = vrot.slane %v1361_v61, %v3378_v62 }
 0xcdd   :  { %2740 = vpow2.f32 %v1365_v63  ;;  %1396 = vbcast.lane.b32.xlu1 %v1394_v0, 256 }
 0xce1   :  { %1403 = vbcast.lane.b32.xlu1 %v1401_v3, 256 }
 0xce8   :  { %v2739_v4 = vpop.eup %2738 }
 0xce9   :  { %v1376_v7 = vsel %vm729_vm7, %v2739_v4, 0.0 }
 0xcea   :  { %v2741_v8 = vpop.eup %2740  ;;  %v1377_v9 = vrot.slane %v1376_v7, 4 }
 0xceb   :  { %v1369_v10 = vsel %vm729_vm7, %v2741_v8, 0.0 }
 0xcec   :  { %v1370_v11 = vrot.slane %v1369_v10, 4  ;;  %v1378_v12 = vadd.f32 %v1377_v9, %v1376_v7 }
 0xcee   :  { %v1371_v14 = vadd.f32 %v1370_v11, %v1369_v10  ;;  %v1379_v15 = vrot.slane %v1378_v12, 2 }
 0xcf0   :  { %v1372_v16 = vrot.slane %v1371_v14, 2  ;;  %v1380_v17 = vadd.f32 %v1379_v15, %v1378_v12 }
 0xcf2   :  { %v1373_v19 = vadd.f32 %v1372_v16, %v1371_v14  ;;  %v1381_v20 = vrot.slane %v1380_v17, 1 }
 0xcf4   :  { %v1374_v21 = vrot.slane %v1373_v19, 1  ;;  %v1382_v22 = vadd.f32 %v1381_v20, %v1380_v17 }
 0xcf6   :  { %v1375_v24 = vadd.f32 %v1374_v21, %v1373_v19  ;;  %2742 = vlog2.f32 %v1382_v22  ;;  %v3438_v19 = vsub.s32 3, %v3220_v18 }
 0xcf8   :  { %2744 = vlog2.f32 %v1375_v24 }
 0xd03   :  { %v2743_v25 = vpop.eup %2742 }
 0xd04   :  { %v1386_v26 = vmul.f32 0.6931472, %v2743_v25 }
 0xd05   :  { %v2745_v27 = vpop.eup %2744 }
 0xd06   :  { %v1384_v28 = vmul.f32 0.6931472, %v2745_v27  ;;  %v1388_v29 = vadd.f32 %v1386_v26, %v3363_v5 }
 0xd08   :  { %v1387_v30 = vadd.f32 %v1384_v28, %v3369_v59  ;;  %v3389_v31 = vadd.f32 %v1388_v29, %v3342_v36 }
 0xd0a   :  { %v3392_v32 = vadd.f32 %v1387_v30, %v3344_v38  ;;  %v1457_v33 = vrot.slane %v3389_v31, %v3378_v62 }
 0xd0c   :  { %v1450_v34 = vrot.slane %v3392_v32, %v3378_v62 }
 0xd4f   :  { %v1397_v35 = vpop.permute.xlu1 %1396 }
 0xd50   :  { %v3399_v37 = vadd.f32 %v1397_v35, %v3351_v42 }
 0xd52   :  { %v1407_v39 = vsel %vm729_vm7, %v3399_v37, -inf }
 0xd53   :  { %v1408_v40 = vrot.slane %v1407_v39, 4  ;;  %v1404_v41 = vpop.permute.xlu1 %1403 }
 0xd54   :  { %v3404_v1 = vadd.f32 %v1404_v41, %v3351_v42 }
 0xd55   :  { %v1409_v43 = vmax.f32 %v1407_v39, %v1408_v40 }
 0xd56   :  { %v1414_v45 = vsel %vm729_vm7, %v3404_v1, -inf }
 0xd57   :  { %v1410_v46 = vrot.slane %v1409_v43, 2  ;;  %v1415_v48 = vrot.slane %v1414_v45, 4 }
 0xd59   :  { %v1411_v49 = vmax.f32 %v1409_v43, %v1410_v46  ;;  %v1416_v50 = vmax.f32 %v1414_v45, %v1415_v48 }
 0xd5b   :  { %v1412_v23 = vrot.slane %v1411_v49, 1  ;;  %v1417_v51 = vrot.slane %v1416_v50, 2 }
 0xd5d   :  { %v3408_v52 = vmax.f32 %v1411_v49, %v1412_v23  ;;  %v1418_v53 = vmax.f32 %v1416_v50, %v1417_v51 }
 0xd5f   :  { %vm1421_vm10 = vcmp.ge.f32.partialorder %v3399_v37, %v3408_v52  ;;  %v1419_v55 = vrot.slane %v1418_v53, 1  ;;  %v1445_v56 = vadd.f32 %v3408_v52, %v3344_v38 }
 0xd61   :  { %v3417_v57 = vmax.f32 %v1418_v53, %v1419_v55  ;;  %v1508_v58 = vrot.slane %v1445_v56, %v3411_v54  ;;  %v3465_v53 = vsub.s32 4, %v3220_v18 }
 0xd63   :  { %vm1422_vm11 = vcmp.ge.f32.partialorder %v3404_v1, %v3417_v57  ;;  %1510 = vbcast.lane.b32.xlu0 %v1508_v58, 256  ;;  %v1446_v6 = vadd.f32 %v3417_v57, %v3342_v36 }
 0xd65   :  { %v1515_v60 = vrot.slane %v1446_v6, %v3411_v54 }
 0xd67   :  { %1517 = vbcast.lane.b32.xlu1 %v1515_v60, 256 }
 0xdd5   :  { %v1511_v61 = vpop.permute.xlu0 %1510 }
 0xdd6   :  { %v3426_v63 = vadd.f32 %v1511_v61, %v3351_v42 }
 0xdd8   :  { %v1521_v0 = vsel %vm729_vm7, %v3426_v63, -inf }
 0xdd9   :  { %v1522_v2 = vrot.slane %v1521_v0, 4  ;;  %v1518_v3 = vpop.permute.xlu1 %1517 }
 0xdda   :  { %v3431_v4 = vadd.f32 %v1518_v3, %v3351_v42 }
 0xddb   :  { %v1523_v7 = vmax.f32 %v1521_v0, %v1522_v2 }
 0xddc   :  { %v1528_v8 = vsel %vm729_vm7, %v3431_v4, -inf }
 0xddd   :  { %v1524_v9 = vrot.slane %v1523_v7, 2  ;;  %v1529_v10 = vrot.slane %v1528_v8, 4 }
 0xddf   :  { %v1525_v11 = vmax.f32 %v1523_v7, %v1524_v9  ;;  %v1530_v12 = vmax.f32 %v1528_v8, %v1529_v10 }
 0xde1   :  { %v1526_v14 = vrot.slane %v1525_v11, 1  ;;  %v1531_v15 = vrot.slane %v1530_v12, 2 }
 0xde3   :  { %v3435_v16 = vmax.f32 %v1525_v11, %v1526_v14  ;;  %v1532_v17 = vmax.f32 %v1530_v12, %v1531_v15 }
 0xde5   :  { %vm1535_vm12 = vcmp.ge.f32.partialorder %v3426_v63, %v3435_v16  ;;  %v1533_v20 = vrot.slane %v1532_v17, 1  ;;  %v1559_v21 = vadd.f32 %v3435_v16, %v3344_v38 }
 0xde7   :  { %v3444_v22 = vmax.f32 %v1532_v17, %v1533_v20  ;;  %v1622_v24 = vrot.slane %v1559_v21, %v3438_v19 }
 0xde9   :  { %vm1536_vm13 = vcmp.ge.f32.partialorder %v3431_v4, %v3444_v22  ;;  %1624 = vbcast.lane.b32.xlu0 %v1622_v24, 256  ;;  %v1560_v25 = vadd.f32 %v3444_v22, %v3342_v36 }
 0xdeb   :  { %v1629_v26 = vrot.slane %v1560_v25, %v3438_v19 }
 0xded   :  { %1631 = vbcast.lane.b32.xlu1 %v1629_v26, 256  ;;  %v3492_v26 = vsub.s32 5, %v3220_v18 }
 0xe5b   :  { %v1625_v27 = vpop.permute.xlu0 %1624 }
 0xe5c   :  { %v3453_v28 = vadd.f32 %v1625_v27, %v3351_v42 }
 0xe5e   :  { %v1635_v29 = vsel %vm729_vm7, %v3453_v28, -inf }
 0xe5f   :  { %v1636_v30 = vrot.slane %v1635_v29, 4  ;;  %v1632_v35 = vpop.permute.xlu1 %1631 }
 0xe60   :  { %v3458_v39 = vadd.f32 %v1632_v35, %v3351_v42 }
 0xe61   :  { %v1637_v40 = vmax.f32 %v1635_v29, %v1636_v30 }
 0xe62   :  { %v1642_v41 = vsel %vm729_vm7, %v3458_v39, -inf }
 0xe63   :  { %v1638_v43 = vrot.slane %v1637_v40, 2  ;;  %v1643_v45 = vrot.slane %v1642_v41, 4 }
 0xe65   :  { %v1639_v46 = vmax.f32 %v1637_v40, %v1638_v43  ;;  %v1644_v48 = vmax.f32 %v1642_v41, %v1643_v45 }
 0xe67   :  { %v1640_v49 = vrot.slane %v1639_v46, 1  ;;  %v1645_v50 = vrot.slane %v1644_v48, 2 }
 0xe69   :  { %v3462_v23 = vmax.f32 %v1639_v46, %v1640_v49  ;;  %v1646_v51 = vmax.f32 %v1644_v48, %v1645_v50 }
 0xe6b   :  { %vm1649_vm14 = vcmp.ge.f32.partialorder %v3453_v28, %v3462_v23  ;;  %v1647_v55 = vrot.slane %v1646_v51, 1  ;;  %v1673_v56 = vadd.f32 %v3462_v23, %v3344_v38 }
 0xe6d   :  { %v3471_v58 = vmax.f32 %v1646_v51, %v1647_v55  ;;  %v1736_v6 = vrot.slane %v1673_v56, %v3465_v53 }
 0xe6f   :  { %vm1650_vm15 = vcmp.ge.f32.partialorder %v3458_v39, %v3471_v58  ;;  %1738 = vbcast.lane.b32.xlu0 %v1736_v6, 256  ;;  %v1674_v60 = vadd.f32 %v3471_v58, %v3342_v36 }
 0xe71   :  { %v1743_v61 = vrot.slane %v1674_v60, %v3465_v53 }
 0xe73   :  { %1745 = vbcast.lane.b32.xlu1 %v1743_v61, 256 }
 0xee1   :  { %v1739_v0 = vpop.permute.xlu0 %1738 }
 0xee2   :  { %v3480_v2 = vadd.f32 %v1739_v0, %v3351_v42 }
 0xee4   :  { %v1749_v3 = vsel %vm729_vm7, %v3480_v2, -inf }
 0xee5   :  { %v1750_v7 = vrot.slane %v1749_v3, 4  ;;  %v1746_v8 = vpop.permute.xlu1 %1745 }
 0xee6   :  { %v3485_v9 = vadd.f32 %v1746_v8, %v3351_v42 }
 0xee7   :  { %v1751_v10 = vmax.f32 %v1749_v3, %v1750_v7 }
 0xee8   :  { %v1756_v11 = vsel %vm729_vm7, %v3485_v9, -inf }
 0xee9   :  { %v1752_v12 = vrot.slane %v1751_v10, 2  ;;  %v1757_v14 = vrot.slane %v1756_v11, 4 }
 0xeeb   :  { %v1753_v15 = vmax.f32 %v1751_v10, %v1752_v12  ;;  %v1758_v17 = vmax.f32 %v1756_v11, %v1757_v14 }
 0xeed   :  { %v1754_v20 = vrot.slane %v1753_v15, 1  ;;  %v1759_v21 = vrot.slane %v1758_v17, 2 }
 0xeef   :  { %v3489_v24 = vmax.f32 %v1753_v15, %v1754_v20  ;;  %v1760_v25 = vmax.f32 %v1758_v17, %v1759_v21  ;;  %v3529_v21 = vsub.s32 6, %v3220_v18 }
 0xef1   :  { %vm1763_vm0 = vcmp.ge.f32.partialorder %v3480_v2, %v3489_v24  ;;  %v1761_v27 = vrot.slane %v1760_v25, 1  ;;  %v1787_v29 = vadd.f32 %v3489_v24, %v3344_v38 }
 0xef3   :  { %v3498_v30 = vmax.f32 %v1760_v25, %v1761_v27  ;;  %v1850_v35 = vrot.slane %v1787_v29, %v3492_v26 }
 0xef5   :  { %vm1764_vm1 = vcmp.ge.f32.partialorder %v3485_v9, %v3498_v30  ;;  %1852 = vbcast.lane.b32.xlu0 %v1850_v35, 256  ;;  %v1788_v40 = vadd.f32 %v3498_v30, %v3342_v36 }
 0xef7   :  { %v1857_v41 = vrot.slane %v1788_v40, %v3492_v26 }
 0xef9   :  { %1452 = vbcast.lane.b32.xlu0 %v1450_v34, 256  ;;  %1859 = vbcast.lane.b32.xlu1 %v1857_v41, 256 }
 0xefd   :  { %1459 = vbcast.lane.b32.xlu1 %v1457_v33, 256 }
 0xf67   :  { %v1853_v43 = vpop.permute.xlu0 %1852 }
 0xf68   :  { %v3513_v45 = vadd.f32 %v1853_v43, %v3351_v42 }
 0xf6a   :  { %v1863_v46 = vsel %vm729_vm7, %v3513_v45, -inf }
 0xf6b   :  { %v1864_v48 = vrot.slane %v1863_v46, 4  ;;  %v1453_v49 = vpop.permute.xlu0 %1452  ;;  %v1860_v50 = vpop.permute.xlu1 %1859 }
 0xf6c   :  { %v1461_v51 = vadd.f32 %v1453_v49, %v3351_v42  ;;  %v3519_v32 = vadd.f32 %v1860_v50, %v3351_v42 }
 0xf6d   :  { %v1865_v34 = vmax.f32 %v1863_v46, %v1864_v48 }
 0xf6e   :  { %v1463_v55 = vsel %vm729_vm7, %v1461_v51, -inf  ;;  %v1870_v62 = vsel %vm729_vm7, %v3519_v32, -inf }
 0xf6f   :  { %v1866_v31 = vrot.slane %v1865_v34, 2  ;;  %v1464_v33 = vrot.slane %v1463_v55, 4  ;;  %v1871_v56 = vrot.slane %v1870_v62, 4  ;;  %v1460_v6 = vpop.permute.xlu1 %1459 }
 0xf70   :  { %v1462_v60 = vadd.f32 %v1460_v6, %v3351_v42 }
 0xf71   :  { %v1867_v61 = vmax.f32 %v1865_v34, %v1866_v31  ;;  %v1465_v0 = vmax.f32 %v1463_v55, %v1464_v33  ;;  %v1872_v3 = vmax.f32 %v1870_v62, %v1871_v56 }
 0xf72   :  { %v1470_v7 = vsel %vm729_vm7, %v1462_v60, -inf }
 0xf73   :  { %v1868_v8 = vrot.slane %v1867_v61, 1  ;;  %v1466_v10 = vrot.slane %v1465_v0, 2  ;;  %v1873_v11 = vrot.slane %v1872_v3, 2  ;;  %v1471_v12 = vrot.slane %v1470_v7, 4 }
 0xf75   :  { %v3526_v14 = vmax.f32 %v1867_v61, %v1868_v8  ;;  %v1467_v15 = vmax.f32 %v1465_v0, %v1466_v10  ;;  %v1874_v17 = vmax.f32 %v1872_v3, %v1873_v11  ;;  %v1472_v20 = vmax.f32 %v1470_v7, %v1471_v12 }
 0xf77   :  { %vm1877_vm2 = vcmp.ge.f32.partialorder %v3513_v45, %v3526_v14  ;;  %v1468_v25 = vrot.slane %v1467_v15, 1  ;;  %v1875_v27 = vrot.slane %v1874_v17, 1  ;;  %v1473_v29 = vrot.slane %v1472_v20, 2 }
 0xf78   :  { %v1901_v35 = vadd.f32 %v3526_v14, %v3344_v38 }
 0xf79   :  { %v1469_v40 = vmax.f32 %v1467_v15, %v1468_v25  ;;  %v3535_v41 = vmax.f32 %v1874_v17, %v1875_v27  ;;  %v1474_v43 = vmax.f32 %v1472_v20, %v1473_v29 }
 0xf7a   :  { %v1964_v46 = vrot.slane %v1901_v35, %v3529_v21 }
 0xf7b   :  { %v1477_v48 = vsub.f32 %v1461_v51, %v1469_v40  ;;  %vm1878_vm3 = vcmp.ge.f32.partialorder %v3519_v32, %v3535_v41  ;;  %v1475_v49 = vrot.slane %v1474_v43, 1  ;;  %v1902_v50 = vadd.f32 %v3535_v41, %v3342_v36 }
 0xf7c   :  { %1966 = vbcast.lane.b32.xlu0 %v1964_v46, 256 }
 0xf7d   :  { %v1479_v34 = vmul.f32 1.442695, %v1477_v48  ;;  %v1476_v55 = vmax.f32 %v1474_v43, %v1475_v49  ;;  %v1971_v62 = vrot.slane %v1902_v50, %v3529_v21 }
 0xf7f   :  { %2746 = vpow2.f32 %v1479_v34  ;;  %v1478_v31 = vsub.f32 %v1462_v60, %v1476_v55  ;;  %1973 = vbcast.lane.b32.xlu1 %v1971_v62, 256 }
 0xf81   :  { %v1481_v33 = vmul.f32 1.442695, %v1478_v31 }
 0xf83   :  { %2748 = vpow2.f32 %v1481_v33 }
 0xf8c   :  { %v2747_v56 = vpop.eup %2746 }
 0xf8d   :  { %v1483_v51 = vsel %vm729_vm7, %v2747_v56, 0.0 }
 0xf8e   :  { %v1484_v6 = vrot.slane %v1483_v51, 4 }
 0xf90   :  { %v2749_v61 = vpop.eup %2748  ;;  %v1485_v0 = vadd.f32 %v1484_v6, %v1483_v51 }
 0xf91   :  { %v1490_v3 = vsel %vm729_vm7, %v2749_v61, 0.0 }
 0xf92   :  { %v1486_v7 = vrot.slane %v1485_v0, 2  ;;  %v1491_v8 = vrot.slane %v1490_v3, 4 }
 0xf94   :  { %v1487_v10 = vadd.f32 %v1486_v7, %v1485_v0  ;;  %v1492_v11 = vadd.f32 %v1491_v8, %v1490_v3 }
 0xf96   :  { %v1488_v12 = vrot.slane %v1487_v10, 1  ;;  %v1493_v15 = vrot.slane %v1492_v11, 2 }
 0xf98   :  { %v1489_v17 = vadd.f32 %v1488_v12, %v1487_v10  ;;  %v1494_v20 = vadd.f32 %v1493_v15, %v1492_v11  ;;  %v2499_v15 = vld [vmem:[%s3165_s20] ss:$0 sm:$0xff] }
 0xf9a   :  { %2750 = vlog2.f32 %v1489_v17  ;;  %v1495_v60 = vrot.slane %v1494_v20, 1 }
 0xf9c   :  { %v1496_v25 = vadd.f32 %v1495_v60, %v1494_v20 }
 0xf9e   :  { %2752 = vlog2.f32 %v1496_v25 }
 0xfa7   :  { %v2751_v27 = vpop.eup %2750 }
 0xfa8   :  { %v1498_v29 = vmul.f32 0.6931472, %v2751_v27 }
 0xfaa   :  { %v1501_v35 = vadd.f32 %v1498_v29, %v1469_v40 }
 0xfab   :  { %v2753_v43 = vpop.eup %2752 }
 0xfac   :  { %v1503_v46 = vadd.f32 %v1501_v35, %v3344_v38  ;;  %v1500_v48 = vmul.f32 0.6931472, %v2753_v43 }
 0xfae   :  { %v1564_v49 = vrot.slane %v1503_v46, %v3411_v54  ;;  %v1502_v50 = vadd.f32 %v1500_v48, %v1476_v55 }
 0xfb0   :  { %1566 = vbcast.lane.b32.xlu0 %v1564_v49, 256  ;;  %v1504_v34 = vadd.f32 %v1502_v50, %v3342_v36 }
 0xfb2   :  { %v1571_v62 = vrot.slane %v1504_v34, %v3411_v54 }
 0xfb4   :  { %1573 = vbcast.lane.b32.xlu1 %v1571_v62, 256 }
 0xfee   :  { %v1967_v31 = vpop.permute.xlu0 %1966 }
 0xfef   :  { %v3550_v33 = vadd.f32 %v1967_v31, %v3351_v42 }
 0xff1   :  { %v1977_v40 = vsel %vm729_vm7, %v3550_v33, -inf  ;;  %v1974_v51 = vpop.permute.xlu1 %1973 }
 0xff2   :  { %v1978_v56 = vrot.slane %v1977_v40, 4  ;;  %v3555_v6 = vadd.f32 %v1974_v51, %v3351_v42 }
 0xff4   :  { %v1979_v55 = vmax.f32 %v1977_v40, %v1978_v56  ;;  %v1984_v61 = vsel %vm729_vm7, %v3555_v6, -inf }
 0xff5   :  { %v1985_v54 = vrot.slane %v1984_v61, 4 }
 0xff6   :  { %v1980_v0 = vrot.slane %v1979_v55, 2 }
 0xff7   :  { %v1986_v7 = vmax.f32 %v1984_v61, %v1985_v54 }
 0xff8   :  { %v1981_v3 = vmax.f32 %v1979_v55, %v1980_v0 }
 0xff9   :  { %v1987_v10 = vrot.slane %v1986_v7, 2 }
 0xffa   :  { %v1982_v8 = vrot.slane %v1981_v3, 1 }
 0xffb   :  { %v1988_v12 = vmax.f32 %v1986_v7, %v1987_v10 }
 0xffc   :  { %v3559_v11 = vmax.f32 %v1981_v3, %v1982_v8 }
 0xffd   :  { %v1989_v17 = vrot.slane %v1988_v12, 1 }
 0xffe   :  { %vm1991_vm4 = vcmp.ge.f32.partialorder %v3550_v33, %v3559_v11  ;;  %v2015_v20 = vadd.f32 %v3559_v11, %v3344_v38 }
 0xfff   :  { %v3566_v60 = vmax.f32 %v1988_v12, %v1989_v17 }
0x1000   :  { %v2081_v25 = vadd.f32 %v2499_v15, %v2015_v20 }
0x1001   :  { %vm1992_vm6 = vcmp.ge.f32.partialorder %v3555_v6, %v3566_v60  ;;  %v2016_v29 = vadd.f32 %v3566_v60, %v3342_v36 }
0x1002   :  { %v2084_v27 = vsel %vm2083_vm5, %v2081_v25, -inf }
0x1003   :  { %2085 = vmax.xlane.f32.xlu0 %v2084_v27  ;;  %v2082_v35 = vadd.f32 %v2499_v15, %v2016_v29 }
0x1005   :  { %v2087_v43 = vsel %vm2083_vm5, %v2082_v35, -inf }
0x1006   :  { %2088 = vmax.xlane.f32.xlu1 %v2087_v43 }
0x1022   :  { %v1567_v46 = vpop.permute.xlu0 %1566 }
0x1023   :  { %v1575_v48 = vadd.f32 %v1567_v46, %v3351_v42 }
0x1025   :  { %v1577_v49 = vsel %vm729_vm7, %v1575_v48, -inf }
0x1026   :  { %v1578_v50 = vrot.slane %v1577_v49, 4  ;;  %v1574_v61 = vpop.permute.xlu1 %1573 }
0x1027   :  { %v1576_v0 = vadd.f32 %v1574_v61, %v3351_v42 }
0x1028   :  { %v1579_v34 = vmax.f32 %v1577_v49, %v1578_v50 }
0x1029   :  { %v1584_v54 = vsel %vm729_vm7, %v1576_v0, -inf }
0x102a   :  { %v1580_v62 = vrot.slane %v1579_v34, 2  ;;  %v1585_v8 = vrot.slane %v1584_v54, 4 }
0x102c   :  { %v1581_v31 = vmax.f32 %v1579_v34, %v1580_v62  ;;  %v1586_v15 = vmax.f32 %v1584_v54, %v1585_v8 }
0x102e   :  { %v1582_v40 = vrot.slane %v1581_v31, 1  ;;  %v1587_v27 = vrot.slane %v1586_v15, 2 }
0x1030   :  { %v1583_v56 = vmax.f32 %v1581_v31, %v1582_v40  ;;  %v1588_v46 = vmax.f32 %v1586_v15, %v1587_v27 }
0x1032   :  { %v1591_v51 = vsub.f32 %v1575_v48, %v1583_v56  ;;  %v1589_v48 = vrot.slane %v1588_v46, 1 }
0x1034   :  { %v1593_v55 = vmul.f32 1.442695, %v1591_v51  ;;  %v1590_v49 = vmax.f32 %v1588_v46, %v1589_v48 }
0x1036   :  { %2754 = vpow2.f32 %v1593_v55  ;;  %v1592_v50 = vsub.f32 %v1576_v0, %v1590_v49 }
0x1038   :  { %v1595_v31 = vmul.f32 1.442695, %v1592_v50 }
0x1043   :  { %v2755_v3 = vpop.eup %2754 }
0x1044   :  { %v1597_v7 = vsel %vm729_vm7, %v2755_v3, 0.0 }
0x1045   :  { %v1598_v10 = vrot.slane %v1597_v7, 4 }
0x1047   :  { %v1599_v12 = vadd.f32 %v1598_v10, %v1597_v7 }
0x1049   :  { %v1600_v17 = vrot.slane %v1599_v12, 2 }
0x104b   :  { %v1601_v20 = vadd.f32 %v1600_v17, %v1599_v12 }
0x104d   :  { %v1602_v29 = vrot.slane %v1601_v20, 1 }
0x104f   :  { %v1603_v43 = vadd.f32 %v1602_v29, %v1601_v20 }
0x1051   :  { %2756 = vlog2.f32 %v1603_v43 }
0x1052   :  { %2758 = vpow2.f32 %v1595_v31 }
0x105e   :  { %v2757_v34 = vpop.eup %2756 }
0x105f   :  { %v1612_v62 = vmul.f32 0.6931472, %v2757_v34  ;;  %v2759_v61 = vpop.eup %2758 }
0x1060   :  { %v1604_v54 = vsel %vm729_vm7, %v2759_v61, 0.0 }
0x1061   :  { %v1615_v40 = vadd.f32 %v1612_v62, %v1583_v56  ;;  %v1605_v3 = vrot.slane %v1604_v54, 4 }
0x1063   :  { %v1617_v51 = vadd.f32 %v1615_v40, %v3344_v38  ;;  %v1606_v7 = vadd.f32 %v1605_v3, %v1604_v54 }
0x1065   :  { %v1678_v55 = vrot.slane %v1617_v51, %v3438_v19  ;;  %v1607_v8 = vrot.slane %v1606_v7, 2 }
0x1067   :  { %1680 = vbcast.lane.b32.xlu1 %v1678_v55, 256  ;;  %v1608_v10 = vadd.f32 %v1607_v8, %v1606_v7 }
0x1069   :  { %v1609_v12 = vrot.slane %v1608_v10, 1 }
0x106b   :  { %v1610_v0 = vadd.f32 %v1609_v12, %v1608_v10 }
0x106d   :  { %2760 = vlog2.f32 %v1610_v0 }
0x108c   :  { %v3582_v15 = vpop.xlane.xlu0 %2085 }
0x108d   :  { %vm2090_vm8 = vcmp.ge.f32.partialorder %v2081_v25, %v3582_v15  ;;  %v2761_v25 = vpop.eup %2760 }
0x108e   :  { %v2092_v56 = vsel %vm2090_vm8, %v3212_v13, 8  ;;  %v1614_v34 = vmul.f32 0.6931472, %v2761_v25 }
0x108f   :  { %v2094_v17 = vsel %vm2083_vm5, %v2092_v56, 2147483647  ;;  %v3587_v20 = vpop.xlane.xlu1 %2088 }
0x1090   :  { %v2096_v27 = vshra.s32 %v2094_v17, 16  ;;  %vm2091_vm9 = vcmp.ge.f32.partialorder %v2082_v35, %v3587_v20  ;;  %v1616_v62 = vadd.f32 %v1614_v34, %v1590_v49  ;;  %v2095_v51 = vand.u32 65535, %v2094_v17 }
0x1091   :  { %v2093_v29 = vsel %vm2091_vm9, %v3212_v13, 8 }
0x1092   :  { %v2098_v43 = vcvt.s32.f32 %v2096_v27  ;;  %v2109_v46 = vsel %vm2083_vm5, %v2093_v29, 2147483647  ;;  %v1618_v31 = vadd.f32 %v1616_v62, %v3342_v36  ;;  %v2097_v35 = vcvt.s32.f32 %v2095_v51 }
0x1093   :  { %v2111_v48 = vshra.s32 %v2109_v46, 16  ;;  %v2110_v61 = vand.u32 65535, %v2109_v46 }
0x1094   :  { %2099 = vmin.xlane.f32.xlu0 %v2098_v43  ;;  %v1685_v40 = vrot.slane %v1618_v31, %v3438_v19 }
0x1095   :  { %v2113_v50 = vcvt.s32.f32 %v2111_v48  ;;  %v2112_v7 = vcvt.s32.f32 %v2110_v61 }
0x1098   :  { %2114 = vmin.xlane.f32.xlu0 %v2113_v50 }
0x10ae   :  { %1687 = vbcast.lane.b32.xlu0 %v1685_v40, 256 }
0x10d9   :  { %v1681_v8 = vpop.permute.xlu1 %1680 }
0x10da   :  { %v1689_v19 = vadd.f32 %v1681_v8, %v3351_v42 }
0x10dc   :  { %v1691_v10 = vsel %vm729_vm7, %v1689_v19, -inf }
0x10dd   :  { %v1692_v0 = vrot.slane %v1691_v10, 4 }
0x10df   :  { %v1693_v17 = vmax.f32 %v1691_v10, %v1692_v0 }
0x10e1   :  { %v1694_v29 = vrot.slane %v1693_v17, 2 }
0x10e3   :  { %v1695_v46 = vmax.f32 %v1693_v17, %v1694_v29 }
0x10e5   :  { %v1696_v25 = vrot.slane %v1695_v46, 1 }
0x10e7   :  { %v3604_v34 = vmax.f32 %v1695_v46, %v1696_v25 }
0x10e9   :  { %v1705_v31 = vsub.f32 %v1689_v19, %v3604_v34  ;;  %v1994_v19 = vsel %vm1992_vm6, %v3220_v18, 8 }
0x10ea   :  { %v2005_v0 = vsel %vm729_vm7, %v1994_v19, 2147483647 }
0x10eb   :  { %v1707_v51 = vmul.f32 1.442695, %v1705_v31 }
0x10ed   :  { %2762 = vpow2.f32 %v1707_v51 }
0x111d   :  { %v3594_v55 = vpop.xlane.xlu0 %2099 }
0x111e   :  { %vm2101_vm8 = vcmp.eq.f32.partialorder %v2098_v43, %v3594_v55  ;;  %v2106_v51 = vcvt.f32.s32 %v3594_v55 }
0x111f   :  { %v2102_v54 = vsel %vm2101_vm8, %v2097_v35, inf }
0x1120   :  { %2103 = vmin.xlane.f32.xlu1 %v2102_v54  ;;  %v2107_v19 = vshll.u32 %v2106_v51, 16 }
0x1121   :  { %v3597_v3 = vpop.xlane.xlu0 %2114 }
0x1122   :  { %vm2116_vm9 = vcmp.eq.f32.partialorder %v2113_v50, %v3597_v3 }
0x1123   :  { %v2117_v49 = vsel %vm2116_vm9, %v2112_v7, inf  ;;  %v1993_v7 = vsel %vm1991_vm4, %v3220_v18, 8 }
0x1124   :  { %2118 = vmin.xlane.f32.xlu0 %v2117_v49  ;;  %v2763_v49 = vpop.eup %2762  ;;  %v1995_v8 = vsel %vm729_vm7, %v1993_v7, 2147483647 }
0x1125   :  { %v1688_v12 = vpop.permute.xlu0 %1687  ;;  %v1711_v10 = vsel %vm729_vm7, %v2763_v49, 0.0 }
0x1126   :  { %v1690_v56 = vadd.f32 %v1688_v12, %v3351_v42  ;;  %v1996_v12 = vrot.slane %v1995_v8, 4 }
0x1128   :  { %v1698_v27 = vsel %vm729_vm7, %v1690_v56, -inf  ;;  %vm1997_vm8 = vcmp.lt.s32.totalorder %v1995_v8, %v1996_v12 }
0x1129   :  { %v1699_v43 = vrot.slane %v1698_v27, 4  ;;  %v1998_v33 = vsel %vm1997_vm8, %v1995_v8, %v1996_v12 }
0x112a   :  { %v1999_v46 = vrot.slane %v1998_v33, 2 }
0x112b   :  { %v1700_v48 = vmax.f32 %v1698_v27, %v1699_v43  ;;  %v2006_v27 = vrot.slane %v2005_v0, 4 }
0x112c   :  { %vm2000_vm6 = vcmp.lt.s32.totalorder %v1998_v33, %v1999_v46 }
0x112d   :  { %v1701_v50 = vrot.slane %v1700_v48, 2  ;;  %vm2007_vm4 = vcmp.lt.s32.totalorder %v2005_v0, %v2006_v27 }
0x112e   :  { %v2008_v25 = vsel %vm2007_vm4, %v2005_v0, %v2006_v27 }
0x112f   :  { %v1702_v62 = vmax.f32 %v1700_v48, %v1701_v50  ;;  %v2009_v60 = vrot.slane %v2008_v25, 2 }
0x1131   :  { %v1703_v40 = vrot.slane %v1702_v62, 1  ;;  %vm2010_vm9 = vcmp.lt.s32.totalorder %v2008_v25, %v2009_v60 }
0x1133   :  { %v3607_v35 = vmax.f32 %v1702_v62, %v1703_v40  ;;  %v2001_v62 = vsel %vm2000_vm6, %v1998_v33, %v1999_v46 }
0x1135   :  { %v1706_v61 = vsub.f32 %v1690_v56, %v3607_v35  ;;  %v1712_v56 = vrot.slane %v1711_v10, 4 }
0x1137   :  { %v1709_v54 = vmul.f32 1.442695, %v1706_v61  ;;  %v1713_v29 = vadd.f32 %v1712_v56, %v1711_v10  ;;  %v2002_v61 = vrot.slane %v2001_v62, 1  ;;  %v2121_v10 = vcvt.f32.s32 %v3597_v3 }
0x1139   :  { %2764 = vpow2.f32 %v1709_v54  ;;  %v1714_v43 = vrot.slane %v1713_v29, 2  ;;  %v2011_v54 = vsel %vm2010_vm9, %v2008_v25, %v2009_v60  ;;  %vm2003_vm8 = vcmp.lt.s32.totalorder %v2001_v62, %v2002_v61 }
0x113a   :  { %v2012_v0 = vrot.slane %v2011_v54, 1  ;;  %v2004_v33 = vsel %vm2003_vm8, %v2001_v62, %v2002_v61 }
0x113b   :  { %v1715_v6 = vadd.f32 %v1714_v43, %v1713_v29  ;;  %v2122_v29 = vshll.u32 %v2121_v10, 16 }
0x113c   :  { %vm2013_vm6 = vcmp.lt.s32.totalorder %v2011_v54, %v2012_v0 }
0x113d   :  { %v1716_v31 = vrot.slane %v1715_v6, 1  ;;  %v2014_v25 = vsel %vm2013_vm6, %v2011_v54, %v2012_v0 }
0x113f   :  { %v1717_v7 = vadd.f32 %v1716_v31, %v1715_v6 }
0x1141   :  { %2766 = vlog2.f32 %v1717_v7 }
0x1146   :  { %v2765_v17 = vpop.eup %2764 }
0x1147   :  { %v1718_v11 = vsel %vm729_vm7, %v2765_v17, 0.0 }
0x1148   :  { %v1719_v48 = vrot.slane %v1718_v11, 4 }
0x114a   :  { %v1720_v50 = vadd.f32 %v1719_v48, %v1718_v11 }
0x114c   :  { %v1721_v40 = vrot.slane %v1720_v50, 2 }
0x114e   :  { %v1722_v8 = vadd.f32 %v1721_v40, %v1720_v50  ;;  %v2767_v7 = vpop.eup %2766 }
0x1150   :  { %v1723_v27 = vrot.slane %v1722_v8, 1 }
0x1152   :  { %v1724_v48 = vadd.f32 %v1723_v27, %v1722_v8  ;;  %v1726_v8 = vmul.f32 0.6931472, %v2767_v7 }
0x1154   :  { %2768 = vlog2.f32 %v1724_v48 }
0x1161   :  { %v2769_v54 = vpop.eup %2768 }
0x11a9   :  { %v2104_v49 = vpop.xlane.xlu1 %2103 }
0x11aa   :  { %v2105_v12 = vcvt.f32.s32 %v2104_v49 }
0x11ac   :  { %v3624_v56 = vadd.s32 %v2107_v19, %v2105_v12  ;;  %v1729_v19 = vadd.f32 %v1726_v8, %v3604_v34  ;;  %v1728_v12 = vmul.f32 0.6931472, %v2769_v54 }
0x11ad   :  { %v2119_v17 = vpop.xlane.xlu0 %2118 }
0x11ae   :  { %vm2124_vm4 = vcmp.eq.s32.totalorder %v3212_v13, %v3624_v56  ;;  %v2120_v55 = vcvt.f32.s32 %v2119_v17  ;;  %v1731_v10 = vadd.f32 %v1729_v19, %v3344_v38  ;;  %v1730_v17 = vadd.f32 %v1728_v12, %v3607_v35 }
0x11af   :  { %v2126_v11 = vsel %vm2124_vm4, %v2004_v33, 0  ;;  %v1880_v33 = vsel %vm1878_vm3, %v3220_v18, 8 }
0x11b0   :  { %v3628_v43 = vadd.s32 %v2122_v29, %v2120_v55  ;;  %v2128_v3 = vsel %vm2083_vm5, %v2126_v11, 0  ;;  %v1792_v0 = vrot.slane %v1731_v10, %v3465_v53  ;;  %v1732_v27 = vadd.f32 %v1730_v17, %v3342_v36 }
0x11b1   :  { %v2130_v46 = vshrl.u32 %v2128_v3, 16  ;;  %v2129_v50 = vand.u32 65535, %v2128_v3  ;;  %v1879_v55 = vsel %vm1877_vm2, %v3220_v18, 8  ;;  %v1891_v35 = vsel %vm729_vm7, %v1880_v33, 2147483647 }
0x11b2   :  { %vm2125_vm9 = vcmp.eq.s32.totalorder %v3212_v13, %v3628_v43  ;;  %v1799_v29 = vrot.slane %v1732_v27, %v3465_v53  ;;  %v1881_v34 = vsel %vm729_vm7, %v1879_v55, 2147483647  ;;  %v1892_v3 = vrot.slane %v1891_v35, 4 }
0x11b3   :  { %v2132_v6 = vcvt.s32.f32 %v2130_v46  ;;  %v2127_v60 = vsel %vm2125_vm9, %v2014_v25, 0  ;;  %v2131_v51 = vcvt.s32.f32 %v2129_v50  ;;  %v1882_v11 = vrot.slane %v1881_v34, 4 }
0x11b4   :  { %v2141_v31 = vsel %vm2083_vm5, %v2127_v60, 0  ;;  %vm1893_vm4 = vcmp.lt.s32.totalorder %v1891_v35, %v1892_v3 }
0x11b5   :  { %2135 = vadd.xlane.f32.xlu1 %v2132_v6  ;;  %v2143_v40 = vshrl.u32 %v2141_v31, 16  ;;  %v2142_v61 = vand.u32 65535, %v2141_v31  ;;  %vm1883_vm8 = vcmp.lt.s32.totalorder %v1881_v34, %v1882_v11  ;;  %v1894_v48 = vsel %vm1893_vm4, %v1891_v35, %v1892_v3 }
0x11b6   :  { %v1884_v46 = vsel %vm1883_vm8, %v1881_v34, %v1882_v11  ;;  %v1895_v25 = vrot.slane %v1894_v48, 2 }
0x11b7   :  { %v2145_v62 = vcvt.s32.f32 %v2143_v40  ;;  %v2144_v49 = vcvt.s32.f32 %v2142_v61  ;;  %v1885_v53 = vrot.slane %v1884_v46, 2 }
0x11b8   :  { %vm1896_vm2 = vcmp.lt.s32.totalorder %v1894_v48, %v1895_v25 }
0x11b9   :  { %2148 = vadd.xlane.f32.xlu0 %v2145_v62  ;;  %2133 = vadd.xlane.f32.xlu1 %v2131_v51  ;;  %vm1886_vm6 = vcmp.lt.s32.totalorder %v1884_v46, %v1885_v53  ;;  %v1897_v50 = vsel %vm1896_vm2, %v1894_v48, %v1895_v25 }
0x11ba   :  { %v1887_v45 = vsel %vm1886_vm6, %v1884_v46, %v1885_v53  ;;  %v1898_v51 = vrot.slane %v1897_v50, 1 }
0x11bb   :  { %v1888_v60 = vrot.slane %v1887_v45, 1 }
0x11bc   :  { %vm1899_vm8 = vcmp.lt.s32.totalorder %v1897_v50, %v1898_v51 }
0x11bd   :  { %2146 = vadd.xlane.f32.xlu0 %v2144_v49  ;;  %vm1889_vm3 = vcmp.lt.s32.totalorder %v1887_v45, %v1888_v60  ;;  %v1900_v11 = vsel %vm1899_vm8, %v1897_v50, %v1898_v51 }
0x11be   :  { %v1890_v8 = vsel %vm1889_vm3, %v1887_v45, %v1888_v60 }
0x11ca   :  { %1794 = vbcast.lane.b32.xlu1 %v1792_v0, 256 }
0x11d3   :  { %1801 = vbcast.lane.b32.xlu0 %v1799_v29, 256 }
0x123e   :  { %v2136_v14 = vpop.xlane.xlu1 %2135 }
0x123f   :  { %v2138_v6 = vcvt.f32.s32 %v2136_v14 }
0x1241   :  { %v2139_v41 = vshll.u32 %v2138_v6, 16 }
0x1242   :  { %v2149_v31 = vpop.xlane.xlu0 %2148  ;;  %v2134_v32 = vpop.xlane.xlu1 %2133 }
0x1243   :  { %v2151_v40 = vcvt.f32.s32 %v2149_v31  ;;  %v2137_v62 = vcvt.f32.s32 %v2134_v32 }
0x1245   :  { %v3650_v61 = vadd.s32 %v2139_v41, %v2137_v62  ;;  %v2152_v19 = vshll.u32 %v2151_v40, 16 }
0x1246   :  { %v2147_v7 = vpop.xlane.xlu0 %2146  ;;  %v1795_v49 = vpop.permute.xlu1 %1794 }
0x1247   :  { %vm2154_vm9 = vcmp.eq.s32.totalorder %v3212_v13, %v3650_v61  ;;  %v2150_v54 = vcvt.f32.s32 %v2147_v7  ;;  %v1803_v10 = vadd.f32 %v1795_v49, %v3351_v42 }
0x1248   :  { %v2156_v12 = vsel %vm2154_vm9, %v1890_v8, 0 }
0x1249   :  { %v3655_v0 = vadd.s32 %v2152_v19, %v2150_v54  ;;  %v1805_v17 = vsel %vm729_vm7, %v1803_v10, -inf  ;;  %v2158_v27 = vsel %vm2083_vm5, %v2156_v12, 0 }
0x124a   :  { %v1806_v29 = vrot.slane %v1805_v17, 4  ;;  %v1802_v55 = vpop.permute.xlu0 %1801  ;;  %v2160_v34 = vshrl.u32 %v2158_v27, 16  ;;  %v2159_v35 = vand.u32 65535, %v2158_v27 }
0x124b   :  { %vm2155_vm4 = vcmp.eq.s32.totalorder %v3212_v13, %v3655_v0  ;;  %v1804_v33 = vadd.f32 %v1802_v55, %v3351_v42 }
0x124c   :  { %v1807_v3 = vmax.f32 %v1805_v17, %v1806_v29  ;;  %v2162_v46 = vcvt.s32.f32 %v2160_v34  ;;  %v2157_v53 = vsel %vm2155_vm4, %v1900_v11, 0  ;;  %v2161_v60 = vcvt.s32.f32 %v2159_v35 }
0x124d   :  { %v1812_v48 = vsel %vm729_vm7, %v1804_v33, -inf  ;;  %v2171_v25 = vsel %vm2083_vm5, %v2157_v53, 0 }
0x124e   :  { %v1808_v45 = vrot.slane %v1807_v3, 2  ;;  %v1813_v14 = vrot.slane %v1812_v48, 4  ;;  %2165 = vadd.xlane.f32.xlu1 %v2162_v46  ;;  %v2173_v6 = vshrl.u32 %v2171_v25, 16  ;;  %v2172_v40 = vand.u32 65535, %v2171_v25 }
0x1250   :  { %v1809_v31 = vmax.f32 %v1807_v3, %v1808_v45  ;;  %v1814_v32 = vmax.f32 %v1812_v48, %v1813_v14  ;;  %v2175_v41 = vcvt.s32.f32 %v2173_v6  ;;  %v2174_v7 = vcvt.s32.f32 %v2172_v40 }
0x1252   :  { %v1810_v62 = vrot.slane %v1809_v31, 1  ;;  %v1815_v42 = vrot.slane %v1814_v32, 2  ;;  %2178 = vadd.xlane.f32.xlu0 %v2175_v41  ;;  %2163 = vadd.xlane.f32.xlu1 %v2161_v60 }
0x1254   :  { %v1811_v50 = vmax.f32 %v1809_v31, %v1810_v62  ;;  %v1816_v51 = vmax.f32 %v1814_v32, %v1815_v42 }
0x1256   :  { %v1819_v49 = vsub.f32 %v1803_v10, %v1811_v50  ;;  %v1817_v8 = vrot.slane %v1816_v51, 1  ;;  %2176 = vadd.xlane.f32.xlu0 %v2174_v7 }
0x1258   :  { %v1821_v19 = vmul.f32 1.442695, %v1819_v49  ;;  %v1818_v54 = vmax.f32 %v1816_v51, %v1817_v8  ;;  %v1765_v8 = vsel %vm1763_vm0, %v3220_v18, 8 }
0x125a   :  { %2770 = vpow2.f32 %v1821_v19  ;;  %v1820_v12 = vsub.f32 %v1804_v33, %v1818_v54  ;;  %v1766_v19 = vsel %vm1764_vm1, %v3220_v18, 8 }
0x125c   :  { %v1823_v17 = vmul.f32 1.442695, %v1820_v12 }
0x125e   :  { %2772 = vpow2.f32 %v1823_v17 }
0x1267   :  { %v2771_v27 = vpop.eup %2770 }
0x1268   :  { %v1825_v29 = vsel %vm729_vm7, %v2771_v27, 0.0 }
0x1269   :  { %v1826_v55 = vrot.slane %v1825_v29, 4 }
0x126b   :  { %v2773_v34 = vpop.eup %2772  ;;  %v1827_v11 = vadd.f32 %v1826_v55, %v1825_v29 }
0x126c   :  { %v1832_v35 = vsel %vm729_vm7, %v2773_v34, 0.0 }
0x126d   :  { %v1828_v3 = vrot.slane %v1827_v11, 2  ;;  %v1833_v46 = vrot.slane %v1832_v35, 4 }
0x126f   :  { %v1829_v53 = vadd.f32 %v1828_v3, %v1827_v11  ;;  %v1834_v10 = vadd.f32 %v1833_v46, %v1832_v35 }
0x1271   :  { %v1830_v48 = vrot.slane %v1829_v53, 1  ;;  %v1835_v25 = vrot.slane %v1834_v10, 2 }
0x1273   :  { %v1831_v45 = vadd.f32 %v1830_v48, %v1829_v53  ;;  %v1836_v14 = vadd.f32 %v1835_v25, %v1834_v10 }
0x1275   :  { %2774 = vlog2.f32 %v1831_v45  ;;  %v1837_v33 = vrot.slane %v1836_v14, 1 }
0x1277   :  { %v1838_v6 = vadd.f32 %v1837_v33, %v1836_v14 }
0x1279   :  { %2776 = vlog2.f32 %v1838_v6 }
0x1282   :  { %v2775_v60 = vpop.eup %2774 }
0x1283   :  { %v1840_v31 = vmul.f32 0.6931472, %v2775_v60 }
0x1285   :  { %v1843_v32 = vadd.f32 %v1840_v31, %v1811_v50  ;;  %v1767_v50 = vsel %vm729_vm7, %v1765_v8, 2147483647 }
0x1286   :  { %v2777_v41 = vpop.eup %2776  ;;  %v1768_v12 = vrot.slane %v1767_v50, 4 }
0x1287   :  { %v1845_v40 = vadd.f32 %v1843_v32, %v3344_v38  ;;  %v1842_v62 = vmul.f32 0.6931472, %v2777_v41 }
0x1288   :  { %vm1769_vm6 = vcmp.lt.s32.totalorder %v1767_v50, %v1768_v12 }
0x1289   :  { %v1906_v42 = vrot.slane %v1845_v40, %v3492_v26  ;;  %v1844_v51 = vadd.f32 %v1842_v62, %v1818_v54  ;;  %v1777_v54 = vsel %vm729_vm7, %v1766_v19, 2147483647  ;;  %v1770_v27 = vsel %vm1769_vm6, %v1767_v50, %v1768_v12 }
0x128a   :  { %v1778_v17 = vrot.slane %v1777_v54, 4 }
0x128b   :  { %1908 = vbcast.lane.b32.xlu1 %v1906_v42, 256  ;;  %v1846_v7 = vadd.f32 %v1844_v51, %v3342_v36 }
0x128c   :  { %vm1779_vm2 = vcmp.lt.s32.totalorder %v1777_v54, %v1778_v17 }
0x128d   :  { %v1913_v49 = vrot.slane %v1846_v7, %v3492_v26  ;;  %v1771_v26 = vrot.slane %v1770_v27, 2  ;;  %v1780_v29 = vsel %vm1779_vm2, %v1777_v54, %v1778_v17  ;;  %v3691_v54 = vld [vmem:[%s3170_s24] sm:$0xff] }
0x128e   :  { %v1781_v55 = vrot.slane %v1780_v29, 2 }
0x128f   :  { %1915 = vbcast.lane.b32.xlu0 %v1913_v49, 256  ;;  %vm1772_vm3 = vcmp.lt.s32.totalorder %v1770_v27, %v1771_v26 }
0x1290   :  { %v1773_v2 = vsel %vm1772_vm3, %v1770_v27, %v1771_v26  ;;  %vm1782_vm0 = vcmp.lt.s32.totalorder %v1780_v29, %v1781_v55 }
0x1291   :  { %v1774_v11 = vrot.slane %v1773_v2, 1  ;;  %v1783_v35 = vsel %vm1782_vm0, %v1780_v29, %v1781_v55 }
0x1292   :  { %v1784_v10 = vrot.slane %v1783_v35, 1 }
0x1293   :  { %vm1775_vm1 = vcmp.lt.s32.totalorder %v1773_v2, %v1774_v11 }
0x1294   :  { %v1776_v33 = vsel %vm1775_vm1, %v1773_v2, %v1774_v11  ;;  %vm1785_vm8 = vcmp.lt.s32.totalorder %v1783_v35, %v1784_v10 }
0x1295   :  { %v1786_v41 = vsel %vm1785_vm8, %v1783_v35, %v1784_v10 }
0x12d7   :  { %v2166_v24 = vpop.xlane.xlu1 %2165 }
0x12d8   :  { %v2168_v34 = vcvt.f32.s32 %v2166_v24 }
0x12da   :  { %v2169_v30 = vshll.u32 %v2168_v34, 16 }
0x12db   :  { %v2179_v3 = vpop.xlane.xlu0 %2178  ;;  %v2164_v9 = vpop.xlane.xlu1 %2163 }
0x12dc   :  { %v2181_v46 = vcvt.f32.s32 %v2179_v3  ;;  %v2167_v53 = vcvt.f32.s32 %v2164_v9 }
0x12de   :  { %v3680_v48 = vadd.s32 %v2169_v30, %v2167_v53  ;;  %v2182_v45 = vshll.u32 %v2181_v46, 16 }
0x12df   :  { %v2177_v25 = vpop.xlane.xlu0 %2176 }
0x12e0   :  { %vm2184_vm9 = vcmp.eq.s32.totalorder %v3212_v13, %v3680_v48  ;;  %v2180_v14 = vcvt.f32.s32 %v2177_v25 }
0x12e1   :  { %v2186_v6 = vsel %vm2184_vm9, %v1776_v33, 0 }
0x12e2   :  { %v3684_v60 = vadd.s32 %v2182_v45, %v2180_v14  ;;  %v2188_v31 = vsel %vm2083_vm5, %v2186_v6, 0 }
0x12e3   :  { %v2190_v32 = vshrl.u32 %v2188_v31, 16  ;;  %v2189_v62 = vand.u32 65535, %v2188_v31  ;;  %v1651_v31 = vsel %vm1649_vm14, %v3220_v18, 8 }
0x12e4   :  { %vm2185_vm4 = vcmp.eq.s32.totalorder %v3212_v13, %v3684_v60 }
0x12e5   :  { %v2192_v40 = vcvt.s32.f32 %v2190_v32  ;;  %v2187_v42 = vsel %vm2185_vm4, %v1786_v41, 0  ;;  %v2191_v49 = vcvt.s32.f32 %v2189_v62  ;;  %v1653_v41 = vsel %vm729_vm7, %v1651_v31, 2147483647 }
0x12e6   :  { %v2201_v51 = vsel %vm2083_vm5, %v2187_v42, 0  ;;  %v1654_v42 = vrot.slane %v1653_v41, 4 }
0x12e7   :  { %2195 = vadd.xlane.f32.xlu1 %v2192_v40  ;;  %v2203_v7 = vshrl.u32 %v2201_v51, 16  ;;  %v2202_v50 = vand.u32 65535, %v2201_v51  ;;  %v1652_v40 = vsel %vm1650_vm15, %v3220_v18, 8 }
0x12e8   :  { %v1663_v51 = vsel %vm729_vm7, %v1652_v40, 2147483647  ;;  %vm1655_vm6 = vcmp.lt.s32.totalorder %v1653_v41, %v1654_v42 }
0x12e9   :  { %v2205_v8 = vcvt.s32.f32 %v2203_v7  ;;  %v2204_v19 = vcvt.s32.f32 %v2202_v50  ;;  %v1656_v28 = vsel %vm1655_vm6, %v1653_v41, %v1654_v42 }
0x12eb   :  { %2193 = vadd.xlane.f32.xlu1 %v2191_v49  ;;  %2208 = vadd.xlane.f32.xlu0 %v2205_v8  ;;  %v1664_v8 = vrot.slane %v1663_v51, 4 }
0x12ed   :  { %vm1665_vm14 = vcmp.lt.s32.totalorder %v1663_v51, %v1664_v8 }
0x12ef   :  { %2206 = vadd.xlane.f32.xlu0 %v2204_v19 }
0x12fd   :  { %v1909_v12 = vpop.permute.xlu1 %1908 }
0x12fe   :  { %v1917_v17 = vadd.f32 %v3691_v54, %v1909_v12  ;;  %v1657_v12 = vrot.slane %v1656_v28, 2 }
0x1300   :  { %v1919_v27 = vsel %vm729_vm7, %v1917_v17, -inf  ;;  %vm1658_vm15 = vcmp.lt.s32.totalorder %v1656_v28, %v1657_v12 }
0x1301   :  { %v1916_v26 = vpop.permute.xlu0 %1915  ;;  %v1920_v29 = vrot.slane %v1919_v27, 4 }
0x1302   :  { %v1918_v55 = vadd.f32 %v3691_v54, %v1916_v26 }
0x1303   :  { %v1921_v2 = vmax.f32 %v1919_v27, %v1920_v29  ;;  %v1666_v27 = vsel %vm1665_vm14, %v1663_v51, %v1664_v8  ;;  %v1659_v29 = vsel %vm1658_vm15, %v1656_v28, %v1657_v12 }
0x1304   :  { %v1926_v24 = vsel %vm729_vm7, %v1918_v55, -inf  ;;  %v1667_v58 = vrot.slane %v1666_v27, 2 }
0x1305   :  { %v1922_v34 = vrot.slane %v1921_v2, 2  ;;  %v1927_v11 = vrot.slane %v1926_v24, 4 }
0x1306   :  { %vm1668_vm2 = vcmp.lt.s32.totalorder %v1666_v27, %v1667_v58 }
0x1307   :  { %v1923_v35 = vmax.f32 %v1921_v2, %v1922_v34  ;;  %v1928_v3 = vmax.f32 %v1926_v24, %v1927_v11  ;;  %v1660_v11 = vrot.slane %v1659_v29, 1 }
0x1309   :  { %v1924_v9 = vrot.slane %v1923_v35, 1  ;;  %v1929_v30 = vrot.slane %v1928_v3, 2  ;;  %vm1661_vm3 = vcmp.lt.s32.totalorder %v1659_v29, %v1660_v11 }
0x130b   :  { %v3697_v46 = vmax.f32 %v1923_v35, %v1924_v9  ;;  %v1930_v53 = vmax.f32 %v1928_v3, %v1929_v30  ;;  %v1669_v35 = vsel %vm1668_vm2, %v1666_v27, %v1667_v58 }
0x130d   :  { %v1933_v10 = vsub.f32 %v1917_v17, %v3697_v46  ;;  %v1931_v25 = vrot.slane %v1930_v53, 1 }
0x130f   :  { %v1935_v45 = vmul.f32 1.442695, %v1933_v10  ;;  %v3700_v14 = vmax.f32 %v1930_v53, %v1931_v25 }
0x1311   :  { %2778 = vpow2.f32 %v1935_v45  ;;  %v1934_v33 = vsub.f32 %v1918_v55, %v3700_v14 }
0x1313   :  { %v1937_v6 = vmul.f32 1.442695, %v1934_v33  ;;  %v1670_v33 = vrot.slane %v1669_v35, 1 }
0x1315   :  { %2780 = vpow2.f32 %v1937_v6  ;;  %vm1671_vm1 = vcmp.lt.s32.totalorder %v1669_v35, %v1670_v33 }
0x131e   :  { %v2779_v32 = vpop.eup %2778 }
0x131f   :  { %v1939_v62 = vsel %vm729_vm7, %v2779_v32, 0.0 }
0x1320   :  { %v1940_v7 = vrot.slane %v1939_v62, 4 }
0x1322   :  { %v2781_v49 = vpop.eup %2780  ;;  %v1941_v50 = vadd.f32 %v1940_v7, %v1939_v62  ;;  %v1662_v62 = vsel %vm1661_vm3, %v1659_v29, %v1660_v11 }
0x1323   :  { %v1946_v23 = vsel %vm729_vm7, %v2781_v49, 0.0 }
0x1324   :  { %v1942_v19 = vrot.slane %v1941_v50, 2  ;;  %v1947_v17 = vrot.slane %v1946_v23, 4 }
0x1326   :  { %v1943_v39 = vadd.f32 %v1942_v19, %v1941_v50  ;;  %v1948_v26 = vadd.f32 %v1947_v17, %v1946_v23  ;;  %v1672_v50 = vsel %vm1671_vm1, %v1669_v35, %v1670_v33 }
0x1328   :  { %v1944_v55 = vrot.slane %v1943_v39, 1  ;;  %v1949_v24 = vrot.slane %v1948_v26, 2 }
0x132a   :  { %v1945_v3 = vadd.f32 %v1944_v55, %v1943_v39  ;;  %v1950_v53 = vadd.f32 %v1949_v24, %v1948_v26 }
0x132c   :  { %2782 = vlog2.f32 %v1945_v3  ;;  %v1951_v32 = vrot.slane %v1950_v53, 1 }
0x132e   :  { %v1952_v8 = vadd.f32 %v1951_v32, %v1950_v53  ;;  %v1537_v53 = vsel %vm1535_vm12, %v3220_v18, 8 }
0x1330   :  { %2784 = vlog2.f32 %v1952_v8 }
0x1339   :  { %v2783_v26 = vpop.eup %2782 }
0x133a   :  { %v1954_v55 = vmul.f32 0.6931472, %v2783_v26 }
0x133d   :  { %v2785_v24 = vpop.eup %2784 }
0x133e   :  { %v1956_v11 = vmul.f32 0.6931472, %v2785_v24 }
0x1340   :  { %v1958_v3 = vadd.f32 %v1956_v11, %v3700_v14 }
0x1370   :  { %v2196_v2 = vpop.xlane.xlu1 %2195 }
0x1371   :  { %v2198_v34 = vcvt.f32.s32 %v2196_v2  ;;  %v1957_v2 = vadd.f32 %v1954_v55, %v3697_v46  ;;  %v1539_v46 = vsel %vm729_vm7, %v1537_v53, 2147483647 }
0x1373   :  { %v2199_v10 = vshll.u32 %v2198_v34, 16  ;;  %v1959_v34 = vadd.f32 %v1957_v2, %v3344_v38 }
0x1374   :  { %v2194_v9 = vpop.xlane.xlu1 %2193  ;;  %v2209_v30 = vpop.xlane.xlu0 %2208 }
0x1375   :  { %v2197_v25 = vcvt.f32.s32 %v2194_v9  ;;  %v2211_v45 = vcvt.f32.s32 %v2209_v30  ;;  %v2020_v35 = vrot.slane %v1959_v34, %v3529_v21  ;;  %v1960_v9 = vadd.f32 %v1958_v3, %v3342_v36 }
0x1377   :  { %v3715_v6 = vadd.s32 %v2199_v10, %v2197_v25  ;;  %v2212_v41 = vshll.u32 %v2211_v45, 16  ;;  %v2027_v30 = vrot.slane %v1960_v9, %v3529_v21  ;;  %v1538_v10 = vsel %vm1536_vm13, %v3220_v18, 8 }
0x1378   :  { %v2207_v31 = vpop.xlane.xlu0 %2206  ;;  %v1540_v25 = vrot.slane %v1539_v46, 4  ;;  %v1549_v14 = vsel %vm729_vm7, %v1538_v10, 2147483647 }
0x1379   :  { %vm2214_vm0 = vcmp.eq.s32.totalorder %v3212_v13, %v3715_v6  ;;  %v2210_v40 = vcvt.f32.s32 %v2207_v31  ;;  %v1550_v45 = vrot.slane %v1549_v14, 4 }
0x137a   :  { %v2216_v42 = vsel %vm2214_vm0, %v1662_v62, 0  ;;  %vm1541_vm8 = vcmp.lt.s32.totalorder %v1539_v46, %v1540_v25 }
0x137b   :  { %v3719_v51 = vadd.s32 %v2212_v41, %v2210_v40  ;;  %v2218_v7 = vsel %vm2083_vm5, %v2216_v42, 0  ;;  %v1542_v33 = vsel %vm1541_vm8, %v1539_v46, %v1540_v25  ;;  %vm1551_vm4 = vcmp.lt.s32.totalorder %v1549_v14, %v1550_v45 }
0x137c   :  { %v2220_v49 = vshrl.u32 %v2218_v7, 16  ;;  %v2219_v23 = vand.u32 65535, %v2218_v7  ;;  %v1543_v21 = vrot.slane %v1542_v33, 2  ;;  %v1552_v31 = vsel %vm1551_vm4, %v1549_v14, %v1550_v45 }
0x137d   :  { %vm2215_vm9 = vcmp.eq.s32.totalorder %v3212_v13, %v3719_v51  ;;  %v1553_v32 = vrot.slane %v1552_v31, 2 }
0x137e   :  { %v2222_v28 = vcvt.s32.f32 %v2220_v49  ;;  %v2217_v19 = vsel %vm2215_vm9, %v1672_v50, 0  ;;  %v2221_v27 = vcvt.s32.f32 %v2219_v23  ;;  %vm1544_vm6 = vcmp.lt.s32.totalorder %v1542_v33, %v1543_v21 }
0x137f   :  { %v2231_v12 = vsel %vm2083_vm5, %v2217_v19, 0  ;;  %v1545_v63 = vsel %vm1544_vm6, %v1542_v33, %v1543_v21  ;;  %vm1554_vm12 = vcmp.lt.s32.totalorder %v1552_v31, %v1553_v32  ;;  %vm3901_vm6 = vcmp.ge.f32.partialorder %v3359_v47, %v3369_v59 }
0x1380   :  { %2225 = vadd.xlane.f32.xlu1 %v2222_v28  ;;  %v2233_v17 = vshrl.u32 %v2231_v12, 16  ;;  %v2232_v58 = vand.u32 65535, %v2231_v12  ;;  %v1546_v40 = vrot.slane %v1545_v63, 1  ;;  %v1555_v62 = vsel %vm1554_vm12, %v1552_v31, %v1553_v32 }
0x1381   :  { %v1556_v8 = vrot.slane %v1555_v62, 1  ;;  %vm3902_vm12 = vcmp.ge.f32.partialorder %v3354_v44, %v3363_v5 }
0x1382   :  { %v2235_v39 = vcvt.s32.f32 %v2233_v17  ;;  %v2234_v29 = vcvt.s32.f32 %v2232_v58  ;;  %vm1547_vm13 = vcmp.lt.s32.totalorder %v1545_v63, %v1546_v40 }
0x1383   :  { %v1548_v19 = vsel %vm1547_vm13, %v1545_v63, %v1546_v40  ;;  %vm1557_vm15 = vcmp.lt.s32.totalorder %v1555_v62, %v1556_v8 }
0x1384   :  { %2223 = vadd.xlane.f32.xlu1 %v2221_v27  ;;  %2238 = vadd.xlane.f32.xlu0 %v2235_v39 }
0x1388   :  { %2236 = vadd.xlane.f32.xlu0 %v2234_v29 }
0x1395   :  { %2022 = vbcast.lane.b32.xlu1 %v2020_v35, 256  ;;  %v1558_v35 = vsel %vm1557_vm15, %v1555_v62, %v1556_v8 }
0x139e   :  { %2029 = vbcast.lane.b32.xlu0 %v2027_v30, 256 }
0x1409   :  { %v2226_v16 = vpop.xlane.xlu1 %2225 }
0x140a   :  { %v2228_v41 = vcvt.f32.s32 %v2226_v16 }
0x140c   :  { %v2229_v22 = vshll.u32 %v2228_v41, 16 }
0x140d   :  { %v2224_v42 = vpop.xlane.xlu1 %2223  ;;  %v2239_v4 = vpop.xlane.xlu0 %2238 }
0x140e   :  { %v2227_v7 = vcvt.f32.s32 %v2224_v42  ;;  %v2241_v49 = vcvt.f32.s32 %v2239_v4 }
0x1410   :  { %v3741_v50 = vadd.s32 %v2229_v22, %v2227_v7  ;;  %v2242_v12 = vshll.u32 %v2241_v49, 16 }
0x1411   :  { %v2023_v28 = vpop.permute.xlu1 %2022  ;;  %v2237_v23 = vpop.xlane.xlu0 %2236 }
0x1412   :  { %vm2244_vm14 = vcmp.eq.s32.totalorder %v3212_v13, %v3741_v50  ;;  %v2031_v17 = vadd.f32 %v3691_v54, %v2023_v28  ;;  %v2240_v27 = vcvt.f32.s32 %v2237_v23 }
0x1413   :  { %v2246_v39 = vsel %vm2244_vm14, %v1548_v19, 0 }
0x1414   :  { %v2033_v58 = vsel %vm729_vm7, %v2031_v17, -inf  ;;  %v3747_v26 = vadd.s32 %v2242_v12, %v2240_v27  ;;  %v2248_v29 = vsel %vm2083_vm5, %v2246_v39, 0 }
0x1415   :  { %v2034_v55 = vrot.slane %v2033_v58, 4  ;;  %v2030_v2 = vpop.permute.xlu0 %2029  ;;  %v2250_v24 = vshrl.u32 %v2248_v29, 16  ;;  %v2249_v11 = vand.u32 65535, %v2248_v29 }
0x1416   :  { %vm2245_vm2 = vcmp.eq.s32.totalorder %v3212_v13, %v3747_v26  ;;  %v2032_v34 = vadd.f32 %v3691_v54, %v2030_v2 }
0x1417   :  { %v2035_v3 = vmax.f32 %v2033_v58, %v2034_v55  ;;  %v2252_v9 = vcvt.s32.f32 %v2250_v24  ;;  %v2247_v30 = vsel %vm2245_vm2, %v1558_v35, 0  ;;  %v2251_v45 = vcvt.s32.f32 %v2249_v11 }
0x1418   :  { %v2040_v53 = vsel %vm729_vm7, %v2032_v34, -inf  ;;  %v2261_v46 = vsel %vm2083_vm5, %v2247_v30, 0 }
0x1419   :  { %v2036_v10 = vrot.slane %v2035_v3, 2  ;;  %v2041_v25 = vrot.slane %v2040_v53, 4  ;;  %2255 = vadd.xlane.f32.xlu1 %v2252_v9  ;;  %v2263_v14 = vshrl.u32 %v2261_v46, 16  ;;  %v2262_v32 = vand.u32 65535, %v2261_v46 }
0x141b   :  { %v2037_v33 = vmax.f32 %v2035_v3, %v2036_v10  ;;  %v2042_v21 = vmax.f32 %v2040_v53, %v2041_v25  ;;  %v2265_v31 = vcvt.s32.f32 %v2263_v14  ;;  %v2264_v40 = vcvt.s32.f32 %v2262_v32  ;;  %v2807_v25 = vld [vmem:[%s3165_s20] ss:$0 sm:$0xff] }
0x141d   :  { %v2038_v63 = vrot.slane %v2037_v33, 1  ;;  %v2043_v54 = vrot.slane %v2042_v21, 2  ;;  %2253 = vadd.xlane.f32.xlu1 %v2251_v45  ;;  %2268 = vadd.xlane.f32.xlu0 %v2265_v31 }
0x141f   :  { %v2039_v16 = vmax.f32 %v2037_v33, %v2038_v63  ;;  %v2044_v41 = vmax.f32 %v2042_v21, %v2043_v54  ;;  %v1423_v63 = vsel %vm1421_vm10, %v3220_v18, 8  ;;  %v1424_v54 = vsel %vm1422_vm11, %v3220_v18, 8 }
0x1421   :  { %v2047_v62 = vsub.f32 %v2031_v17, %v2039_v16  ;;  %v2045_v42 = vrot.slane %v2044_v41, 1  ;;  %2266 = vadd.xlane.f32.xlu0 %v2264_v40 }
0x1423   :  { %v2049_v4 = vmul.f32 1.442695, %v2047_v62  ;;  %v2046_v22 = vmax.f32 %v2044_v41, %v2045_v42 }
0x1425   :  { %2786 = vpow2.f32 %v2049_v4  ;;  %v2048_v7 = vsub.f32 %v2032_v34, %v2046_v22 }
0x1427   :  { %v2051_v49 = vmul.f32 1.442695, %v2048_v7 }
0x1429   :  { %2788 = vpow2.f32 %v2051_v49 }
0x1432   :  { %v2787_v8 = vpop.eup %2786 }
0x1433   :  { %v2053_v28 = vsel %vm729_vm7, %v2787_v8, 0.0 }
0x1434   :  { %v2054_v23 = vrot.slane %v2053_v28, 4 }
0x1436   :  { %v2789_v19 = vpop.eup %2788  ;;  %v2055_v12 = vadd.f32 %v2054_v23, %v2053_v28 }
0x1437   :  { %v2060_v27 = vsel %vm729_vm7, %v2789_v19, 0.0 }
0x1438   :  { %v2056_v39 = vrot.slane %v2055_v12, 2  ;;  %v2061_v58 = vrot.slane %v2060_v27, 4 }
0x143a   :  { %v2057_v29 = vadd.f32 %v2056_v39, %v2055_v12  ;;  %v2062_v17 = vadd.f32 %v2061_v58, %v2060_v27 }
0x143c   :  { %v2058_v55 = vrot.slane %v2057_v29, 1  ;;  %v2063_v2 = vrot.slane %v2062_v17, 2 }
0x143e   :  { %v2059_v24 = vadd.f32 %v2058_v55, %v2057_v29  ;;  %v2064_v11 = vadd.f32 %v2063_v2, %v2062_v17 }
0x1440   :  { %2790 = vlog2.f32 %v2059_v24  ;;  %v2065_v34 = vrot.slane %v2064_v11, 1 }
0x1442   :  { %v2066_v35 = vadd.f32 %v2065_v34, %v2064_v11 }
0x1444   :  { %2792 = vlog2.f32 %v2066_v35 }
0x144d   :  { %v2791_v3 = vpop.eup %2790 }
0x144e   :  { %v2068_v9 = vmul.f32 0.6931472, %v2791_v3 }
0x1450   :  { %v2071_v30 = vadd.f32 %v2068_v9, %v2039_v16 }
0x1451   :  { %v2793_v53 = vpop.eup %2792 }
0x1452   :  { %v2073_v46 = vadd.f32 %v2071_v30, %v3344_v38  ;;  %v2070_v10 = vmul.f32 0.6931472, %v2793_v53  ;;  %v1425_v38 = vsel %vm729_vm7, %v1423_v63, 2147483647 }
0x1453   :  { %v1426_v16 = vrot.slane %v1425_v38, 4 }
0x1454   :  { %v2334_v14 = vadd.f32 %v2807_v25, %v2073_v46  ;;  %v2072_v45 = vadd.f32 %v2070_v10, %v2046_v22 }
0x1455   :  { %vm1427_vm3 = vcmp.lt.s32.totalorder %v1425_v38, %v1426_v16 }
0x1456   :  { %v2336_v33 = vsel %vm2083_vm5, %v2334_v14, -inf  ;;  %v2074_v21 = vadd.f32 %v2072_v45, %v3342_v36  ;;  %v1435_v36 = vsel %vm729_vm7, %v1424_v54, 2147483647  ;;  %v1428_v40 = vsel %vm1427_vm3, %v1425_v38, %v1426_v16 }
0x1457   :  { %2337 = vmax.xlane.f32.xlu1 %v2336_v33  ;;  %v1436_v41 = vrot.slane %v1435_v36, 4  ;;  %v1429_v62 = vrot.slane %v1428_v40, 2 }
0x1458   :  { %v2335_v31 = vadd.f32 %v2807_v25, %v2074_v21 }
0x1459   :  { %vm1437_vm0 = vcmp.lt.s32.totalorder %v1435_v36, %v1436_v41  ;;  %vm1430_vm1 = vcmp.lt.s32.totalorder %v1428_v40, %v1429_v62 }
0x145a   :  { %v2339_v32 = vsel %vm2083_vm5, %v2335_v31, -inf  ;;  %v1438_v42 = vsel %vm1437_vm0, %v1435_v36, %v1436_v41  ;;  %v1431_v37 = vsel %vm1430_vm1, %v1428_v40, %v1429_v62 }
0x145b   :  { %2340 = vmax.xlane.f32.xlu0 %v2339_v32  ;;  %v1439_v4 = vrot.slane %v1438_v42, 2  ;;  %v1432_v7 = vrot.slane %v1431_v37, 1 }
0x145d   :  { %vm1440_vm10 = vcmp.lt.s32.totalorder %v1438_v42, %v1439_v4  ;;  %vm1433_vm11 = vcmp.lt.s32.totalorder %v1431_v37, %v1432_v7 }
0x145e   :  { %v1441_v49 = vsel %vm1440_vm10, %v1438_v42, %v1439_v4  ;;  %v1434_v29 = vsel %vm1433_vm11, %v1431_v37, %v1432_v7  ;;  %vm2371_vm10 = vcmp.eq.s32.totalorder %v3212_v13, 1  ;;  %vm2376_vm11 = vcmp.eq.s32.totalorder %v3212_v13, 2 }
0x145f   :  { %v1442_v19 = vrot.slane %v1441_v49, 1 }
0x1461   :  { %vm1443_vm8 = vcmp.lt.s32.totalorder %v1441_v49, %v1442_v19 }
0x1462   :  { %v1444_v11 = vsel %vm1443_vm8, %v1441_v49, %v1442_v19  ;;  %vm2386_vm8 = vcmp.eq.s32.totalorder %v3212_v13, 4 }
0x14a2   :  { %v2256_v52 = vpop.xlane.xlu1 %2255 }
0x14a3   :  { %v2258_v22 = vcvt.f32.s32 %v2256_v52 }
0x14a5   :  { %v2259_v57 = vshll.u32 %v2258_v22, 16 }
0x14a6   :  { %v2254_v8 = vpop.xlane.xlu1 %2253  ;;  %v2269_v1 = vpop.xlane.xlu0 %2268 }
0x14a7   :  { %v2257_v28 = vcvt.f32.s32 %v2254_v8  ;;  %v2271_v23 = vcvt.f32.s32 %v2269_v1 }
0x14a9   :  { %v3772_v12 = vadd.s32 %v2259_v57, %v2257_v28  ;;  %v2272_v39 = vshll.u32 %v2271_v23, 16 }
0x14aa   :  { %v2267_v27 = vpop.xlane.xlu0 %2266 }
0x14ab   :  { %vm2274_vm9 = vcmp.eq.s32.totalorder %v3212_v13, %v3772_v12  ;;  %v2270_v58 = vcvt.f32.s32 %v2267_v27 }
0x14ac   :  { %v2276_v17 = vsel %vm2274_vm9, %v1434_v29, 0  ;;  %vm2381_vm9 = vcmp.eq.s32.totalorder %v3212_v13, 3 }
0x14ad   :  { %v3776_v55 = vadd.s32 %v2272_v39, %v2270_v58  ;;  %v2278_v2 = vsel %vm2083_vm5, %v2276_v17, 0 }
0x14ae   :  { %v2280_v24 = vshrl.u32 %v2278_v2, 16  ;;  %v2279_v35 = vand.u32 65535, %v2278_v2 }
0x14af   :  { %vm2275_vm4 = vcmp.eq.s32.totalorder %v3212_v13, %v3776_v55 }
0x14b0   :  { %v2282_v34 = vcvt.s32.f32 %v2280_v24  ;;  %v2277_v3 = vsel %vm2275_vm4, %v1444_v11, 0  ;;  %v2281_v53 = vcvt.s32.f32 %v2279_v35  ;;  %vm2391_vm4 = vcmp.eq.s32.totalorder %v3212_v13, 5 }
0x14b1   :  { %v2291_v9 = vsel %vm2083_vm5, %v2277_v3, 0 }
0x14b2   :  { %2285 = vadd.xlane.f32.xlu1 %v2282_v34  ;;  %v2293_v30 = vshrl.u32 %v2291_v9, 16  ;;  %v2292_v10 = vand.u32 65535, %v2291_v9 }
0x14b4   :  { %v2295_v46 = vcvt.s32.f32 %v2293_v30  ;;  %v2294_v25 = vcvt.s32.f32 %v2292_v10 }
0x14b6   :  { %2283 = vadd.xlane.f32.xlu1 %v2281_v53  ;;  %2298 = vadd.xlane.f32.xlu0 %v2295_v46 }
0x14ba   :  { %2296 = vadd.xlane.f32.xlu0 %v2294_v25 }
0x14e0   :  { %v3782_v45 = vpop.xlane.xlu1 %2337 }
0x14e1   :  { %v2342_v33 = vsub.f32 %v2334_v14, %v3782_v45  ;;  %v1339_v14 = vsel %vm3901_vm6, %v3220_v18, 8  ;;  %vm2396_vm6 = vcmp.eq.s32.totalorder %v3212_v13, 6 }
0x14e2   :  { %v1341_v40 = vsel %vm729_vm7, %v1339_v14, 2147483647 }
0x14e3   :  { %v2344_v21 = vmul.f32 1.442695, %v2342_v33  ;;  %v1342_v62 = vrot.slane %v1341_v40, 4 }
0x14e4   :  { %v3785_v32 = vpop.xlane.xlu0 %2340 }
0x14e5   :  { %2794 = vpow2.f32 %v2344_v21  ;;  %v2343_v63 = vsub.f32 %v2335_v31, %v3785_v32  ;;  %v1340_v31 = vsel %vm3902_vm12, %v3220_v18, 8  ;;  %vm1343_vm13 = vcmp.lt.s32.totalorder %v1341_v40, %v1342_v62 }
0x14e6   :  { %v1351_v42 = vsel %vm729_vm7, %v1340_v31, 2147483647  ;;  %v1344_v37 = vsel %vm1343_vm13, %v1341_v40, %v1342_v62  ;;  %vm2401_vm12 = vcmp.eq.s32.totalorder %v3212_v13, 7  ;;  %vm2406_vm13 = vcmp.eq.s32.totalorder %v3212_v13, 8 }
0x14e7   :  { %v2346_v38 = vmul.f32 1.442695, %v2343_v63  ;;  %v1352_v4 = vrot.slane %v1351_v42, 4  ;;  %v1345_v52 = vrot.slane %v1344_v37, 2 }
0x14e9   :  { %2796 = vpow2.f32 %v2346_v38  ;;  %vm1353_vm14 = vcmp.lt.s32.totalorder %v1351_v42, %v1352_v4  ;;  %vm1346_vm15 = vcmp.lt.s32.totalorder %v1344_v37, %v1345_v52 }
0x14ea   :  { %v1354_v22 = vsel %vm1353_vm14, %v1351_v42, %v1352_v4  ;;  %v1347_v47 = vsel %vm1346_vm15, %v1344_v37, %v1345_v52 }
0x14eb   :  { %v1355_v7 = vrot.slane %v1354_v22, 2  ;;  %v1348_v8 = vrot.slane %v1347_v47, 1 }
0x14ed   :  { %vm1356_vm2 = vcmp.lt.s32.totalorder %v1354_v22, %v1355_v7  ;;  %vm1349_vm7 = vcmp.lt.s32.totalorder %v1347_v47, %v1348_v8 }
0x14ee   :  { %v1357_v1 = vsel %vm1356_vm2, %v1354_v22, %v1355_v7  ;;  %v1350_v29 = vsel %vm1349_vm7, %v1347_v47, %v1348_v8 }
0x14ef   :  { %v1358_v23 = vrot.slane %v1357_v1, 1 }
0x14f1   :  { %vm1359_vm0 = vcmp.lt.s32.totalorder %v1357_v1, %v1358_v23 }
0x14f2   :  { %v2795_v54 = vpop.eup %2794  ;;  %v1360_v34 = vsel %vm1359_vm0, %v1357_v1, %v1358_v23  ;;  %v2387_v23 = vcvt.s32.f32 %v3715_v6 }
0x14f3   :  { %v2348_v16 = vsel %vm2083_vm5, %v2795_v54, 0.0 }
0x14f4   :  { %2349 = vadd.xlane.f32.xlu1 %v2348_v16 }
0x14f6   :  { %v2797_v36 = vpop.eup %2796 }
0x14f7   :  { %v2351_v41 = vsel %vm2083_vm5, %v2797_v36, 0.0 }
0x14f8   :  { %2352 = vadd.xlane.f32.xlu0 %v2351_v41 }
0x153b   :  { %v2286_v59 = vpop.xlane.xlu1 %2285 }
0x153c   :  { %v2288_v49 = vcvt.f32.s32 %v2286_v59 }
0x153e   :  { %v2289_v18 = vshll.u32 %v2288_v49, 16 }
0x153f   :  { %v2284_v57 = vpop.xlane.xlu1 %2283  ;;  %v2299_v44 = vpop.xlane.xlu0 %2298 }
0x1540   :  { %v2287_v5 = vcvt.f32.s32 %v2284_v57  ;;  %v2301_v28 = vcvt.f32.s32 %v2299_v44  ;;  %v2377_v57 = vcvt.s32.f32 %v3772_v12 }
0x1542   :  { %v3800_v19 = vadd.s32 %v2289_v18, %v2287_v5  ;;  %v2302_v39 = vshll.u32 %v2301_v28, 16  ;;  %v2397_v5 = vcvt.s32.f32 %v3650_v61  ;;  %v2382_v28 = vcvt.s32.f32 %v3741_v50 }
0x1543   :  { %v2297_v27 = vpop.xlane.xlu0 %2296  ;;  %v2378_v50 = vcvt.s32.f32 %v3776_v55 }
0x1544   :  { %vm2304_vm3 = vcmp.eq.s32.totalorder %v3212_v13, %v3800_v19  ;;  %v2300_v58 = vcvt.f32.s32 %v2297_v27  ;;  %v2372_v1 = vcvt.s32.f32 %v3800_v19  ;;  %v2392_v27 = vcvt.s32.f32 %v3680_v48 }
0x1545   :  { %v2306_v17 = vsel %vm2304_vm3, %v1350_v29, 0  ;;  %v2383_v48 = vcvt.s32.f32 %v3747_v26  ;;  %v2393_v26 = vcvt.s32.f32 %v3684_v60 }
0x1546   :  { %v3804_v2 = vadd.s32 %v2302_v39, %v2300_v58  ;;  %v2308_v24 = vsel %vm2083_vm5, %v2306_v17, 0 }
0x1547   :  { %v2310_v11 = vshrl.u32 %v2308_v24, 16  ;;  %v2309_v9 = vand.u32 65535, %v2308_v24 }
0x1548   :  { %vm2305_vm1 = vcmp.eq.s32.totalorder %v3212_v13, %v3804_v2  ;;  %v2373_v39 = vcvt.s32.f32 %v3804_v2  ;;  %v2388_v2 = vcvt.s32.f32 %v3719_v51 }
0x1549   :  { %v2312_v35 = vcvt.s32.f32 %v2310_v11  ;;  %v2307_v3 = vsel %vm2305_vm1, %v1360_v34, 0  ;;  %v2311_v10 = vcvt.s32.f32 %v2309_v9 }
0x154a   :  { %v2321_v30 = vsel %vm2083_vm5, %v2307_v3, 0  ;;  %vm2366_vm5 = vcmp.eq.s32.totalorder %v3212_v13, 0  ;;  %v2398_v3 = vcvt.s32.f32 %v3655_v0 }
0x154b   :  { %2315 = vadd.xlane.f32.xlu1 %v2312_v35  ;;  %v2323_v53 = vshrl.u32 %v2321_v30, 16  ;;  %v2322_v25 = vand.u32 65535, %v2321_v30  ;;  %v2403_v30 = vcvt.s32.f32 %v3628_v43 }
0x154d   :  { %v2325_v46 = vcvt.s32.f32 %v2323_v53  ;;  %v2324_v33 = vcvt.s32.f32 %v2322_v25 }
0x154f   :  { %2328 = vadd.xlane.f32.xlu0 %v2325_v46  ;;  %2313 = vadd.xlane.f32.xlu1 %v2311_v10 }
0x1553   :  { %2326 = vadd.xlane.f32.xlu0 %v2324_v33 }
0x157d   :  { %v2350_v21 = vpop.xlane.xlu1 %2349 }
0x157e   :  { %2798 = vlog2.f32 %v2350_v21 }
0x1581   :  { %v2353_v63 = vpop.xlane.xlu0 %2352 }
0x1582   :  { %2800 = vlog2.f32 %v2353_v63 }
0x158b   :  { %v2799_v38 = vpop.eup %2798 }
0x158c   :  { %v2355_v54 = vmul.f32 0.6931472, %v2799_v38 }
0x158e   :  { %v2358_v36 = vadd.f32 %v2355_v54, %v3782_v45 }
0x158f   :  { %v2801_v16 = vpop.eup %2800 }
0x1590   :  { %v2357_v41 = vmul.f32 0.6931472, %v2801_v16  ;;  %v2360_v14 = vsub.f32 %v3582_v15, %v2358_v36 }
0x1592   :  { %v2359_v40 = vadd.f32 %v2357_v41, %v3785_v32  ;;  %v2362_v31 = vmul.f32 1.442695, %v2360_v14 }
0x1594   :  { %v2361_v42 = vsub.f32 %v3587_v20, %v2359_v40  ;;  %2802 = vpow2.f32 %v2362_v31  ;;  %v2402_v20 = vcvt.s32.f32 %v3624_v56 }
0x1596   :  { %v2364_v22 = vmul.f32 1.442695, %v2361_v42 }
0x1598   :  { %2804 = vpow2.f32 %v2364_v22 }
0x15a1   :  { %v2803_v55 = vpop.eup %2802 }
0x15a5   :  { %v2805_v46 = vpop.eup %2804 }
0x15d4   :  { %v2316_v62 = vpop.xlane.xlu1 %2315 }
0x15d5   :  { %v2318_v4 = vcvt.f32.s32 %v2316_v62 }
0x15d7   :  { %v2319_v7 = vshll.u32 %v2318_v4, 16 }
0x15d8   :  { %v2329_v37 = vpop.xlane.xlu0 %2328  ;;  %v2314_v52 = vpop.xlane.xlu1 %2313 }
0x15d9   :  { %v2331_v47 = vcvt.f32.s32 %v2329_v37  ;;  %v2317_v59 = vcvt.f32.s32 %v2314_v52 }
0x15db   :  { %v2320_v49 = vadd.s32 %v2319_v7, %v2317_v59  ;;  %v2332_v45 = vshll.u32 %v2331_v47, 16 }
0x15dc   :  { %v2327_v15 = vpop.xlane.xlu0 %2326 }
0x15dd   :  { %v2367_v32 = vcvt.s32.f32 %v2320_v49  ;;  %v2330_v8 = vcvt.f32.s32 %v2327_v15 }
0x15df   :  { %v2369_v44 = vsel %vm2366_vm5, %v2367_v32, 0.0  ;;  %v2333_v18 = vadd.s32 %v2332_v45, %v2330_v8 }
0x15e0   :  { %v2374_v56 = vsel %vm2371_vm10, %v2372_v1, %v2369_v44 }
0x15e1   :  { %v2379_v12 = vsel %vm2376_vm11, %v2377_v57, %v2374_v56  ;;  %v2368_v19 = vcvt.s32.f32 %v2333_v18 }
0x15e2   :  { %v2384_v61 = vsel %vm2381_vm9, %v2382_v28, %v2379_v12 }
0x15e3   :  { %v2389_v6 = vsel %vm2386_vm8, %v2387_v23, %v2384_v61  ;;  %v2370_v58 = vsel %vm2366_vm5, %v2368_v19, 0.0 }
0x15e4   :  { %v2394_v29 = vsel %vm2391_vm4, %v2392_v27, %v2389_v6  ;;  %v2375_v17 = vsel %vm2371_vm10, %v2373_v39, %v2370_v58 }
0x15e5   :  { %v2399_v24 = vsel %vm2396_vm6, %v2397_v5, %v2394_v29  ;;  %v2380_v11 = vsel %vm2376_vm11, %v2378_v50, %v2375_v17 }
0x15e6   :  { %v2404_v34 = vsel %vm2401_vm12, %v2402_v20, %v2399_v24  ;;  %v2385_v35 = vsel %vm2381_vm9, %v2383_v48, %v2380_v11 }
0x15e7   :  { %v2407_v51 = vsel %vm2406_vm13, %v2803_v55, %v2404_v34  ;;  %v2390_v9 = vsel %vm2386_vm8, %v2388_v2, %v2385_v35 }
0x15e8   :  { %2409 = vst [vmem:[%s3175_s4 - $0x7] sm:$0x80] %v2407_v51  ;;  %v2395_v60 = vsel %vm2391_vm4, %v2393_v26, %v2390_v9 }
0x15e9   :  { %v2400_v53 = vsel %vm2396_vm6, %v2398_v3, %v2395_v60 }
0x15ea   :  { %v2405_v10 = vsel %vm2401_vm12, %v2403_v30, %v2400_v53 }
0x15eb   :  { %v2408_v0 = vsel %vm2406_vm13, %v2805_v46, %v2405_v10 }
0x15ec   :  { %2410 = vst [vmem:[%s3175_s4 - $0x6] sm:$0x80] %v2408_v0 }
0x15ed   :  { %2415 = vsyncpa [#allocation3], 1 }
0x15ee   :  { %2416 = vsyncpa [#allocation5], 1 }
0x15ef   :  { %2417 = vsyncpa [#allocation8], 1 }
0x15f0   :  { %2418 = vsyncpa [#allocation11], 1 }
0x15f1   :  { %2419 = vsyncpa [#allocation14], 1 }

</bundles_post_ra>
